<compile_context>
chip_gen: v6e
topology: v6e:2x2x1
jax: 0.10.0
libtpu: 0.0.40
codegen_flags: <defaults>
</compile_context>

<pallas_src>
import jax
import jax.numpy as jnp
import numpy as np
from jax import lax
from jax.experimental import pallas as pl
from jax.experimental.pallas import tpu as pltpu


# ----------------------------- Pallas kernels -------------------------------

def _bilstm_kernel(x_ref, m_ref,
                   wih_f_ref, whh_f_ref, b_f_ref,
                   wih_b_ref, whh_b_ref, b_b_ref,
                   y_ref,
                   hf_sc, cf_sc, hb_sc, cb_sc, fwd_buf):
    """Fused bidirectional LSTM recurrence in a single grid step.

    x_ref:   (T, B, H)   time-major embeddings (resident in VMEM)
    m_ref:   (T, B, 1)   validity mask (1.0 valid / 0.0 padding)
    w*_ref:  (H, 4H)     fused gate weights, PyTorch gate order i|f|g|o on lanes
    b*_ref:  (1, 4H)     fused gate bias (b_ih + b_hh)
    y_ref:   (T, B, 2H)  output: forward half [:, :, :H], backward half [:, :, H:]
    """
    T, B, H = x_ref.shape

    hf_sc[...] = jnp.zeros_like(hf_sc)
    cf_sc[...] = jnp.zeros_like(cf_sc)
    hb_sc[...] = jnp.zeros_like(hb_sc)
    cb_sc[...] = jnp.zeros_like(cb_sc)

    def cell(x, valid, h_prev, c_prev, wih, whh, b):
        # one fused matmul per operand; gates laid out [i | f | g | o] on lanes
        gates = (jnp.dot(x, wih, preferred_element_type=jnp.float32)
                 + jnp.dot(h_prev, whh, preferred_element_type=jnp.float32)
                 + b)
        i = jax.nn.sigmoid(gates[:, 0 * H:1 * H])
        f = jax.nn.sigmoid(gates[:, 1 * H:2 * H])
        g = jnp.tanh(gates[:, 2 * H:3 * H])
        o = jax.nn.sigmoid(gates[:, 3 * H:4 * H])
        c_new = f * c_prev + i * g
        h_new = o * jnp.tanh(c_new)
        # packed-sequence semantics: padded steps freeze state and emit zeros
        h_next = jnp.where(valid, h_new, h_prev)
        c_next = jnp.where(valid, c_new, c_prev)
        y = jnp.where(valid, h_new, jnp.zeros_like(h_new))
        return h_next, c_next, y

    def fwd_step(t, carry):
        valid = m_ref[t] > 0.0
        h, c, y = cell(x_ref[t], valid, hf_sc[...], cf_sc[...],
                       wih_f_ref[...], whh_f_ref[...], b_f_ref[...])
        hf_sc[...] = h
        cf_sc[...] = c
        fwd_buf[t] = y
        return carry

    lax.fori_loop(0, T, fwd_step, 0, unroll=True)

    def bwd_step(s, carry):
        t = T - 1 - s
        valid = m_ref[t] > 0.0
        h, c, y = cell(x_ref[t], valid, hb_sc[...], cb_sc[...],
                       wih_b_ref[...], whh_b_ref[...], b_b_ref[...])
        hb_sc[...] = h
        cb_sc[...] = c
        # lane-dense (B, 2H) row store: fwd half from scratch, bwd half just computed
        y_ref[t] = jnp.concatenate([fwd_buf[t], y], axis=-1).astype(y_ref.dtype)
        return carry

    lax.fori_loop(0, T, bwd_step, 0, unroll=True)


def _linear_kernel(x_ref, w_ref, b_ref, o_ref):
    o_ref[...] = (jnp.dot(x_ref[...], w_ref[...],
                          preferred_element_type=jnp.float32)
                  + b_ref[...]).astype(o_ref.dtype)


# ------------------------------ wrappers -------------------------------------

def _run_bilstm(x_tbh, mask_tb1, p):
    T, B, H = x_tbh.shape
    return pl.pallas_call(
        _bilstm_kernel,
        out_shape=jax.ShapeDtypeStruct((T, B, 2 * H), jnp.float32),
        grid=(1,),
        in_specs=[
            pl.BlockSpec((T, B, H), lambda i: (0, 0, 0)),      # x, time-major
            pl.BlockSpec((T, B, 1), lambda i: (0, 0, 0)),      # mask
            pl.BlockSpec((H, 4 * H), lambda i: (0, 0)),        # W_ih^T fwd
            pl.BlockSpec((H, 4 * H), lambda i: (0, 0)),        # W_hh^T fwd
            pl.BlockSpec((1, 4 * H), lambda i: (0, 0)),        # bias fwd
            pl.BlockSpec((H, 4 * H), lambda i: (0, 0)),        # W_ih^T bwd
            pl.BlockSpec((H, 4 * H), lambda i: (0, 0)),        # W_hh^T bwd
            pl.BlockSpec((1, 4 * H), lambda i: (0, 0)),        # bias bwd
        ],
        out_specs=pl.BlockSpec((T, B, 2 * H), lambda i: (0, 0, 0)),
        scratch_shapes=[pltpu.VMEM((B, H), jnp.float32),       # h fwd
                        pltpu.VMEM((B, H), jnp.float32),       # c fwd
                        pltpu.VMEM((B, H), jnp.float32),       # h bwd
                        pltpu.VMEM((B, H), jnp.float32),       # c bwd
                        pltpu.VMEM((T, B, H), jnp.float32)],   # fwd outputs buffer
        compiler_params=pltpu.CompilerParams(
            dimension_semantics=("arbitrary",)),
    )(x_tbh, mask_tb1, p["wih_f"], p["whh_f"], p["b_f"],
      p["wih_b"], p["whh_b"], p["b_b"])


def _linear(x, w, b):
    # Single-block Linear; trivially fits VMEM at these sizes.
    # TODO(synk): tile the M axis (128-512 rows, parallel grid) once B*T grows.
    M, K = x.shape
    _, N = w.shape
    return pl.pallas_call(
        _linear_kernel,
        out_shape=jax.ShapeDtypeStruct((M, N), jnp.float32),
        grid=(1,),
        in_specs=[pl.BlockSpec((M, K), lambda i: (0, 0)),
                  pl.BlockSpec((K, N), lambda i: (0, 0)),
                  pl.BlockSpec((1, N), lambda i: (0, 0))],
        out_specs=pl.BlockSpec((M, N), lambda i: (0, 0)),
        compiler_params=pltpu.CompilerParams(
            dimension_semantics=("arbitrary",)),
    )(x, w, b)


@jax.jit
def bilstm_forward(params, x_ids, batch_seq_len):
    """x_ids: (B, T) int32 token ids. batch_seq_len: (B,) valid lengths.
    Returns (B, T, output_size) logits (positions past each length are
    Linear(0) = bias, matching PyTorch's Linear after pad_packed_sequence).
    Assumes max(batch_seq_len) == T so the padded output length equals T."""
    B, T = x_ids.shape
    H = params["embedding"].shape[1]

    # Embedding lookup directly into time-major layout (glue, plain JAX)
    x_tbh = params["embedding"][x_ids.T].astype(jnp.float32)            # (T, B, H)

    mask = (jnp.arange(T)[None, :] < batch_seq_len[:, None]).astype(jnp.float32)  # (B, T)
    mask_tb1 = jnp.transpose(mask)[:, :, None]                          # (T, B, 1)

    y = _run_bilstm(x_tbh, mask_tb1, params)                            # (T, B, 2H)
    flat = y.reshape(T * B, 2 * H)                                      # free merge
    logits = _linear(flat, params["w_out_t"], params["b_out"])          # (T*B, O)
    return jnp.transpose(logits.reshape(T, B, -1), (1, 0, 2))           # (B, T, O)


# ------------------------- pure-JAX reference --------------------------------

def _ref_lstm_dir(x_tbh, mask_tb1, w_ih, w_hh, bias, reverse):
    T, B, H = x_tbh.shape
    h = jnp.zeros((B, H), jnp.float32)
    c = jnp.zeros((B, H), jnp.float32)
    outs = [None] * T
    order = reversed(range(T)) if reverse else range(T)
    for t in order:
        x = x_tbh[t]
        m = mask_tb1[t]
        gates = x @ w_ih + h @ w_hh + bias                  # (B, 4H)
        i = jax.nn.sigmoid(gates[:, 0 * H:1 * H])
        f = jax.nn.sigmoid(gates[:, 1 * H:2 * H])
        g = jnp.tanh(gates[:, 2 * H:3 * H])
        o = jax.nn.sigmoid(gates[:, 3 * H:4 * H])
        c_new = f * c + i * g
        h_new = o * jnp.tanh(c_new)
        h = m * h_new + (1.0 - m) * h
        c = m * c_new + (1.0 - m) * c
        outs[t] = m * h_new
    return jnp.stack(outs, axis=0)


def bilstm_forward_ref(params, x_ids, batch_seq_len):
    B, T = x_ids.shape
    H = params["embedding"].shape[1]
    x_tbh = params["embedding"][x_ids.T].astype(jnp.float32)
    mask = (jnp.arange(T)[None, :] < batch_seq_len[:, None]).astype(jnp.float32)
    mask_tb1 = jnp.transpose(mask)[:, :, None]
    out_f = _ref_lstm_dir(x_tbh, mask_tb1, params["wih_f"], params["whh_f"],
                          params["b_f"], False)
    out_b = _ref_lstm_dir(x_tbh, mask_tb1, params["wih_b"], params["whh_b"],
                          params["b_b"], True)
    out = jnp.transpose(jnp.concatenate([out_f, out_b], axis=-1), (1, 0, 2))
    flat = out.reshape(B * T, 2 * H)
    return (flat @ params["w_out_t"] + params["b_out"]).reshape(B, T, -1)


# ------------------------------ param init -----------------------------------

def init_params(key, vocab_size, hidden_size, output_size):
    H = hidden_size
    ks = jax.random.split(key, 11)
    s = 1.0 / np.sqrt(H)

    def u(k, shape):
        return jax.random.uniform(k, shape, jnp.float32, -s, s)

    # PyTorch LSTM weight shapes: W_ih (4H, H), W_hh (4H, H), biases (4H,)
    # Kernel layout: transposed + gate-fused -> (H, 4H), bias (1, 4H).
    def make_dir(k0, k1, k2, k3):
        w_ih = u(k0, (4 * H, H))
        w_hh = u(k1, (4 * H, H))
        b = u(k2, (4 * H,)) + u(k3, (4 * H,))               # b_ih + b_hh fused
        return w_ih.T, w_hh.T, b.reshape(1, 4 * H)

    wih_f, whh_f, b_f = make_dir(ks[0], ks[1], ks[2], ks[3])
    wih_b, whh_b, b_b = make_dir(ks[4], ks[5], ks[6], ks[7])

    embedding = jax.random.normal(ks[8], (vocab_size, H), jnp.float32)

    so = 1.0 / np.sqrt(2 * H)
    w_out = jax.random.uniform(ks[9], (output_size, 2 * H), jnp.float32, -so, so)
    b_out = jax.random.uniform(ks[10], (output_size,), jnp.float32, -so, so)

    return dict(embedding=embedding,
                wih_f=wih_f, whh_f=whh_f, b_f=b_f,
                wih_b=wih_b, whh_b=whh_b, b_b=b_b,
                w_out_t=w_out.T, b_out=b_out.reshape(1, output_size))


# --------------------------------- main ---------------------------------------

if __name__ == "__main__":
    key = jax.random.PRNGKey(0)
    vocab_size, hidden_size, output_size = 20, 32, 5
    B, T = 2, 8

    kp, kx = jax.random.split(key)
    params = init_params(kp, vocab_size, hidden_size, output_size)

    x_ids = jax.random.randint(kx, (B, T), 0, vocab_size, dtype=jnp.int32)
    # lengths sorted descending, max == T (pack_padded_sequence convention)
    batch_seq_len = jnp.array([8, 5], dtype=jnp.int32)
    assert int(np.max(np.asarray(batch_seq_len))) == T

    out = bilstm_forward(params, x_ids, batch_seq_len)
    out = jax.block_until_ready(out)
    assert out.shape == (B, T, output_size)

    ref = jax.block_until_ready(bilstm_forward_ref(params, x_ids, batch_seq_len))
    np.testing.assert_allclose(np.asarray(out), np.asarray(ref),
                               rtol=1e-3, atol=1e-3)

    print("KERNEL_OK")
</pallas_src>

<mosaic_0001>
module attributes {stable_mosaic.version = 11 : i64} {
  func.func @_linear_kernel(%arg0: i32, %arg1: memref<16x64xf32, #tpu.memory_space<vmem>>, %arg2: memref<64x5xf32, #tpu.memory_space<vmem>>, %arg3: memref<1x5xf32, #tpu.memory_space<vmem>>, %arg4: memref<16x5xf32, #tpu.memory_space<vmem>>) attributes {dimension_semantics = [#tpu.dimension_semantics<arbitrary>], iteration_bounds = array<i64: 1>, scalar_prefetch = 0 : i64, scratch_operands = 0 : i64, tpu.core_type = #tpu.core_type<tc>, window_params = [{pipeline_mode = #tpu.pipeline_mode<synchronous>, transform_indices = @transform_0, window_bounds = array<i64: 16, 64>}, {pipeline_mode = #tpu.pipeline_mode<synchronous>, transform_indices = @transform_1, window_bounds = array<i64: 64, 5>}, {pipeline_mode = #tpu.pipeline_mode<synchronous>, transform_indices = @transform_2, window_bounds = array<i64: 1, 5>}, {pipeline_mode = #tpu.pipeline_mode<synchronous>, transform_indices = @transform_3, window_bounds = array<i64: 16, 5>}]} {
    %c0 = arith.constant 0 : index
    %c0_0 = arith.constant 0 : index
    %0 = vector.load %arg1[%c0, %c0_0] : memref<16x64xf32, #tpu.memory_space<vmem>>, vector<16x64xf32>
    %c0_1 = arith.constant 0 : index
    %c0_2 = arith.constant 0 : index
    %1 = vector.load %arg2[%c0_1, %c0_2] : memref<64x5xf32, #tpu.memory_space<vmem>>, vector<64x5xf32>
    %cst = arith.constant dense<0.000000e+00> : vector<16x5xf32>
    %2 = tpu.matmul %0, %1, %cst {dimension_numbers = #tpu.dot_dimension_numbers<[1], [0], [0], [1], [0, 0, 1, 1], [], []>} : vector<16x64xf32>, vector<64x5xf32>, vector<16x5xf32> -> vector<16x5xf32>
    %c0_3 = arith.constant 0 : index
    %c0_4 = arith.constant 0 : index
    %3 = vector.load %arg3[%c0_3, %c0_4] : memref<1x5xf32, #tpu.memory_space<vmem>>, vector<1x5xf32>
    %4 = vector.broadcast %3 : vector<1x5xf32> to vector<16x5xf32>
    %5 = arith.addf %2, %4 : vector<16x5xf32>
    %c0_5 = arith.constant 0 : index
    %c0_6 = arith.constant 0 : index
    %6 = vector.load %arg4[%c0_5, %c0_6] : memref<16x5xf32, #tpu.memory_space<vmem>>, vector<16x5xf32>
    tpu.vector_store %arg4[%c0_5, %c0_6], %5 {strides = array<i32>} : memref<16x5xf32, #tpu.memory_space<vmem>>, vector<16x5xf32>,
    return
  }
  func.func @transform_0(%arg0: i32) -> (i32, i32) {
    %c0_i32 = arith.constant 0 : i32
    %c0_i32_0 = arith.constant 0 : i32
    %c0_i32_1 = arith.constant 0 : i32
    return %c0_i32, %c0_i32_0 : i32, i32
  }
  func.func @transform_1(%arg0: i32) -> (i32, i32) {
    %c0_i32 = arith.constant 0 : i32
    %c0_i32_0 = arith.constant 0 : i32
    %c0_i32_1 = arith.constant 0 : i32
    return %c0_i32, %c0_i32_0 : i32, i32
  }
  func.func @transform_2(%arg0: i32) -> (i32, i32) {
    %c0_i32 = arith.constant 0 : i32
    %c0_i32_0 = arith.constant 0 : i32
    %c0_i32_1 = arith.constant 0 : i32
    return %c0_i32, %c0_i32_0 : i32, i32
  }
  func.func @transform_3(%arg0: i32) -> (i32, i32) {
    %c0_i32 = arith.constant 0 : i32
    %c0_i32_0 = arith.constant 0 : i32
    %c0_i32_1 = arith.constant 0 : i32
    return %c0_i32, %c0_i32_0 : i32, i32
  }
}

module attributes {stable_mosaic.version = 11 : i64} {
  func.func @_bilstm_kernel(%arg0: i32, %arg1: memref<8x2x32xf32, #tpu.memory_space<vmem>>, %arg2: memref<8x2x1xf32, #tpu.memory_space<vmem>>, %arg3: memref<32x128xf32, #tpu.memory_space<vmem>>, %arg4: memref<32x128xf32, #tpu.memory_space<vmem>>, %arg5: memref<1x128xf32, #tpu.memory_space<vmem>>, %arg6: memref<32x128xf32, #tpu.memory_space<vmem>>, %arg7: memref<32x128xf32, #tpu.memory_space<vmem>>, %arg8: memref<1x128xf32, #tpu.memory_space<vmem>>, %arg9: memref<8x2x64xf32, #tpu.memory_space<vmem>>, %arg10: memref<2x32xf32, #tpu.memory_space<vmem>>, %arg11: memref<2x32xf32, #tpu.memory_space<vmem>>, %arg12: memref<2x32xf32, #tpu.memory_space<vmem>>, %arg13: memref<2x32xf32, #tpu.memory_space<vmem>>, %arg14: memref<8x2x32xf32, #tpu.memory_space<vmem>>) attributes {dimension_semantics = [#tpu.dimension_semantics<arbitrary>], iteration_bounds = array<i64: 1>, scalar_prefetch = 0 : i64, scratch_operands = 5 : i64, tpu.core_type = #tpu.core_type<tc>, window_params = [{pipeline_mode = #tpu.pipeline_mode<synchronous>, transform_indices = @transform_0, window_bounds = array<i64: 8, 2, 32>}, {pipeline_mode = #tpu.pipeline_mode<synchronous>, transform_indices = @transform_1, window_bounds = array<i64: 8, 2, 1>}, {pipeline_mode = #tpu.pipeline_mode<synchronous>, transform_indices = @transform_2, window_bounds = array<i64: 32, 128>}, {pipeline_mode = #tpu.pipeline_mode<synchronous>, transform_indices = @transform_3, window_bounds = array<i64: 32, 128>}, {pipeline_mode = #tpu.pipeline_mode<synchronous>, transform_indices = @transform_4, window_bounds = array<i64: 1, 128>}, {pipeline_mode = #tpu.pipeline_mode<synchronous>, transform_indices = @transform_5, window_bounds = array<i64: 32, 128>}, {pipeline_mode = #tpu.pipeline_mode<synchronous>, transform_indices = @transform_6, window_bounds = array<i64: 32, 128>}, {pipeline_mode = #tpu.pipeline_mode<synchronous>, transform_indices = @transform_7, window_bounds = array<i64: 1, 128>}, {pipeline_mode = #tpu.pipeline_mode<synchronous>, transform_indices = @transform_8, window_bounds = array<i64: 8, 2, 64>}]} {
    %cst = arith.constant 0.000000e+00 : f32
    %0 = vector.broadcast %cst : f32 to vector<2x32xf32>
    %c0 = arith.constant 0 : index
    %c0_0 = arith.constant 0 : index
    %1 = vector.load %arg10[%c0, %c0_0] : memref<2x32xf32, #tpu.memory_space<vmem>>, vector<2x32xf32>
    tpu.vector_store %arg10[%c0, %c0_0], %0 {strides = array<i32>} : memref<2x32xf32, #tpu.memory_space<vmem>>, vector<2x32xf32>,
    %cst_1 = arith.constant 0.000000e+00 : f32
    %2 = vector.broadcast %cst_1 : f32 to vector<2x32xf32>
    %c0_2 = arith.constant 0 : index
    %c0_3 = arith.constant 0 : index
    %3 = vector.load %arg11[%c0_2, %c0_3] : memref<2x32xf32, #tpu.memory_space<vmem>>, vector<2x32xf32>
    tpu.vector_store %arg11[%c0_2, %c0_3], %2 {strides = array<i32>} : memref<2x32xf32, #tpu.memory_space<vmem>>, vector<2x32xf32>,
    %cst_4 = arith.constant 0.000000e+00 : f32
    %4 = vector.broadcast %cst_4 : f32 to vector<2x32xf32>
    %c0_5 = arith.constant 0 : index
    %c0_6 = arith.constant 0 : index
    %5 = vector.load %arg12[%c0_5, %c0_6] : memref<2x32xf32, #tpu.memory_space<vmem>>, vector<2x32xf32>
    tpu.vector_store %arg12[%c0_5, %c0_6], %4 {strides = array<i32>} : memref<2x32xf32, #tpu.memory_space<vmem>>, vector<2x32xf32>,
    %cst_7 = arith.constant 0.000000e+00 : f32
    %6 = vector.broadcast %cst_7 : f32 to vector<2x32xf32>
    %c0_8 = arith.constant 0 : index
    %c0_9 = arith.constant 0 : index
    %7 = vector.load %arg13[%c0_8, %c0_9] : memref<2x32xf32, #tpu.memory_space<vmem>>, vector<2x32xf32>
    tpu.vector_store %arg13[%c0_8, %c0_9], %6 {strides = array<i32>} : memref<2x32xf32, #tpu.memory_space<vmem>>, vector<2x32xf32>,
    %c0_i32 = arith.constant 0 : i32
    %8 = arith.index_cast %c0_i32 : i32 to index
    %c0_10 = arith.constant 0 : index
    %c0_11 = arith.constant 0 : index
    %9 = vector.load %arg2[%8, %c0_10, %c0_11] : memref<8x2x1xf32, #tpu.memory_space<vmem>>, vector<1x2x1xf32>
    %10 = vector.shape_cast %9 : vector<1x2x1xf32> to vector<2x1xf32>
    %cst_12 = arith.constant 0.000000e+00 : f32
    %11 = vector.broadcast %cst_12 : f32 to vector<2x1xf32>
    %12 = arith.cmpf ogt, %10, %11 : vector<2x1xf32>
    %13 = arith.index_cast %c0_i32 : i32 to index
    %c0_13 = arith.constant 0 : index
    %c0_14 = arith.constant 0 : index
    %14 = vector.load %arg1[%13, %c0_13, %c0_14] : memref<8x2x32xf32, #tpu.memory_space<vmem>>, vector<1x2x32xf32>
    %15 = vector.shape_cast %14 : vector<1x2x32xf32> to vector<2x32xf32>
    %c0_15 = arith.constant 0 : index
    %c0_16 = arith.constant 0 : index
    %16 = vector.load %arg10[%c0_15, %c0_16] : memref<2x32xf32, #tpu.memory_space<vmem>>, vector<2x32xf32>
    %c0_17 = arith.constant 0 : index
    %c0_18 = arith.constant 0 : index
    %17 = vector.load %arg11[%c0_17, %c0_18] : memref<2x32xf32, #tpu.memory_space<vmem>>, vector<2x32xf32>
    %c0_19 = arith.constant 0 : index
    %c0_20 = arith.constant 0 : index
    %18 = vector.load %arg3[%c0_19, %c0_20] : memref<32x128xf32, #tpu.memory_space<vmem>>, vector<32x128xf32>
    %c0_21 = arith.constant 0 : index
    %c0_22 = arith.constant 0 : index
    %19 = vector.load %arg4[%c0_21, %c0_22] : memref<32x128xf32, #tpu.memory_space<vmem>>, vector<32x128xf32>
    %c0_23 = arith.constant 0 : index
    %c0_24 = arith.constant 0 : index
    %20 = vector.load %arg5[%c0_23, %c0_24] : memref<1x128xf32, #tpu.memory_space<vmem>>, vector<1x128xf32>
    %cst_25 = arith.constant dense<0.000000e+00> : vector<2x128xf32>
    %21 = tpu.matmul %15, %18, %cst_25 {dimension_numbers = #tpu.dot_dimension_numbers<[1], [0], [0], [1], [0, 0, 1, 1], [], []>} : vector<2x32xf32>, vector<32x128xf32>, vector<2x128xf32> -> vector<2x128xf32>
    %cst_26 = arith.constant dense<0.000000e+00> : vector<2x128xf32>
    %22 = tpu.matmul %16, %19, %cst_26 {dimension_numbers = #tpu.dot_dimension_numbers<[1], [0], [0], [1], [0, 0, 1, 1], [], []>} : vector<2x32xf32>, vector<32x128xf32>, vector<2x128xf32> -> vector<2x128xf32>
    %23 = arith.addf %21, %22 : vector<2x128xf32>
    %24 = vector.broadcast %20 : vector<1x128xf32> to vector<2x128xf32>
    %25 = arith.addf %23, %24 : vector<2x128xf32>
    %26 = vector.extract_strided_slice %25 {offsets = [0, 0], sizes = [2, 32], strides = [1, 1]} : vector<2x128xf32> to vector<2x32xf32>
    %27 = arith.negf %26 : vector<2x32xf32>
    %28 = math.exp %27 : vector<2x32xf32>
    %cst_27 = arith.constant 1.000000e+00 : f32
    %29 = vector.broadcast %cst_27 : f32 to vector<2x32xf32>
    %30 = arith.addf %29, %28 : vector<2x32xf32>
    %31 = arith.divf %29, %30 : vector<2x32xf32>
    %32 = vector.extract_strided_slice %25 {offsets = [0, 32], sizes = [2, 32], strides = [1, 1]} : vector<2x128xf32> to vector<2x32xf32>
    %33 = arith.negf %32 : vector<2x32xf32>
    %34 = math.exp %33 : vector<2x32xf32>
    %cst_28 = arith.constant 1.000000e+00 : f32
    %35 = vector.broadcast %cst_28 : f32 to vector<2x32xf32>
    %36 = arith.addf %35, %34 : vector<2x32xf32>
    %37 = arith.divf %35, %36 : vector<2x32xf32>
    %38 = vector.extract_strided_slice %25 {offsets = [0, 64], sizes = [2, 32], strides = [1, 1]} : vector<2x128xf32> to vector<2x32xf32>
    %39 = math.tanh %38 : vector<2x32xf32>
    %40 = vector.extract_strided_slice %25 {offsets = [0, 96], sizes = [2, 32], strides = [1, 1]} : vector<2x128xf32> to vector<2x32xf32>
    %41 = arith.negf %40 : vector<2x32xf32>
    %42 = math.exp %41 : vector<2x32xf32>
    %cst_29 = arith.constant 1.000000e+00 : f32
    %43 = vector.broadcast %cst_29 : f32 to vector<2x32xf32>
    %44 = arith.addf %43, %42 : vector<2x32xf32>
    %45 = arith.divf %43, %44 : vector<2x32xf32>
    %46 = arith.mulf %37, %17 : vector<2x32xf32>
    %47 = arith.mulf %31, %39 : vector<2x32xf32>
    %48 = arith.addf %46, %47 : vector<2x32xf32>
    %49 = math.tanh %48 : vector<2x32xf32>
    %50 = arith.mulf %45, %49 : vector<2x32xf32>
    %51 = vector.shape_cast %12 : vector<2x1xi1> to vector<2x1xi1>
    %52 = vector.broadcast %51 : vector<2x1xi1> to vector<2x32xi1>
    %53 = arith.select %52, %50, %16 : vector<2x32xi1>, vector<2x32xf32>
    %54 = vector.shape_cast %12 : vector<2x1xi1> to vector<2x1xi1>
    %55 = vector.broadcast %54 : vector<2x1xi1> to vector<2x32xi1>
    %56 = arith.select %55, %48, %17 : vector<2x32xi1>, vector<2x32xf32>
    %cst_30 = arith.constant 0.000000e+00 : f32
    %57 = vector.broadcast %cst_30 : f32 to vector<2x32xf32>
    %58 = vector.shape_cast %12 : vector<2x1xi1> to vector<2x1xi1>
    %59 = vector.broadcast %58 : vector<2x1xi1> to vector<2x32xi1>
    %60 = arith.select %59, %50, %57 : vector<2x32xi1>, vector<2x32xf32>
    %c0_31 = arith.constant 0 : index
    %c0_32 = arith.constant 0 : index
    %61 = vector.load %arg10[%c0_31, %c0_32] : memref<2x32xf32, #tpu.memory_space<vmem>>, vector<2x32xf32>
    tpu.vector_store %arg10[%c0_31, %c0_32], %53 {strides = array<i32>} : memref<2x32xf32, #tpu.memory_space<vmem>>, vector<2x32xf32>,
    %c0_33 = arith.constant 0 : index
    %c0_34 = arith.constant 0 : index
    %62 = vector.load %arg11[%c0_33, %c0_34] : memref<2x32xf32, #tpu.memory_space<vmem>>, vector<2x32xf32>
    tpu.vector_store %arg11[%c0_33, %c0_34], %56 {strides = array<i32>} : memref<2x32xf32, #tpu.memory_space<vmem>>, vector<2x32xf32>,
    %63 = arith.index_cast %c0_i32 : i32 to index
    %c0_35 = arith.constant 0 : index
    %c0_36 = arith.constant 0 : index
    %64 = vector.load %arg14[%63, %c0_35, %c0_36] : memref<8x2x32xf32, #tpu.memory_space<vmem>>, vector<1x2x32xf32>
    %65 = vector.shape_cast %64 : vector<1x2x32xf32> to vector<2x32xf32>
    %66 = vector.shape_cast %60 : vector<2x32xf32> to vector<1x2x32xf32>
    tpu.vector_store %arg14[%63, %c0_35, %c0_36], %66 {strides = array<i32>} : memref<8x2x32xf32, #tpu.memory_space<vmem>>, vector<1x2x32xf32>,
    %c1_i32 = arith.constant 1 : i32
    %67 = arith.index_cast %c1_i32 : i32 to index
    %c0_37 = arith.constant 0 : index
    %c0_38 = arith.constant 0 : index
    %68 = vector.load %arg2[%67, %c0_37, %c0_38] : memref<8x2x1xf32, #tpu.memory_space<vmem>>, vector<1x2x1xf32>
    %69 = vector.shape_cast %68 : vector<1x2x1xf32> to vector<2x1xf32>
    %cst_39 = arith.constant 0.000000e+00 : f32
    %70 = vector.broadcast %cst_39 : f32 to vector<2x1xf32>
    %71 = arith.cmpf ogt, %69, %70 : vector<2x1xf32>
    %72 = arith.index_cast %c1_i32 : i32 to index
    %c0_40 = arith.constant 0 : index
    %c0_41 = arith.constant 0 : index
    %73 = vector.load %arg1[%72, %c0_40, %c0_41] : memref<8x2x32xf32, #tpu.memory_space<vmem>>, vector<1x2x32xf32>
    %74 = vector.shape_cast %73 : vector<1x2x32xf32> to vector<2x32xf32>
    %c0_42 = arith.constant 0 : index
    %c0_43 = arith.constant 0 : index
    %75 = vector.load %arg10[%c0_42, %c0_43] : memref<2x32xf32, #tpu.memory_space<vmem>>, vector<2x32xf32>
    %c0_44 = arith.constant 0 : index
    %c0_45 = arith.constant 0 : index
    %76 = vector.load %arg11[%c0_44, %c0_45] : memref<2x32xf32, #tpu.memory_space<vmem>>, vector<2x32xf32>
    %c0_46 = arith.constant 0 : index
    %c0_47 = arith.constant 0 : index
    %77 = vector.load %arg3[%c0_46, %c0_47] : memref<32x128xf32, #tpu.memory_space<vmem>>, vector<32x128xf32>
    %c0_48 = arith.constant 0 : index
    %c0_49 = arith.constant 0 : index
    %78 = vector.load %arg4[%c0_48, %c0_49] : memref<32x128xf32, #tpu.memory_space<vmem>>, vector<32x128xf32>
    %c0_50 = arith.constant 0 : index
    %c0_51 = arith.constant 0 : index
    %79 = vector.load %arg5[%c0_50, %c0_51] : memref<1x128xf32, #tpu.memory_space<vmem>>, vector<1x128xf32>
    %cst_52 = arith.constant dense<0.000000e+00> : vector<2x128xf32>
    %80 = tpu.matmul %74, %77, %cst_52 {dimension_numbers = #tpu.dot_dimension_numbers<[1], [0], [0], [1], [0, 0, 1, 1], [], []>} : vector<2x32xf32>, vector<32x128xf32>, vector<2x128xf32> -> vector<2x128xf32>
    %cst_53 = arith.constant dense<0.000000e+00> : vector<2x128xf32>
    %81 = tpu.matmul %75, %78, %cst_53 {dimension_numbers = #tpu.dot_dimension_numbers<[1], [0], [0], [1], [0, 0, 1, 1], [], []>} : vector<2x32xf32>, vector<32x128xf32>, vector<2x128xf32> -> vector<2x128xf32>
    %82 = arith.addf %80, %81 : vector<2x128xf32>
    %83 = vector.broadcast %79 : vector<1x128xf32> to vector<2x128xf32>
    %84 = arith.addf %82, %83 : vector<2x128xf32>
    %85 = vector.extract_strided_slice %84 {offsets = [0, 0], sizes = [2, 32], strides = [1, 1]} : vector<2x128xf32> to vector<2x32xf32>
    %86 = arith.negf %85 : vector<2x32xf32>
    %87 = math.exp %86 : vector<2x32xf32>
    %cst_54 = arith.constant 1.000000e+00 : f32
    %88 = vector.broadcast %cst_54 : f32 to vector<2x32xf32>
    %89 = arith.addf %88, %87 : vector<2x32xf32>
    %90 = arith.divf %88, %89 : vector<2x32xf32>
    %91 = vector.extract_strided_slice %84 {offsets = [0, 32], sizes = [2, 32], strides = [1, 1]} : vector<2x128xf32> to vector<2x32xf32>
    %92 = arith.negf %91 : vector<2x32xf32>
    %93 = math.exp %92 : vector<2x32xf32>
    %cst_55 = arith.constant 1.000000e+00 : f32
    %94 = vector.broadcast %cst_55 : f32 to vector<2x32xf32>
    %95 = arith.addf %94, %93 : vector<2x32xf32>
    %96 = arith.divf %94, %95 : vector<2x32xf32>
    %97 = vector.extract_strided_slice %84 {offsets = [0, 64], sizes = [2, 32], strides = [1, 1]} : vector<2x128xf32> to vector<2x32xf32>
    %98 = math.tanh %97 : vector<2x32xf32>
    %99 = vector.extract_strided_slice %84 {offsets = [0, 96], sizes = [2, 32], strides = [1, 1]} : vector<2x128xf32> to vector<2x32xf32>
    %100 = arith.negf %99 : vector<2x32xf32>
    %101 = math.exp %100 : vector<2x32xf32>
    %cst_56 = arith.constant 1.000000e+00 : f32
    %102 = vector.broadcast %cst_56 : f32 to vector<2x32xf32>
    %103 = arith.addf %102, %101 : vector<2x32xf32>
    %104 = arith.divf %102, %103 : vector<2x32xf32>
    %105 = arith.mulf %96, %76 : vector<2x32xf32>
    %106 = arith.mulf %90, %98 : vector<2x32xf32>
    %107 = arith.addf %105, %106 : vector<2x32xf32>
    %108 = math.tanh %107 : vector<2x32xf32>
    %109 = arith.mulf %104, %108 : vector<2x32xf32>
    %110 = vector.shape_cast %71 : vector<2x1xi1> to vector<2x1xi1>
    %111 = vector.broadcast %110 : vector<2x1xi1> to vector<2x32xi1>
    %112 = arith.select %111, %109, %75 : vector<2x32xi1>, vector<2x32xf32>
    %113 = vector.shape_cast %71 : vector<2x1xi1> to vector<2x1xi1>
    %114 = vector.broadcast %113 : vector<2x1xi1> to vector<2x32xi1>
    %115 = arith.select %114, %107, %76 : vector<2x32xi1>, vector<2x32xf32>
    %cst_57 = arith.constant 0.000000e+00 : f32
    %116 = vector.broadcast %cst_57 : f32 to vector<2x32xf32>
    %117 = vector.shape_cast %71 : vector<2x1xi1> to vector<2x1xi1>
    %118 = vector.broadcast %117 : vector<2x1xi1> to vector<2x32xi1>
    %119 = arith.select %118, %109, %116 : vector<2x32xi1>, vector<2x32xf32>
    %c0_58 = arith.constant 0 : index
    %c0_59 = arith.constant 0 : index
    %120 = vector.load %arg10[%c0_58, %c0_59] : memref<2x32xf32, #tpu.memory_space<vmem>>, vector<2x32xf32>
    tpu.vector_store %arg10[%c0_58, %c0_59], %112 {strides = array<i32>} : memref<2x32xf32, #tpu.memory_space<vmem>>, vector<2x32xf32>,
    %c0_60 = arith.constant 0 : index
    %c0_61 = arith.constant 0 : index
    %121 = vector.load %arg11[%c0_60, %c0_61] : memref<2x32xf32, #tpu.memory_space<vmem>>, vector<2x32xf32>
    tpu.vector_store %arg11[%c0_60, %c0_61], %115 {strides = array<i32>} : memref<2x32xf32, #tpu.memory_space<vmem>>, vector<2x32xf32>,
    %122 = arith.index_cast %c1_i32 : i32 to index
    %c0_62 = arith.constant 0 : index
    %c0_63 = arith.constant 0 : index
    %123 = vector.load %arg14[%122, %c0_62, %c0_63] : memref<8x2x32xf32, #tpu.memory_space<vmem>>, vector<1x2x32xf32>
    %124 = vector.shape_cast %123 : vector<1x2x32xf32> to vector<2x32xf32>
    %125 = vector.shape_cast %119 : vector<2x32xf32> to vector<1x2x32xf32>
    tpu.vector_store %arg14[%122, %c0_62, %c0_63], %125 {strides = array<i32>} : memref<8x2x32xf32, #tpu.memory_space<vmem>>, vector<1x2x32xf32>,
    %c2_i32 = arith.constant 2 : i32
    %126 = arith.index_cast %c2_i32 : i32 to index
    %c0_64 = arith.constant 0 : index
    %c0_65 = arith.constant 0 : index
    %127 = vector.load %arg2[%126, %c0_64, %c0_65] : memref<8x2x1xf32, #tpu.memory_space<vmem>>, vector<1x2x1xf32>
    %128 = vector.shape_cast %127 : vector<1x2x1xf32> to vector<2x1xf32>
    %cst_66 = arith.constant 0.000000e+00 : f32
    %129 = vector.broadcast %cst_66 : f32 to vector<2x1xf32>
    %130 = arith.cmpf ogt, %128, %129 : vector<2x1xf32>
    %131 = arith.index_cast %c2_i32 : i32 to index
    %c0_67 = arith.constant 0 : index
    %c0_68 = arith.constant 0 : index
    %132 = vector.load %arg1[%131, %c0_67, %c0_68] : memref<8x2x32xf32, #tpu.memory_space<vmem>>, vector<1x2x32xf32>
    %133 = vector.shape_cast %132 : vector<1x2x32xf32> to vector<2x32xf32>
    %c0_69 = arith.constant 0 : index
    %c0_70 = arith.constant 0 : index
    %134 = vector.load %arg10[%c0_69, %c0_70] : memref<2x32xf32, #tpu.memory_space<vmem>>, vector<2x32xf32>
    %c0_71 = arith.constant 0 : index
    %c0_72 = arith.constant 0 : index
    %135 = vector.load %arg11[%c0_71, %c0_72] : memref<2x32xf32, #tpu.memory_space<vmem>>, vector<2x32xf32>
    %c0_73 = arith.constant 0 : index
    %c0_74 = arith.constant 0 : index
    %136 = vector.load %arg3[%c0_73, %c0_74] : memref<32x128xf32, #tpu.memory_space<vmem>>, vector<32x128xf32>
    %c0_75 = arith.constant 0 : index
    %c0_76 = arith.constant 0 : index
    %137 = vector.load %arg4[%c0_75, %c0_76] : memref<32x128xf32, #tpu.memory_space<vmem>>, vector<32x128xf32>
    %c0_77 = arith.constant 0 : index
    %c0_78 = arith.constant 0 : index
    %138 = vector.load %arg5[%c0_77, %c0_78] : memref<1x128xf32, #tpu.memory_space<vmem>>, vector<1x128xf32>
    %cst_79 = arith.constant dense<0.000000e+00> : vector<2x128xf32>
    %139 = tpu.matmul %133, %136, %cst_79 {dimension_numbers = #tpu.dot_dimension_numbers<[1], [0], [0], [1], [0, 0, 1, 1], [], []>} : vector<2x32xf32>, vector<32x128xf32>, vector<2x128xf32> -> vector<2x128xf32>
    %cst_80 = arith.constant dense<0.000000e+00> : vector<2x128xf32>
    %140 = tpu.matmul %134, %137, %cst_80 {dimension_numbers = #tpu.dot_dimension_numbers<[1], [0], [0], [1], [0, 0, 1, 1], [], []>} : vector<2x32xf32>, vector<32x128xf32>, vector<2x128xf32> -> vector<2x128xf32>
    %141 = arith.addf %139, %140 : vector<2x128xf32>
    %142 = vector.broadcast %138 : vector<1x128xf32> to vector<2x128xf32>
    %143 = arith.addf %141, %142 : vector<2x128xf32>
    %144 = vector.extract_strided_slice %143 {offsets = [0, 0], sizes = [2, 32], strides = [1, 1]} : vector<2x128xf32> to vector<2x32xf32>
    %145 = arith.negf %144 : vector<2x32xf32>
    %146 = math.exp %145 : vector<2x32xf32>
    %cst_81 = arith.constant 1.000000e+00 : f32
    %147 = vector.broadcast %cst_81 : f32 to vector<2x32xf32>
    %148 = arith.addf %147, %146 : vector<2x32xf32>
    %149 = arith.divf %147, %148 : vector<2x32xf32>
    %150 = vector.extract_strided_slice %143 {offsets = [0, 32], sizes = [2, 32], strides = [1, 1]} : vector<2x128xf32> to vector<2x32xf32>
    %151 = arith.negf %150 : vector<2x32xf32>
    %152 = math.exp %151 : vector<2x32xf32>
    %cst_82 = arith.constant 1.000000e+00 : f32
    %153 = vector.broadcast %cst_82 : f32 to vector<2x32xf32>
    %154 = arith.addf %153, %152 : vector<2x32xf32>
    %155 = arith.divf %153, %154 : vector<2x32xf32>
    %156 = vector.extract_strided_slice %143 {offsets = [0, 64], sizes = [2, 32], strides = [1, 1]} : vector<2x128xf32> to vector<2x32xf32>
    %157 = math.tanh %156 : vector<2x32xf32>
    %158 = vector.extract_strided_slice %143 {offsets = [0, 96], sizes = [2, 32], strides = [1, 1]} : vector<2x128xf32> to vector<2x32xf32>
    %159 = arith.negf %158 : vector<2x32xf32>
    %160 = math.exp %159 : vector<2x32xf32>
    %cst_83 = arith.constant 1.000000e+00 : f32
    %161 = vector.broadcast %cst_83 : f32 to vector<2x32xf32>
    %162 = arith.addf %161, %160 : vector<2x32xf32>
    %163 = arith.divf %161, %162 : vector<2x32xf32>
    %164 = arith.mulf %155, %135 : vector<2x32xf32>
    %165 = arith.mulf %149, %157 : vector<2x32xf32>
    %166 = arith.addf %164, %165 : vector<2x32xf32>
    %167 = math.tanh %166 : vector<2x32xf32>
    %168 = arith.mulf %163, %167 : vector<2x32xf32>
    %169 = vector.shape_cast %130 : vector<2x1xi1> to vector<2x1xi1>
    %170 = vector.broadcast %169 : vector<2x1xi1> to vector<2x32xi1>
    %171 = arith.select %170, %168, %134 : vector<2x32xi1>, vector<2x32xf32>
    %172 = vector.shape_cast %130 : vector<2x1xi1> to vector<2x1xi1>
    %173 = vector.broadcast %172 : vector<2x1xi1> to vector<2x32xi1>
    %174 = arith.select %173, %166, %135 : vector<2x32xi1>, vector<2x32xf32>
    %cst_84 = arith.constant 0.000000e+00 : f32
    %175 = vector.broadcast %cst_84 : f32 to vector<2x32xf32>
    %176 = vector.shape_cast %130 : vector<2x1xi1> to vector<2x1xi1>
    %177 = vector.broadcast %176 : vector<2x1xi1> to vector<2x32xi1>
    %178 = arith.select %177, %168, %175 : vector<2x32xi1>, vector<2x32xf32>
    %c0_85 = arith.constant 0 : index
    %c0_86 = arith.constant 0 : index
    %179 = vector.load %arg10[%c0_85, %c0_86] : memref<2x32xf32, #tpu.memory_space<vmem>>, vector<2x32xf32>
    tpu.vector_store %arg10[%c0_85, %c0_86], %171 {strides = array<i32>} : memref<2x32xf32, #tpu.memory_space<vmem>>, vector<2x32xf32>,
    %c0_87 = arith.constant 0 : index
    %c0_88 = arith.constant 0 : index
    %180 = vector.load %arg11[%c0_87, %c0_88] : memref<2x32xf32, #tpu.memory_space<vmem>>, vector<2x32xf32>
    tpu.vector_store %arg11[%c0_87, %c0_88], %174 {strides = array<i32>} : memref<2x32xf32, #tpu.memory_space<vmem>>, vector<2x32xf32>,
    %181 = arith.index_cast %c2_i32 : i32 to index
    %c0_89 = arith.constant 0 : index
    %c0_90 = arith.constant 0 : index
    %182 = vector.load %arg14[%181, %c0_89, %c0_90] : memref<8x2x32xf32, #tpu.memory_space<vmem>>, vector<1x2x32xf32>
    %183 = vector.shape_cast %182 : vector<1x2x32xf32> to vector<2x32xf32>
    %184 = vector.shape_cast %178 : vector<2x32xf32> to vector<1x2x32xf32>
    tpu.vector_store %arg14[%181, %c0_89, %c0_90], %184 {strides = array<i32>} : memref<8x2x32xf32, #tpu.memory_space<vmem>>, vector<1x2x32xf32>,
    %c3_i32 = arith.constant 3 : i32
    %185 = arith.index_cast %c3_i32 : i32 to index
    %c0_91 = arith.constant 0 : index
    %c0_92 = arith.constant 0 : index
    %186 = vector.load %arg2[%185, %c0_91, %c0_92] : memref<8x2x1xf32, #tpu.memory_space<vmem>>, vector<1x2x1xf32>
    %187 = vector.shape_cast %186 : vector<1x2x1xf32> to vector<2x1xf32>
    %cst_93 = arith.constant 0.000000e+00 : f32
    %188 = vector.broadcast %cst_93 : f32 to vector<2x1xf32>
    %189 = arith.cmpf ogt, %187, %188 : vector<2x1xf32>
    %190 = arith.index_cast %c3_i32 : i32 to index
    %c0_94 = arith.constant 0 : index
    %c0_95 = arith.constant 0 : index
    %191 = vector.load %arg1[%190, %c0_94, %c0_95] : memref<8x2x32xf32, #tpu.memory_space<vmem>>, vector<1x2x32xf32>
    %192 = vector.shape_cast %191 : vector<1x2x32xf32> to vector<2x32xf32>
    %c0_96 = arith.constant 0 : index
    %c0_97 = arith.constant 0 : index
    %193 = vector.load %arg10[%c0_96, %c0_97] : memref<2x32xf32, #tpu.memory_space<vmem>>, vector<2x32xf32>
    %c0_98 = arith.constant 0 : index
    %c0_99 = arith.constant 0 : index
    %194 = vector.load %arg11[%c0_98, %c0_99] : memref<2x32xf32, #tpu.memory_space<vmem>>, vector<2x32xf32>
    %c0_100 = arith.constant 0 : index
    %c0_101 = arith.constant 0 : index
    %195 = vector.load %arg3[%c0_100, %c0_101] : memref<32x128xf32, #tpu.memory_space<vmem>>, vector<32x128xf32>
    %c0_102 = arith.constant 0 : index
    %c0_103 = arith.constant 0 : index
    %196 = vector.load %arg4[%c0_102, %c0_103] : memref<32x128xf32, #tpu.memory_space<vmem>>, vector<32x128xf32>
    %c0_104 = arith.constant 0 : index
    %c0_105 = arith.constant 0 : index
    %197 = vector.load %arg5[%c0_104, %c0_105] : memref<1x128xf32, #tpu.memory_space<vmem>>, vector<1x128xf32>
    %cst_106 = arith.constant dense<0.000000e+00> : vector<2x128xf32>
    %198 = tpu.matmul %192, %195, %cst_106 {dimension_numbers = #tpu.dot_dimension_numbers<[1], [0], [0], [1], [0, 0, 1, 1], [], []>} : vector<2x32xf32>, vector<32x128xf32>, vector<2x128xf32> -> vector<2x128xf32>
    %cst_107 = arith.constant dense<0.000000e+00> : vector<2x128xf32>
    %199 = tpu.matmul %193, %196, %cst_107 {dimension_numbers = #tpu.dot_dimension_numbers<[1], [0], [0], [1], [0, 0, 1, 1], [], []>} : vector<2x32xf32>, vector<32x128xf32>, vector<2x128xf32> -> vector<2x128xf32>
    %200 = arith.addf %198, %199 : vector<2x128xf32>
    %201 = vector.broadcast %197 : vector<1x128xf32> to vector<2x128xf32>
    %202 = arith.addf %200, %201 : vector<2x128xf32>
    %203 = vector.extract_strided_slice %202 {offsets = [0, 0], sizes = [2, 32], strides = [1, 1]} : vector<2x128xf32> to vector<2x32xf32>
    %204 = arith.negf %203 : vector<2x32xf32>
    %205 = math.exp %204 : vector<2x32xf32>
    %cst_108 = arith.constant 1.000000e+00 : f32
    %206 = vector.broadcast %cst_108 : f32 to vector<2x32xf32>
    %207 = arith.addf %206, %205 : vector<2x32xf32>
    %208 = arith.divf %206, %207 : vector<2x32xf32>
    %209 = vector.extract_strided_slice %202 {offsets = [0, 32], sizes = [2, 32], strides = [1, 1]} : vector<2x128xf32> to vector<2x32xf32>
    %210 = arith.negf %209 : vector<2x32xf32>
    %211 = math.exp %210 : vector<2x32xf32>
    %cst_109 = arith.constant 1.000000e+00 : f32
    %212 = vector.broadcast %cst_109 : f32 to vector<2x32xf32>
    %213 = arith.addf %212, %211 : vector<2x32xf32>
    %214 = arith.divf %212, %213 : vector<2x32xf32>
    %215 = vector.extract_strided_slice %202 {offsets = [0, 64], sizes = [2, 32], strides = [1, 1]} : vector<2x128xf32> to vector<2x32xf32>
    %216 = math.tanh %215 : vector<2x32xf32>
    %217 = vector.extract_strided_slice %202 {offsets = [0, 96], sizes = [2, 32], strides = [1, 1]} : vector<2x128xf32> to vector<2x32xf32>
    %218 = arith.negf %217 : vector<2x32xf32>
    %219 = math.exp %218 : vector<2x32xf32>
    %cst_110 = arith.constant 1.000000e+00 : f32
    %220 = vector.broadcast %cst_110 : f32 to vector<2x32xf32>
    %221 = arith.addf %220, %219 : vector<2x32xf32>
    %222 = arith.divf %220, %221 : vector<2x32xf32>
    %223 = arith.mulf %214, %194 : vector<2x32xf32>
    %224 = arith.mulf %208, %216 : vector<2x32xf32>
    %225 = arith.addf %223, %224 : vector<2x32xf32>
    %226 = math.tanh %225 : vector<2x32xf32>
    %227 = arith.mulf %222, %226 : vector<2x32xf32>
    %228 = vector.shape_cast %189 : vector<2x1xi1> to vector<2x1xi1>
    %229 = vector.broadcast %228 : vector<2x1xi1> to vector<2x32xi1>
    %230 = arith.select %229, %227, %193 : vector<2x32xi1>, vector<2x32xf32>
    %231 = vector.shape_cast %189 : vector<2x1xi1> to vector<2x1xi1>
    %232 = vector.broadcast %231 : vector<2x1xi1> to vector<2x32xi1>
    %233 = arith.select %232, %225, %194 : vector<2x32xi1>, vector<2x32xf32>
    %cst_111 = arith.constant 0.000000e+00 : f32
    %234 = vector.broadcast %cst_111 : f32 to vector<2x32xf32>
    %235 = vector.shape_cast %189 : vector<2x1xi1> to vector<2x1xi1>
    %236 = vector.broadcast %235 : vector<2x1xi1> to vector<2x32xi1>
    %237 = arith.select %236, %227, %234 : vector<2x32xi1>, vector<2x32xf32>
    %c0_112 = arith.constant 0 : index
    %c0_113 = arith.constant 0 : index
    %238 = vector.load %arg10[%c0_112, %c0_113] : memref<2x32xf32, #tpu.memory_space<vmem>>, vector<2x32xf32>
    tpu.vector_store %arg10[%c0_112, %c0_113], %230 {strides = array<i32>} : memref<2x32xf32, #tpu.memory_space<vmem>>, vector<2x32xf32>,
    %c0_114 = arith.constant 0 : index
    %c0_115 = arith.constant 0 : index
    %239 = vector.load %arg11[%c0_114, %c0_115] : memref<2x32xf32, #tpu.memory_space<vmem>>, vector<2x32xf32>
    tpu.vector_store %arg11[%c0_114, %c0_115], %233 {strides = array<i32>} : memref<2x32xf32, #tpu.memory_space<vmem>>, vector<2x32xf32>,
    %240 = arith.index_cast %c3_i32 : i32 to index
    %c0_116 = arith.constant 0 : index
    %c0_117 = arith.constant 0 : index
    %241 = vector.load %arg14[%240, %c0_116, %c0_117] : memref<8x2x32xf32, #tpu.memory_space<vmem>>, vector<1x2x32xf32>
    %242 = vector.shape_cast %241 : vector<1x2x32xf32> to vector<2x32xf32>
    %243 = vector.shape_cast %237 : vector<2x32xf32> to vector<1x2x32xf32>
    tpu.vector_store %arg14[%240, %c0_116, %c0_117], %243 {strides = array<i32>} : memref<8x2x32xf32, #tpu.memory_space<vmem>>, vector<1x2x32xf32>,
    %c4_i32 = arith.constant 4 : i32
    %244 = arith.index_cast %c4_i32 : i32 to index
    %c0_118 = arith.constant 0 : index
    %c0_119 = arith.constant 0 : index
    %245 = vector.load %arg2[%244, %c0_118, %c0_119] : memref<8x2x1xf32, #tpu.memory_space<vmem>>, vector<1x2x1xf32>
    %246 = vector.shape_cast %245 : vector<1x2x1xf32> to vector<2x1xf32>
    %cst_120 = arith.constant 0.000000e+00 : f32
    %247 = vector.broadcast %cst_120 : f32 to vector<2x1xf32>
    %248 = arith.cmpf ogt, %246, %247 : vector<2x1xf32>
    %249 = arith.index_cast %c4_i32 : i32 to index
    %c0_121 = arith.constant 0 : index
    %c0_122 = arith.constant 0 : index
    %250 = vector.load %arg1[%249, %c0_121, %c0_122] : memref<8x2x32xf32, #tpu.memory_space<vmem>>, vector<1x2x32xf32>
    %251 = vector.shape_cast %250 : vector<1x2x32xf32> to vector<2x32xf32>
    %c0_123 = arith.constant 0 : index
    %c0_124 = arith.constant 0 : index
    %252 = vector.load %arg10[%c0_123, %c0_124] : memref<2x32xf32, #tpu.memory_space<vmem>>, vector<2x32xf32>
    %c0_125 = arith.constant 0 : index
    %c0_126 = arith.constant 0 : index
    %253 = vector.load %arg11[%c0_125, %c0_126] : memref<2x32xf32, #tpu.memory_space<vmem>>, vector<2x32xf32>
    %c0_127 = arith.constant 0 : index
    %c0_128 = arith.constant 0 : index
    %254 = vector.load %arg3[%c0_127, %c0_128] : memref<32x128xf32, #tpu.memory_space<vmem>>, vector<32x128xf32>
    %c0_129 = arith.constant 0 : index
    %c0_130 = arith.constant 0 : index
    %255 = vector.load %arg4[%c0_129, %c0_130] : memref<32x128xf32, #tpu.memory_space<vmem>>, vector<32x128xf32>
    %c0_131 = arith.constant 0 : index
    %c0_132 = arith.constant 0 : index
    %256 = vector.load %arg5[%c0_131, %c0_132] : memref<1x128xf32, #tpu.memory_space<vmem>>, vector<1x128xf32>
    %cst_133 = arith.constant dense<0.000000e+00> : vector<2x128xf32>
    %257 = tpu.matmul %251, %254, %cst_133 {dimension_numbers = #tpu.dot_dimension_numbers<[1], [0], [0], [1], [0, 0, 1, 1], [], []>} : vector<2x32xf32>, vector<32x128xf32>, vector<2x128xf32> -> vector<2x128xf32>
    %cst_134 = arith.constant dense<0.000000e+00> : vector<2x128xf32>
    %258 = tpu.matmul %252, %255, %cst_134 {dimension_numbers = #tpu.dot_dimension_numbers<[1], [0], [0], [1], [0, 0, 1, 1], [], []>} : vector<2x32xf32>, vector<32x128xf32>, vector<2x128xf32> -> vector<2x128xf32>
    %259 = arith.addf %257, %258 : vector<2x128xf32>
    %260 = vector.broadcast %256 : vector<1x128xf32> to vector<2x128xf32>
    %261 = arith.addf %259, %260 : vector<2x128xf32>
    %262 = vector.extract_strided_slice %261 {offsets = [0, 0], sizes = [2, 32], strides = [1, 1]} : vector<2x128xf32> to vector<2x32xf32>
    %263 = arith.negf %262 : vector<2x32xf32>
    %264 = math.exp %263 : vector<2x32xf32>
    %cst_135 = arith.constant 1.000000e+00 : f32
    %265 = vector.broadcast %cst_135 : f32 to vector<2x32xf32>
    %266 = arith.addf %265, %264 : vector<2x32xf32>
    %267 = arith.divf %265, %266 : vector<2x32xf32>
    %268 = vector.extract_strided_slice %261 {offsets = [0, 32], sizes = [2, 32], strides = [1, 1]} : vector<2x128xf32> to vector<2x32xf32>
    %269 = arith.negf %268 : vector<2x32xf32>
    %270 = math.exp %269 : vector<2x32xf32>
    %cst_136 = arith.constant 1.000000e+00 : f32
    %271 = vector.broadcast %cst_136 : f32 to vector<2x32xf32>
    %272 = arith.addf %271, %270 : vector<2x32xf32>
    %273 = arith.divf %271, %272 : vector<2x32xf32>
    %274 = vector.extract_strided_slice %261 {offsets = [0, 64], sizes = [2, 32], strides = [1, 1]} : vector<2x128xf32> to vector<2x32xf32>
    %275 = math.tanh %274 : vector<2x32xf32>
    %276 = vector.extract_strided_slice %261 {offsets = [0, 96], sizes = [2, 32], strides = [1, 1]} : vector<2x128xf32> to vector<2x32xf32>
    %277 = arith.negf %276 : vector<2x32xf32>
    %278 = math.exp %277 : vector<2x32xf32>
    %cst_137 = arith.constant 1.000000e+00 : f32
    %279 = vector.broadcast %cst_137 : f32 to vector<2x32xf32>
    %280 = arith.addf %279, %278 : vector<2x32xf32>
    %281 = arith.divf %279, %280 : vector<2x32xf32>
    %282 = arith.mulf %273, %253 : vector<2x32xf32>
    %283 = arith.mulf %267, %275 : vector<2x32xf32>
    %284 = arith.addf %282, %283 : vector<2x32xf32>
    %285 = math.tanh %284 : vector<2x32xf32>
    %286 = arith.mulf %281, %285 : vector<2x32xf32>
    %287 = vector.shape_cast %248 : vector<2x1xi1> to vector<2x1xi1>
    %288 = vector.broadcast %287 : vector<2x1xi1> to vector<2x32xi1>
    %289 = arith.select %288, %286, %252 : vector<2x32xi1>, vector<2x32xf32>
    %290 = vector.shape_cast %248 : vector<2x1xi1> to vector<2x1xi1>
    %291 = vector.broadcast %290 : vector<2x1xi1> to vector<2x32xi1>
    %292 = arith.select %291, %284, %253 : vector<2x32xi1>, vector<2x32xf32>
    %cst_138 = arith.constant 0.000000e+00 : f32
    %293 = vector.broadcast %cst_138 : f32 to vector<2x32xf32>
    %294 = vector.shape_cast %248 : vector<2x1xi1> to vector<2x1xi1>
    %295 = vector.broadcast %294 : vector<2x1xi1> to vector<2x32xi1>
    %296 = arith.select %295, %286, %293 : vector<2x32xi1>, vector<2x32xf32>
    %c0_139 = arith.constant 0 : index
    %c0_140 = arith.constant 0 : index
    %297 = vector.load %arg10[%c0_139, %c0_140] : memref<2x32xf32, #tpu.memory_space<vmem>>, vector<2x32xf32>
    tpu.vector_store %arg10[%c0_139, %c0_140], %289 {strides = array<i32>} : memref<2x32xf32, #tpu.memory_space<vmem>>, vector<2x32xf32>,
    %c0_141 = arith.constant 0 : index
    %c0_142 = arith.constant 0 : index
    %298 = vector.load %arg11[%c0_141, %c0_142] : memref<2x32xf32, #tpu.memory_space<vmem>>, vector<2x32xf32>
    tpu.vector_store %arg11[%c0_141, %c0_142], %292 {strides = array<i32>} : memref<2x32xf32, #tpu.memory_space<vmem>>, vector<2x32xf32>,
    %299 = arith.index_cast %c4_i32 : i32 to index
    %c0_143 = arith.constant 0 : index
    %c0_144 = arith.constant 0 : index
    %300 = vector.load %arg14[%299, %c0_143, %c0_144] : memref<8x2x32xf32, #tpu.memory_space<vmem>>, vector<1x2x32xf32>
    %301 = vector.shape_cast %300 : vector<1x2x32xf32> to vector<2x32xf32>
    %302 = vector.shape_cast %296 : vector<2x32xf32> to vector<1x2x32xf32>
    tpu.vector_store %arg14[%299, %c0_143, %c0_144], %302 {strides = array<i32>} : memref<8x2x32xf32, #tpu.memory_space<vmem>>, vector<1x2x32xf32>,
    %c5_i32 = arith.constant 5 : i32
    %303 = arith.index_cast %c5_i32 : i32 to index
    %c0_145 = arith.constant 0 : index
    %c0_146 = arith.constant 0 : index
    %304 = vector.load %arg2[%303, %c0_145, %c0_146] : memref<8x2x1xf32, #tpu.memory_space<vmem>>, vector<1x2x1xf32>
    %305 = vector.shape_cast %304 : vector<1x2x1xf32> to vector<2x1xf32>
    %cst_147 = arith.constant 0.000000e+00 : f32
    %306 = vector.broadcast %cst_147 : f32 to vector<2x1xf32>
    %307 = arith.cmpf ogt, %305, %306 : vector<2x1xf32>
    %308 = arith.index_cast %c5_i32 : i32 to index
    %c0_148 = arith.constant 0 : index
    %c0_149 = arith.constant 0 : index
    %309 = vector.load %arg1[%308, %c0_148, %c0_149] : memref<8x2x32xf32, #tpu.memory_space<vmem>>, vector<1x2x32xf32>
    %310 = vector.shape_cast %309 : vector<1x2x32xf32> to vector<2x32xf32>
    %c0_150 = arith.constant 0 : index
    %c0_151 = arith.constant 0 : index
    %311 = vector.load %arg10[%c0_150, %c0_151] : memref<2x32xf32, #tpu.memory_space<vmem>>, vector<2x32xf32>
    %c0_152 = arith.constant 0 : index
    %c0_153 = arith.constant 0 : index
    %312 = vector.load %arg11[%c0_152, %c0_153] : memref<2x32xf32, #tpu.memory_space<vmem>>, vector<2x32xf32>
    %c0_154 = arith.constant 0 : index
    %c0_155 = arith.constant 0 : index
    %313 = vector.load %arg3[%c0_154, %c0_155] : memref<32x128xf32, #tpu.memory_space<vmem>>, vector<32x128xf32>
    %c0_156 = arith.constant 0 : index
    %c0_157 = arith.constant 0 : index
    %314 = vector.load %arg4[%c0_156, %c0_157] : memref<32x128xf32, #tpu.memory_space<vmem>>, vector<32x128xf32>
    %c0_158 = arith.constant 0 : index
    %c0_159 = arith.constant 0 : index
    %315 = vector.load %arg5[%c0_158, %c0_159] : memref<1x128xf32, #tpu.memory_space<vmem>>, vector<1x128xf32>
    %cst_160 = arith.constant dense<0.000000e+00> : vector<2x128xf32>
    %316 = tpu.matmul %310, %313, %cst_160 {dimension_numbers = #tpu.dot_dimension_numbers<[1], [0], [0], [1], [0, 0, 1, 1], [], []>} : vector<2x32xf32>, vector<32x128xf32>, vector<2x128xf32> -> vector<2x128xf32>
    %cst_161 = arith.constant dense<0.000000e+00> : vector<2x128xf32>
    %317 = tpu.matmul %311, %314, %cst_161 {dimension_numbers = #tpu.dot_dimension_numbers<[1], [0], [0], [1], [0, 0, 1, 1], [], []>} : vector<2x32xf32>, vector<32x128xf32>, vector<2x128xf32> -> vector<2x128xf32>
    %318 = arith.addf %316, %317 : vector<2x128xf32>
    %319 = vector.broadcast %315 : vector<1x128xf32> to vector<2x128xf32>
    %320 = arith.addf %318, %319 : vector<2x128xf32>
    %321 = vector.extract_strided_slice %320 {offsets = [0, 0], sizes = [2, 32], strides = [1, 1]} : vector<2x128xf32> to vector<2x32xf32>
    %322 = arith.negf %321 : vector<2x32xf32>
    %323 = math.exp %322 : vector<2x32xf32>
    %cst_162 = arith.constant 1.000000e+00 : f32
    %324 = vector.broadcast %cst_162 : f32 to vector<2x32xf32>
    %325 = arith.addf %324, %323 : vector<2x32xf32>
    %326 = arith.divf %324, %325 : vector<2x32xf32>
    %327 = vector.extract_strided_slice %320 {offsets = [0, 32], sizes = [2, 32], strides = [1, 1]} : vector<2x128xf32> to vector<2x32xf32>
    %328 = arith.negf %327 : vector<2x32xf32>
    %329 = math.exp %328 : vector<2x32xf32>
    %cst_163 = arith.constant 1.000000e+00 : f32
    %330 = vector.broadcast %cst_163 : f32 to vector<2x32xf32>
    %331 = arith.addf %330, %329 : vector<2x32xf32>
    %332 = arith.divf %330, %331 : vector<2x32xf32>
    %333 = vector.extract_strided_slice %320 {offsets = [0, 64], sizes = [2, 32], strides = [1, 1]} : vector<2x128xf32> to vector<2x32xf32>
    %334 = math.tanh %333 : vector<2x32xf32>
    %335 = vector.extract_strided_slice %320 {offsets = [0, 96], sizes = [2, 32], strides = [1, 1]} : vector<2x128xf32> to vector<2x32xf32>
    %336 = arith.negf %335 : vector<2x32xf32>
    %337 = math.exp %336 : vector<2x32xf32>
    %cst_164 = arith.constant 1.000000e+00 : f32
    %338 = vector.broadcast %cst_164 : f32 to vector<2x32xf32>
    %339 = arith.addf %338, %337 : vector<2x32xf32>
    %340 = arith.divf %338, %339 : vector<2x32xf32>
    %341 = arith.mulf %332, %312 : vector<2x32xf32>
    %342 = arith.mulf %326, %334 : vector<2x32xf32>
    %343 = arith.addf %341, %342 : vector<2x32xf32>
    %344 = math.tanh %343 : vector<2x32xf32>
    %345 = arith.mulf %340, %344 : vector<2x32xf32>
    %346 = vector.shape_cast %307 : vector<2x1xi1> to vector<2x1xi1>
    %347 = vector.broadcast %346 : vector<2x1xi1> to vector<2x32xi1>
    %348 = arith.select %347, %345, %311 : vector<2x32xi1>, vector<2x32xf32>
    %349 = vector.shape_cast %307 : vector<2x1xi1> to vector<2x1xi1>
    %350 = vector.broadcast %349 : vector<2x1xi1> to vector<2x32xi1>
    %351 = arith.select %350, %343, %312 : vector<2x32xi1>, vector<2x32xf32>
    %cst_165 = arith.constant 0.000000e+00 : f32
    %352 = vector.broadcast %cst_165 : f32 to vector<2x32xf32>
    %353 = vector.shape_cast %307 : vector<2x1xi1> to vector<2x1xi1>
    %354 = vector.broadcast %353 : vector<2x1xi1> to vector<2x32xi1>
    %355 = arith.select %354, %345, %352 : vector<2x32xi1>, vector<2x32xf32>
    %c0_166 = arith.constant 0 : index
    %c0_167 = arith.constant 0 : index
    %356 = vector.load %arg10[%c0_166, %c0_167] : memref<2x32xf32, #tpu.memory_space<vmem>>, vector<2x32xf32>
    tpu.vector_store %arg10[%c0_166, %c0_167], %348 {strides = array<i32>} : memref<2x32xf32, #tpu.memory_space<vmem>>, vector<2x32xf32>,
    %c0_168 = arith.constant 0 : index
    %c0_169 = arith.constant 0 : index
    %357 = vector.load %arg11[%c0_168, %c0_169] : memref<2x32xf32, #tpu.memory_space<vmem>>, vector<2x32xf32>
    tpu.vector_store %arg11[%c0_168, %c0_169], %351 {strides = array<i32>} : memref<2x32xf32, #tpu.memory_space<vmem>>, vector<2x32xf32>,
    %358 = arith.index_cast %c5_i32 : i32 to index
    %c0_170 = arith.constant 0 : index
    %c0_171 = arith.constant 0 : index
    %359 = vector.load %arg14[%358, %c0_170, %c0_171] : memref<8x2x32xf32, #tpu.memory_space<vmem>>, vector<1x2x32xf32>
    %360 = vector.shape_cast %359 : vector<1x2x32xf32> to vector<2x32xf32>
    %361 = vector.shape_cast %355 : vector<2x32xf32> to vector<1x2x32xf32>
    tpu.vector_store %arg14[%358, %c0_170, %c0_171], %361 {strides = array<i32>} : memref<8x2x32xf32, #tpu.memory_space<vmem>>, vector<1x2x32xf32>,
    %c6_i32 = arith.constant 6 : i32
    %362 = arith.index_cast %c6_i32 : i32 to index
    %c0_172 = arith.constant 0 : index
    %c0_173 = arith.constant 0 : index
    %363 = vector.load %arg2[%362, %c0_172, %c0_173] : memref<8x2x1xf32, #tpu.memory_space<vmem>>, vector<1x2x1xf32>
    %364 = vector.shape_cast %363 : vector<1x2x1xf32> to vector<2x1xf32>
    %cst_174 = arith.constant 0.000000e+00 : f32
    %365 = vector.broadcast %cst_174 : f32 to vector<2x1xf32>
    %366 = arith.cmpf ogt, %364, %365 : vector<2x1xf32>
    %367 = arith.index_cast %c6_i32 : i32 to index
    %c0_175 = arith.constant 0 : index
    %c0_176 = arith.constant 0 : index
    %368 = vector.load %arg1[%367, %c0_175, %c0_176] : memref<8x2x32xf32, #tpu.memory_space<vmem>>, vector<1x2x32xf32>
    %369 = vector.shape_cast %368 : vector<1x2x32xf32> to vector<2x32xf32>
    %c0_177 = arith.constant 0 : index
    %c0_178 = arith.constant 0 : index
    %370 = vector.load %arg10[%c0_177, %c0_178] : memref<2x32xf32, #tpu.memory_space<vmem>>, vector<2x32xf32>
    %c0_179 = arith.constant 0 : index
    %c0_180 = arith.constant 0 : index
    %371 = vector.load %arg11[%c0_179, %c0_180] : memref<2x32xf32, #tpu.memory_space<vmem>>, vector<2x32xf32>
    %c0_181 = arith.constant 0 : index
    %c0_182 = arith.constant 0 : index
    %372 = vector.load %arg3[%c0_181, %c0_182] : memref<32x128xf32, #tpu.memory_space<vmem>>, vector<32x128xf32>
    %c0_183 = arith.constant 0 : index
    %c0_184 = arith.constant 0 : index
    %373 = vector.load %arg4[%c0_183, %c0_184] : memref<32x128xf32, #tpu.memory_space<vmem>>, vector<32x128xf32>
    %c0_185 = arith.constant 0 : index
    %c0_186 = arith.constant 0 : index
    %374 = vector.load %arg5[%c0_185, %c0_186] : memref<1x128xf32, #tpu.memory_space<vmem>>, vector<1x128xf32>
    %cst_187 = arith.constant dense<0.000000e+00> : vector<2x128xf32>
    %375 = tpu.matmul %369, %372, %cst_187 {dimension_numbers = #tpu.dot_dimension_numbers<[1], [0], [0], [1], [0, 0, 1, 1], [], []>} : vector<2x32xf32>, vector<32x128xf32>, vector<2x128xf32> -> vector<2x128xf32>
    %cst_188 = arith.constant dense<0.000000e+00> : vector<2x128xf32>
    %376 = tpu.matmul %370, %373, %cst_188 {dimension_numbers = #tpu.dot_dimension_numbers<[1], [0], [0], [1], [0, 0, 1, 1], [], []>} : vector<2x32xf32>, vector<32x128xf32>, vector<2x128xf32> -> vector<2x128xf32>
    %377 = arith.addf %375, %376 : vector<2x128xf32>
    %378 = vector.broadcast %374 : vector<1x128xf32> to vector<2x128xf32>
    %379 = arith.addf %377, %378 : vector<2x128xf32>
    %380 = vector.extract_strided_slice %379 {offsets = [0, 0], sizes = [2, 32], strides = [1, 1]} : vector<2x128xf32> to vector<2x32xf32>
    %381 = arith.negf %380 : vector<2x32xf32>
    %382 = math.exp %381 : vector<2x32xf32>
    %cst_189 = arith.constant 1.000000e+00 : f32
    %383 = vector.broadcast %cst_189 : f32 to vector<2x32xf32>
    %384 = arith.addf %383, %382 : vector<2x32xf32>
    %385 = arith.divf %383, %384 : vector<2x32xf32>
    %386 = vector.extract_strided_slice %379 {offsets = [0, 32], sizes = [2, 32], strides = [1, 1]} : vector<2x128xf32> to vector<2x32xf32>
    %387 = arith.negf %386 : vector<2x32xf32>
    %388 = math.exp %387 : vector<2x32xf32>
    %cst_190 = arith.constant 1.000000e+00 : f32
    %389 = vector.broadcast %cst_190 : f32 to vector<2x32xf32>
    %390 = arith.addf %389, %388 : vector<2x32xf32>
    %391 = arith.divf %389, %390 : vector<2x32xf32>
    %392 = vector.extract_strided_slice %379 {offsets = [0, 64], sizes = [2, 32], strides = [1, 1]} : vector<2x128xf32> to vector<2x32xf32>
    %393 = math.tanh %392 : vector<2x32xf32>
    %394 = vector.extract_strided_slice %379 {offsets = [0, 96], sizes = [2, 32], strides = [1, 1]} : vector<2x128xf32> to vector<2x32xf32>
    %395 = arith.negf %394 : vector<2x32xf32>
    %396 = math.exp %395 : vector<2x32xf32>
    %cst_191 = arith.constant 1.000000e+00 : f32
    %397 = vector.broadcast %cst_191 : f32 to vector<2x32xf32>
    %398 = arith.addf %397, %396 : vector<2x32xf32>
    %399 = arith.divf %397, %398 : vector<2x32xf32>
    %400 = arith.mulf %391, %371 : vector<2x32xf32>
    %401 = arith.mulf %385, %393 : vector<2x32xf32>
    %402 = arith.addf %400, %401 : vector<2x32xf32>
    %403 = math.tanh %402 : vector<2x32xf32>
    %404 = arith.mulf %399, %403 : vector<2x32xf32>
    %405 = vector.shape_cast %366 : vector<2x1xi1> to vector<2x1xi1>
    %406 = vector.broadcast %405 : vector<2x1xi1> to vector<2x32xi1>
    %407 = arith.select %406, %404, %370 : vector<2x32xi1>, vector<2x32xf32>
    %408 = vector.shape_cast %366 : vector<2x1xi1> to vector<2x1xi1>
    %409 = vector.broadcast %408 : vector<2x1xi1> to vector<2x32xi1>
    %410 = arith.select %409, %402, %371 : vector<2x32xi1>, vector<2x32xf32>
    %cst_192 = arith.constant 0.000000e+00 : f32
    %411 = vector.broadcast %cst_192 : f32 to vector<2x32xf32>
    %412 = vector.shape_cast %366 : vector<2x1xi1> to vector<2x1xi1>
    %413 = vector.broadcast %412 : vector<2x1xi1> to vector<2x32xi1>
    %414 = arith.select %413, %404, %411 : vector<2x32xi1>, vector<2x32xf32>
    %c0_193 = arith.constant 0 : index
    %c0_194 = arith.constant 0 : index
    %415 = vector.load %arg10[%c0_193, %c0_194] : memref<2x32xf32, #tpu.memory_space<vmem>>, vector<2x32xf32>
    tpu.vector_store %arg10[%c0_193, %c0_194], %407 {strides = array<i32>} : memref<2x32xf32, #tpu.memory_space<vmem>>, vector<2x32xf32>,
    %c0_195 = arith.constant 0 : index
    %c0_196 = arith.constant 0 : index
    %416 = vector.load %arg11[%c0_195, %c0_196] : memref<2x32xf32, #tpu.memory_space<vmem>>, vector<2x32xf32>
    tpu.vector_store %arg11[%c0_195, %c0_196], %410 {strides = array<i32>} : memref<2x32xf32, #tpu.memory_space<vmem>>, vector<2x32xf32>,
    %417 = arith.index_cast %c6_i32 : i32 to index
    %c0_197 = arith.constant 0 : index
    %c0_198 = arith.constant 0 : index
    %418 = vector.load %arg14[%417, %c0_197, %c0_198] : memref<8x2x32xf32, #tpu.memory_space<vmem>>, vector<1x2x32xf32>
    %419 = vector.shape_cast %418 : vector<1x2x32xf32> to vector<2x32xf32>
    %420 = vector.shape_cast %414 : vector<2x32xf32> to vector<1x2x32xf32>
    tpu.vector_store %arg14[%417, %c0_197, %c0_198], %420 {strides = array<i32>} : memref<8x2x32xf32, #tpu.memory_space<vmem>>, vector<1x2x32xf32>,
    %c7_i32 = arith.constant 7 : i32
    %421 = arith.index_cast %c7_i32 : i32 to index
    %c0_199 = arith.constant 0 : index
    %c0_200 = arith.constant 0 : index
    %422 = vector.load %arg2[%421, %c0_199, %c0_200] : memref<8x2x1xf32, #tpu.memory_space<vmem>>, vector<1x2x1xf32>
    %423 = vector.shape_cast %422 : vector<1x2x1xf32> to vector<2x1xf32>
    %cst_201 = arith.constant 0.000000e+00 : f32
    %424 = vector.broadcast %cst_201 : f32 to vector<2x1xf32>
    %425 = arith.cmpf ogt, %423, %424 : vector<2x1xf32>
    %426 = arith.index_cast %c7_i32 : i32 to index
    %c0_202 = arith.constant 0 : index
    %c0_203 = arith.constant 0 : index
    %427 = vector.load %arg1[%426, %c0_202, %c0_203] : memref<8x2x32xf32, #tpu.memory_space<vmem>>, vector<1x2x32xf32>
    %428 = vector.shape_cast %427 : vector<1x2x32xf32> to vector<2x32xf32>
    %c0_204 = arith.constant 0 : index
    %c0_205 = arith.constant 0 : index
    %429 = vector.load %arg10[%c0_204, %c0_205] : memref<2x32xf32, #tpu.memory_space<vmem>>, vector<2x32xf32>
    %c0_206 = arith.constant 0 : index
    %c0_207 = arith.constant 0 : index
    %430 = vector.load %arg11[%c0_206, %c0_207] : memref<2x32xf32, #tpu.memory_space<vmem>>, vector<2x32xf32>
    %c0_208 = arith.constant 0 : index
    %c0_209 = arith.constant 0 : index
    %431 = vector.load %arg3[%c0_208, %c0_209] : memref<32x128xf32, #tpu.memory_space<vmem>>, vector<32x128xf32>
    %c0_210 = arith.constant 0 : index
    %c0_211 = arith.constant 0 : index
    %432 = vector.load %arg4[%c0_210, %c0_211] : memref<32x128xf32, #tpu.memory_space<vmem>>, vector<32x128xf32>
    %c0_212 = arith.constant 0 : index
    %c0_213 = arith.constant 0 : index
    %433 = vector.load %arg5[%c0_212, %c0_213] : memref<1x128xf32, #tpu.memory_space<vmem>>, vector<1x128xf32>
    %cst_214 = arith.constant dense<0.000000e+00> : vector<2x128xf32>
    %434 = tpu.matmul %428, %431, %cst_214 {dimension_numbers = #tpu.dot_dimension_numbers<[1], [0], [0], [1], [0, 0, 1, 1], [], []>} : vector<2x32xf32>, vector<32x128xf32>, vector<2x128xf32> -> vector<2x128xf32>
    %cst_215 = arith.constant dense<0.000000e+00> : vector<2x128xf32>
    %435 = tpu.matmul %429, %432, %cst_215 {dimension_numbers = #tpu.dot_dimension_numbers<[1], [0], [0], [1], [0, 0, 1, 1], [], []>} : vector<2x32xf32>, vector<32x128xf32>, vector<2x128xf32> -> vector<2x128xf32>
    %436 = arith.addf %434, %435 : vector<2x128xf32>
    %437 = vector.broadcast %433 : vector<1x128xf32> to vector<2x128xf32>
    %438 = arith.addf %436, %437 : vector<2x128xf32>
    %439 = vector.extract_strided_slice %438 {offsets = [0, 0], sizes = [2, 32], strides = [1, 1]} : vector<2x128xf32> to vector<2x32xf32>
    %440 = arith.negf %439 : vector<2x32xf32>
    %441 = math.exp %440 : vector<2x32xf32>
    %cst_216 = arith.constant 1.000000e+00 : f32
    %442 = vector.broadcast %cst_216 : f32 to vector<2x32xf32>
    %443 = arith.addf %442, %441 : vector<2x32xf32>
    %444 = arith.divf %442, %443 : vector<2x32xf32>
    %445 = vector.extract_strided_slice %438 {offsets = [0, 32], sizes = [2, 32], strides = [1, 1]} : vector<2x128xf32> to vector<2x32xf32>
    %446 = arith.negf %445 : vector<2x32xf32>
    %447 = math.exp %446 : vector<2x32xf32>
    %cst_217 = arith.constant 1.000000e+00 : f32
    %448 = vector.broadcast %cst_217 : f32 to vector<2x32xf32>
    %449 = arith.addf %448, %447 : vector<2x32xf32>
    %450 = arith.divf %448, %449 : vector<2x32xf32>
    %451 = vector.extract_strided_slice %438 {offsets = [0, 64], sizes = [2, 32], strides = [1, 1]} : vector<2x128xf32> to vector<2x32xf32>
    %452 = math.tanh %451 : vector<2x32xf32>
    %453 = vector.extract_strided_slice %438 {offsets = [0, 96], sizes = [2, 32], strides = [1, 1]} : vector<2x128xf32> to vector<2x32xf32>
    %454 = arith.negf %453 : vector<2x32xf32>
    %455 = math.exp %454 : vector<2x32xf32>
    %cst_218 = arith.constant 1.000000e+00 : f32
    %456 = vector.broadcast %cst_218 : f32 to vector<2x32xf32>
    %457 = arith.addf %456, %455 : vector<2x32xf32>
    %458 = arith.divf %456, %457 : vector<2x32xf32>
    %459 = arith.mulf %450, %430 : vector<2x32xf32>
    %460 = arith.mulf %444, %452 : vector<2x32xf32>
    %461 = arith.addf %459, %460 : vector<2x32xf32>
    %462 = math.tanh %461 : vector<2x32xf32>
    %463 = arith.mulf %458, %462 : vector<2x32xf32>
    %464 = vector.shape_cast %425 : vector<2x1xi1> to vector<2x1xi1>
    %465 = vector.broadcast %464 : vector<2x1xi1> to vector<2x32xi1>
    %466 = arith.select %465, %463, %429 : vector<2x32xi1>, vector<2x32xf32>
    %467 = vector.shape_cast %425 : vector<2x1xi1> to vector<2x1xi1>
    %468 = vector.broadcast %467 : vector<2x1xi1> to vector<2x32xi1>
    %469 = arith.select %468, %461, %430 : vector<2x32xi1>, vector<2x32xf32>
    %cst_219 = arith.constant 0.000000e+00 : f32
    %470 = vector.broadcast %cst_219 : f32 to vector<2x32xf32>
    %471 = vector.shape_cast %425 : vector<2x1xi1> to vector<2x1xi1>
    %472 = vector.broadcast %471 : vector<2x1xi1> to vector<2x32xi1>
    %473 = arith.select %472, %463, %470 : vector<2x32xi1>, vector<2x32xf32>
    %c0_220 = arith.constant 0 : index
    %c0_221 = arith.constant 0 : index
    %474 = vector.load %arg10[%c0_220, %c0_221] : memref<2x32xf32, #tpu.memory_space<vmem>>, vector<2x32xf32>
    tpu.vector_store %arg10[%c0_220, %c0_221], %466 {strides = array<i32>} : memref<2x32xf32, #tpu.memory_space<vmem>>, vector<2x32xf32>,
    %c0_222 = arith.constant 0 : index
    %c0_223 = arith.constant 0 : index
    %475 = vector.load %arg11[%c0_222, %c0_223] : memref<2x32xf32, #tpu.memory_space<vmem>>, vector<2x32xf32>
    tpu.vector_store %arg11[%c0_222, %c0_223], %469 {strides = array<i32>} : memref<2x32xf32, #tpu.memory_space<vmem>>, vector<2x32xf32>,
    %476 = arith.index_cast %c7_i32 : i32 to index
    %c0_224 = arith.constant 0 : index
    %c0_225 = arith.constant 0 : index
    %477 = vector.load %arg14[%476, %c0_224, %c0_225] : memref<8x2x32xf32, #tpu.memory_space<vmem>>, vector<1x2x32xf32>
    %478 = vector.shape_cast %477 : vector<1x2x32xf32> to vector<2x32xf32>
    %479 = vector.shape_cast %473 : vector<2x32xf32> to vector<1x2x32xf32>
    tpu.vector_store %arg14[%476, %c0_224, %c0_225], %479 {strides = array<i32>} : memref<8x2x32xf32, #tpu.memory_space<vmem>>, vector<1x2x32xf32>,
    %c8_i32 = arith.constant 8 : i32
    %c0_i32_226 = arith.constant 0 : i32
    %c7_i32_227 = arith.constant 7 : i32
    %480 = arith.subi %c7_i32_227, %c0_i32_226 : i32
    %481 = arith.index_cast %480 : i32 to index
    %c0_228 = arith.constant 0 : index
    %c0_229 = arith.constant 0 : index
    %482 = vector.load %arg2[%481, %c0_228, %c0_229] : memref<8x2x1xf32, #tpu.memory_space<vmem>>, vector<1x2x1xf32>
    %483 = vector.shape_cast %482 : vector<1x2x1xf32> to vector<2x1xf32>
    %cst_230 = arith.constant 0.000000e+00 : f32
    %484 = vector.broadcast %cst_230 : f32 to vector<2x1xf32>
    %485 = arith.cmpf ogt, %483, %484 : vector<2x1xf32>
    %486 = arith.index_cast %480 : i32 to index
    %c0_231 = arith.constant 0 : index
    %c0_232 = arith.constant 0 : index
    %487 = vector.load %arg1[%486, %c0_231, %c0_232] : memref<8x2x32xf32, #tpu.memory_space<vmem>>, vector<1x2x32xf32>
    %488 = vector.shape_cast %487 : vector<1x2x32xf32> to vector<2x32xf32>
    %c0_233 = arith.constant 0 : index
    %c0_234 = arith.constant 0 : index
    %489 = vector.load %arg12[%c0_233, %c0_234] : memref<2x32xf32, #tpu.memory_space<vmem>>, vector<2x32xf32>
    %c0_235 = arith.constant 0 : index
    %c0_236 = arith.constant 0 : index
    %490 = vector.load %arg13[%c0_235, %c0_236] : memref<2x32xf32, #tpu.memory_space<vmem>>, vector<2x32xf32>
    %c0_237 = arith.constant 0 : index
    %c0_238 = arith.constant 0 : index
    %491 = vector.load %arg6[%c0_237, %c0_238] : memref<32x128xf32, #tpu.memory_space<vmem>>, vector<32x128xf32>
    %c0_239 = arith.constant 0 : index
    %c0_240 = arith.constant 0 : index
    %492 = vector.load %arg7[%c0_239, %c0_240] : memref<32x128xf32, #tpu.memory_space<vmem>>, vector<32x128xf32>
    %c0_241 = arith.constant 0 : index
    %c0_242 = arith.constant 0 : index
    %493 = vector.load %arg8[%c0_241, %c0_242] : memref<1x128xf32, #tpu.memory_space<vmem>>, vector<1x128xf32>
    %cst_243 = arith.constant dense<0.000000e+00> : vector<2x128xf32>
    %494 = tpu.matmul %488, %491, %cst_243 {dimension_numbers = #tpu.dot_dimension_numbers<[1], [0], [0], [1], [0, 0, 1, 1], [], []>} : vector<2x32xf32>, vector<32x128xf32>, vector<2x128xf32> -> vector<2x128xf32>
    %cst_244 = arith.constant dense<0.000000e+00> : vector<2x128xf32>
    %495 = tpu.matmul %489, %492, %cst_244 {dimension_numbers = #tpu.dot_dimension_numbers<[1], [0], [0], [1], [0, 0, 1, 1], [], []>} : vector<2x32xf32>, vector<32x128xf32>, vector<2x128xf32> -> vector<2x128xf32>
    %496 = arith.addf %494, %495 : vector<2x128xf32>
    %497 = vector.broadcast %493 : vector<1x128xf32> to vector<2x128xf32>
    %498 = arith.addf %496, %497 : vector<2x128xf32>
    %499 = vector.extract_strided_slice %498 {offsets = [0, 0], sizes = [2, 32], strides = [1, 1]} : vector<2x128xf32> to vector<2x32xf32>
    %500 = arith.negf %499 : vector<2x32xf32>
    %501 = math.exp %500 : vector<2x32xf32>
    %cst_245 = arith.constant 1.000000e+00 : f32
    %502 = vector.broadcast %cst_245 : f32 to vector<2x32xf32>
    %503 = arith.addf %502, %501 : vector<2x32xf32>
    %504 = arith.divf %502, %503 : vector<2x32xf32>
    %505 = vector.extract_strided_slice %498 {offsets = [0, 32], sizes = [2, 32], strides = [1, 1]} : vector<2x128xf32> to vector<2x32xf32>
    %506 = arith.negf %505 : vector<2x32xf32>
    %507 = math.exp %506 : vector<2x32xf32>
    %cst_246 = arith.constant 1.000000e+00 : f32
    %508 = vector.broadcast %cst_246 : f32 to vector<2x32xf32>
    %509 = arith.addf %508, %507 : vector<2x32xf32>
    %510 = arith.divf %508, %509 : vector<2x32xf32>
    %511 = vector.extract_strided_slice %498 {offsets = [0, 64], sizes = [2, 32], strides = [1, 1]} : vector<2x128xf32> to vector<2x32xf32>
    %512 = math.tanh %511 : vector<2x32xf32>
    %513 = vector.extract_strided_slice %498 {offsets = [0, 96], sizes = [2, 32], strides = [1, 1]} : vector<2x128xf32> to vector<2x32xf32>
    %514 = arith.negf %513 : vector<2x32xf32>
    %515 = math.exp %514 : vector<2x32xf32>
    %cst_247 = arith.constant 1.000000e+00 : f32
    %516 = vector.broadcast %cst_247 : f32 to vector<2x32xf32>
    %517 = arith.addf %516, %515 : vector<2x32xf32>
    %518 = arith.divf %516, %517 : vector<2x32xf32>
    %519 = arith.mulf %510, %490 : vector<2x32xf32>
    %520 = arith.mulf %504, %512 : vector<2x32xf32>
    %521 = arith.addf %519, %520 : vector<2x32xf32>
    %522 = math.tanh %521 : vector<2x32xf32>
    %523 = arith.mulf %518, %522 : vector<2x32xf32>
    %524 = vector.shape_cast %485 : vector<2x1xi1> to vector<2x1xi1>
    %525 = vector.broadcast %524 : vector<2x1xi1> to vector<2x32xi1>
    %526 = arith.select %525, %523, %489 : vector<2x32xi1>, vector<2x32xf32>
    %527 = vector.shape_cast %485 : vector<2x1xi1> to vector<2x1xi1>
    %528 = vector.broadcast %527 : vector<2x1xi1> to vector<2x32xi1>
    %529 = arith.select %528, %521, %490 : vector<2x32xi1>, vector<2x32xf32>
    %cst_248 = arith.constant 0.000000e+00 : f32
    %530 = vector.broadcast %cst_248 : f32 to vector<2x32xf32>
    %531 = vector.shape_cast %485 : vector<2x1xi1> to vector<2x1xi1>
    %532 = vector.broadcast %531 : vector<2x1xi1> to vector<2x32xi1>
    %533 = arith.select %532, %523, %530 : vector<2x32xi1>, vector<2x32xf32>
    %c0_249 = arith.constant 0 : index
    %c0_250 = arith.constant 0 : index
    %534 = vector.load %arg12[%c0_249, %c0_250] : memref<2x32xf32, #tpu.memory_space<vmem>>, vector<2x32xf32>
    tpu.vector_store %arg12[%c0_249, %c0_250], %526 {strides = array<i32>} : memref<2x32xf32, #tpu.memory_space<vmem>>, vector<2x32xf32>,
    %c0_251 = arith.constant 0 : index
    %c0_252 = arith.constant 0 : index
    %535 = vector.load %arg13[%c0_251, %c0_252] : memref<2x32xf32, #tpu.memory_space<vmem>>, vector<2x32xf32>
    tpu.vector_store %arg13[%c0_251, %c0_252], %529 {strides = array<i32>} : memref<2x32xf32, #tpu.memory_space<vmem>>, vector<2x32xf32>,
    %536 = arith.index_cast %480 : i32 to index
    %c0_253 = arith.constant 0 : index
    %c0_254 = arith.constant 0 : index
    %537 = vector.load %arg14[%536, %c0_253, %c0_254] : memref<8x2x32xf32, #tpu.memory_space<vmem>>, vector<1x2x32xf32>
    %538 = vector.shape_cast %537 : vector<1x2x32xf32> to vector<2x32xf32>
    %539 = tpu.concatenate %538, %533 in 1 : vector<2x32xf32>, vector<2x32xf32> -> vector<2x64xf32>
    %540 = arith.index_cast %480 : i32 to index
    %c0_255 = arith.constant 0 : index
    %c0_256 = arith.constant 0 : index
    %541 = vector.load %arg9[%540, %c0_255, %c0_256] : memref<8x2x64xf32, #tpu.memory_space<vmem>>, vector<1x2x64xf32>
    %542 = vector.shape_cast %541 : vector<1x2x64xf32> to vector<2x64xf32>
    %543 = vector.shape_cast %539 : vector<2x64xf32> to vector<1x2x64xf32>
    tpu.vector_store %arg9[%540, %c0_255, %c0_256], %543 {strides = array<i32>} : memref<8x2x64xf32, #tpu.memory_space<vmem>>, vector<1x2x64xf32>,
    %c1_i32_257 = arith.constant 1 : i32
    %c7_i32_258 = arith.constant 7 : i32
    %544 = arith.subi %c7_i32_258, %c1_i32_257 : i32
    %545 = arith.index_cast %544 : i32 to index
    %c0_259 = arith.constant 0 : index
    %c0_260 = arith.constant 0 : index
    %546 = vector.load %arg2[%545, %c0_259, %c0_260] : memref<8x2x1xf32, #tpu.memory_space<vmem>>, vector<1x2x1xf32>
    %547 = vector.shape_cast %546 : vector<1x2x1xf32> to vector<2x1xf32>
    %cst_261 = arith.constant 0.000000e+00 : f32
    %548 = vector.broadcast %cst_261 : f32 to vector<2x1xf32>
    %549 = arith.cmpf ogt, %547, %548 : vector<2x1xf32>
    %550 = arith.index_cast %544 : i32 to index
    %c0_262 = arith.constant 0 : index
    %c0_263 = arith.constant 0 : index
    %551 = vector.load %arg1[%550, %c0_262, %c0_263] : memref<8x2x32xf32, #tpu.memory_space<vmem>>, vector<1x2x32xf32>
    %552 = vector.shape_cast %551 : vector<1x2x32xf32> to vector<2x32xf32>
    %c0_264 = arith.constant 0 : index
    %c0_265 = arith.constant 0 : index
    %553 = vector.load %arg12[%c0_264, %c0_265] : memref<2x32xf32, #tpu.memory_space<vmem>>, vector<2x32xf32>
    %c0_266 = arith.constant 0 : index
    %c0_267 = arith.constant 0 : index
    %554 = vector.load %arg13[%c0_266, %c0_267] : memref<2x32xf32, #tpu.memory_space<vmem>>, vector<2x32xf32>
    %c0_268 = arith.constant 0 : index
    %c0_269 = arith.constant 0 : index
    %555 = vector.load %arg6[%c0_268, %c0_269] : memref<32x128xf32, #tpu.memory_space<vmem>>, vector<32x128xf32>
    %c0_270 = arith.constant 0 : index
    %c0_271 = arith.constant 0 : index
    %556 = vector.load %arg7[%c0_270, %c0_271] : memref<32x128xf32, #tpu.memory_space<vmem>>, vector<32x128xf32>
    %c0_272 = arith.constant 0 : index
    %c0_273 = arith.constant 0 : index
    %557 = vector.load %arg8[%c0_272, %c0_273] : memref<1x128xf32, #tpu.memory_space<vmem>>, vector<1x128xf32>
    %cst_274 = arith.constant dense<0.000000e+00> : vector<2x128xf32>
    %558 = tpu.matmul %552, %555, %cst_274 {dimension_numbers = #tpu.dot_dimension_numbers<[1], [0], [0], [1], [0, 0, 1, 1], [], []>} : vector<2x32xf32>, vector<32x128xf32>, vector<2x128xf32> -> vector<2x128xf32>
    %cst_275 = arith.constant dense<0.000000e+00> : vector<2x128xf32>
    %559 = tpu.matmul %553, %556, %cst_275 {dimension_numbers = #tpu.dot_dimension_numbers<[1], [0], [0], [1], [0, 0, 1, 1], [], []>} : vector<2x32xf32>, vector<32x128xf32>, vector<2x128xf32> -> vector<2x128xf32>
    %560 = arith.addf %558, %559 : vector<2x128xf32>
    %561 = vector.broadcast %557 : vector<1x128xf32> to vector<2x128xf32>
    %562 = arith.addf %560, %561 : vector<2x128xf32>
    %563 = vector.extract_strided_slice %562 {offsets = [0, 0], sizes = [2, 32], strides = [1, 1]} : vector<2x128xf32> to vector<2x32xf32>
    %564 = arith.negf %563 : vector<2x32xf32>
    %565 = math.exp %564 : vector<2x32xf32>
    %cst_276 = arith.constant 1.000000e+00 : f32
    %566 = vector.broadcast %cst_276 : f32 to vector<2x32xf32>
    %567 = arith.addf %566, %565 : vector<2x32xf32>
    %568 = arith.divf %566, %567 : vector<2x32xf32>
    %569 = vector.extract_strided_slice %562 {offsets = [0, 32], sizes = [2, 32], strides = [1, 1]} : vector<2x128xf32> to vector<2x32xf32>
    %570 = arith.negf %569 : vector<2x32xf32>
    %571 = math.exp %570 : vector<2x32xf32>
    %cst_277 = arith.constant 1.000000e+00 : f32
    %572 = vector.broadcast %cst_277 : f32 to vector<2x32xf32>
    %573 = arith.addf %572, %571 : vector<2x32xf32>
    %574 = arith.divf %572, %573 : vector<2x32xf32>
    %575 = vector.extract_strided_slice %562 {offsets = [0, 64], sizes = [2, 32], strides = [1, 1]} : vector<2x128xf32> to vector<2x32xf32>
    %576 = math.tanh %575 : vector<2x32xf32>
    %577 = vector.extract_strided_slice %562 {offsets = [0, 96], sizes = [2, 32], strides = [1, 1]} : vector<2x128xf32> to vector<2x32xf32>
    %578 = arith.negf %577 : vector<2x32xf32>
    %579 = math.exp %578 : vector<2x32xf32>
    %cst_278 = arith.constant 1.000000e+00 : f32
    %580 = vector.broadcast %cst_278 : f32 to vector<2x32xf32>
    %581 = arith.addf %580, %579 : vector<2x32xf32>
    %582 = arith.divf %580, %581 : vector<2x32xf32>
    %583 = arith.mulf %574, %554 : vector<2x32xf32>
    %584 = arith.mulf %568, %576 : vector<2x32xf32>
    %585 = arith.addf %583, %584 : vector<2x32xf32>
    %586 = math.tanh %585 : vector<2x32xf32>
    %587 = arith.mulf %582, %586 : vector<2x32xf32>
    %588 = vector.shape_cast %549 : vector<2x1xi1> to vector<2x1xi1>
    %589 = vector.broadcast %588 : vector<2x1xi1> to vector<2x32xi1>
    %590 = arith.select %589, %587, %553 : vector<2x32xi1>, vector<2x32xf32>
    %591 = vector.shape_cast %549 : vector<2x1xi1> to vector<2x1xi1>
    %592 = vector.broadcast %591 : vector<2x1xi1> to vector<2x32xi1>
    %593 = arith.select %592, %585, %554 : vector<2x32xi1>, vector<2x32xf32>
    %cst_279 = arith.constant 0.000000e+00 : f32
    %594 = vector.broadcast %cst_279 : f32 to vector<2x32xf32>
    %595 = vector.shape_cast %549 : vector<2x1xi1> to vector<2x1xi1>
    %596 = vector.broadcast %595 : vector<2x1xi1> to vector<2x32xi1>
    %597 = arith.select %596, %587, %594 : vector<2x32xi1>, vector<2x32xf32>
    %c0_280 = arith.constant 0 : index
    %c0_281 = arith.constant 0 : index
    %598 = vector.load %arg12[%c0_280, %c0_281] : memref<2x32xf32, #tpu.memory_space<vmem>>, vector<2x32xf32>
    tpu.vector_store %arg12[%c0_280, %c0_281], %590 {strides = array<i32>} : memref<2x32xf32, #tpu.memory_space<vmem>>, vector<2x32xf32>,
    %c0_282 = arith.constant 0 : index
    %c0_283 = arith.constant 0 : index
    %599 = vector.load %arg13[%c0_282, %c0_283] : memref<2x32xf32, #tpu.memory_space<vmem>>, vector<2x32xf32>
    tpu.vector_store %arg13[%c0_282, %c0_283], %593 {strides = array<i32>} : memref<2x32xf32, #tpu.memory_space<vmem>>, vector<2x32xf32>,
    %600 = arith.index_cast %544 : i32 to index
    %c0_284 = arith.constant 0 : index
    %c0_285 = arith.constant 0 : index
    %601 = vector.load %arg14[%600, %c0_284, %c0_285] : memref<8x2x32xf32, #tpu.memory_space<vmem>>, vector<1x2x32xf32>
    %602 = vector.shape_cast %601 : vector<1x2x32xf32> to vector<2x32xf32>
    %603 = tpu.concatenate %602, %597 in 1 : vector<2x32xf32>, vector<2x32xf32> -> vector<2x64xf32>
    %604 = arith.index_cast %544 : i32 to index
    %c0_286 = arith.constant 0 : index
    %c0_287 = arith.constant 0 : index
    %605 = vector.load %arg9[%604, %c0_286, %c0_287] : memref<8x2x64xf32, #tpu.memory_space<vmem>>, vector<1x2x64xf32>
    %606 = vector.shape_cast %605 : vector<1x2x64xf32> to vector<2x64xf32>
    %607 = vector.shape_cast %603 : vector<2x64xf32> to vector<1x2x64xf32>
    tpu.vector_store %arg9[%604, %c0_286, %c0_287], %607 {strides = array<i32>} : memref<8x2x64xf32, #tpu.memory_space<vmem>>, vector<1x2x64xf32>,
    %c2_i32_288 = arith.constant 2 : i32
    %c7_i32_289 = arith.constant 7 : i32
    %608 = arith.subi %c7_i32_289, %c2_i32_288 : i32
    %609 = arith.index_cast %608 : i32 to index
    %c0_290 = arith.constant 0 : index
    %c0_291 = arith.constant 0 : index
    %610 = vector.load %arg2[%609, %c0_290, %c0_291] : memref<8x2x1xf32, #tpu.memory_space<vmem>>, vector<1x2x1xf32>
    %611 = vector.shape_cast %610 : vector<1x2x1xf32> to vector<2x1xf32>
    %cst_292 = arith.constant 0.000000e+00 : f32
    %612 = vector.broadcast %cst_292 : f32 to vector<2x1xf32>
    %613 = arith.cmpf ogt, %611, %612 : vector<2x1xf32>
    %614 = arith.index_cast %608 : i32 to index
    %c0_293 = arith.constant 0 : index
    %c0_294 = arith.constant 0 : index
    %615 = vector.load %arg1[%614, %c0_293, %c0_294] : memref<8x2x32xf32, #tpu.memory_space<vmem>>, vector<1x2x32xf32>
    %616 = vector.shape_cast %615 : vector<1x2x32xf32> to vector<2x32xf32>
    %c0_295 = arith.constant 0 : index
    %c0_296 = arith.constant 0 : index
    %617 = vector.load %arg12[%c0_295, %c0_296] : memref<2x32xf32, #tpu.memory_space<vmem>>, vector<2x32xf32>
    %c0_297 = arith.constant 0 : index
    %c0_298 = arith.constant 0 : index
    %618 = vector.load %arg13[%c0_297, %c0_298] : memref<2x32xf32, #tpu.memory_space<vmem>>, vector<2x32xf32>
    %c0_299 = arith.constant 0 : index
    %c0_300 = arith.constant 0 : index
    %619 = vector.load %arg6[%c0_299, %c0_300] : memref<32x128xf32, #tpu.memory_space<vmem>>, vector<32x128xf32>
    %c0_301 = arith.constant 0 : index
    %c0_302 = arith.constant 0 : index
    %620 = vector.load %arg7[%c0_301, %c0_302] : memref<32x128xf32, #tpu.memory_space<vmem>>, vector<32x128xf32>
    %c0_303 = arith.constant 0 : index
    %c0_304 = arith.constant 0 : index
    %621 = vector.load %arg8[%c0_303, %c0_304] : memref<1x128xf32, #tpu.memory_space<vmem>>, vector<1x128xf32>
    %cst_305 = arith.constant dense<0.000000e+00> : vector<2x128xf32>
    %622 = tpu.matmul %616, %619, %cst_305 {dimension_numbers = #tpu.dot_dimension_numbers<[1], [0], [0], [1], [0, 0, 1, 1], [], []>} : vector<2x32xf32>, vector<32x128xf32>, vector<2x128xf32> -> vector<2x128xf32>
    %cst_306 = arith.constant dense<0.000000e+00> : vector<2x128xf32>
    %623 = tpu.matmul %617, %620, %cst_306 {dimension_numbers = #tpu.dot_dimension_numbers<[1], [0], [0], [1], [0, 0, 1, 1], [], []>} : vector<2x32xf32>, vector<32x128xf32>, vector<2x128xf32> -> vector<2x128xf32>
    %624 = arith.addf %622, %623 : vector<2x128xf32>
    %625 = vector.broadcast %621 : vector<1x128xf32> to vector<2x128xf32>
    %626 = arith.addf %624, %625 : vector<2x128xf32>
    %627 = vector.extract_strided_slice %626 {offsets = [0, 0], sizes = [2, 32], strides = [1, 1]} : vector<2x128xf32> to vector<2x32xf32>
    %628 = arith.negf %627 : vector<2x32xf32>
    %629 = math.exp %628 : vector<2x32xf32>
    %cst_307 = arith.constant 1.000000e+00 : f32
    %630 = vector.broadcast %cst_307 : f32 to vector<2x32xf32>
    %631 = arith.addf %630, %629 : vector<2x32xf32>
    %632 = arith.divf %630, %631 : vector<2x32xf32>
    %633 = vector.extract_strided_slice %626 {offsets = [0, 32], sizes = [2, 32], strides = [1, 1]} : vector<2x128xf32> to vector<2x32xf32>
    %634 = arith.negf %633 : vector<2x32xf32>
    %635 = math.exp %634 : vector<2x32xf32>
    %cst_308 = arith.constant 1.000000e+00 : f32
    %636 = vector.broadcast %cst_308 : f32 to vector<2x32xf32>
    %637 = arith.addf %636, %635 : vector<2x32xf32>
    %638 = arith.divf %636, %637 : vector<2x32xf32>
    %639 = vector.extract_strided_slice %626 {offsets = [0, 64], sizes = [2, 32], strides = [1, 1]} : vector<2x128xf32> to vector<2x32xf32>
    %640 = math.tanh %639 : vector<2x32xf32>
    %641 = vector.extract_strided_slice %626 {offsets = [0, 96], sizes = [2, 32], strides = [1, 1]} : vector<2x128xf32> to vector<2x32xf32>
    %642 = arith.negf %641 : vector<2x32xf32>
    %643 = math.exp %642 : vector<2x32xf32>
    %cst_309 = arith.constant 1.000000e+00 : f32
    %644 = vector.broadcast %cst_309 : f32 to vector<2x32xf32>
    %645 = arith.addf %644, %643 : vector<2x32xf32>
    %646 = arith.divf %644, %645 : vector<2x32xf32>
    %647 = arith.mulf %638, %618 : vector<2x32xf32>
    %648 = arith.mulf %632, %640 : vector<2x32xf32>
    %649 = arith.addf %647, %648 : vector<2x32xf32>
    %650 = math.tanh %649 : vector<2x32xf32>
    %651 = arith.mulf %646, %650 : vector<2x32xf32>
    %652 = vector.shape_cast %613 : vector<2x1xi1> to vector<2x1xi1>
    %653 = vector.broadcast %652 : vector<2x1xi1> to vector<2x32xi1>
    %654 = arith.select %653, %651, %617 : vector<2x32xi1>, vector<2x32xf32>
    %655 = vector.shape_cast %613 : vector<2x1xi1> to vector<2x1xi1>
    %656 = vector.broadcast %655 : vector<2x1xi1> to vector<2x32xi1>
    %657 = arith.select %656, %649, %618 : vector<2x32xi1>, vector<2x32xf32>
    %cst_310 = arith.constant 0.000000e+00 : f32
    %658 = vector.broadcast %cst_310 : f32 to vector<2x32xf32>
    %659 = vector.shape_cast %613 : vector<2x1xi1> to vector<2x1xi1>
    %660 = vector.broadcast %659 : vector<2x1xi1> to vector<2x32xi1>
    %661 = arith.select %660, %651, %658 : vector<2x32xi1>, vector<2x32xf32>
    %c0_311 = arith.constant 0 : index
    %c0_312 = arith.constant 0 : index
    %662 = vector.load %arg12[%c0_311, %c0_312] : memref<2x32xf32, #tpu.memory_space<vmem>>, vector<2x32xf32>
    tpu.vector_store %arg12[%c0_311, %c0_312], %654 {strides = array<i32>} : memref<2x32xf32, #tpu.memory_space<vmem>>, vector<2x32xf32>,
    %c0_313 = arith.constant 0 : index
    %c0_314 = arith.constant 0 : index
    %663 = vector.load %arg13[%c0_313, %c0_314] : memref<2x32xf32, #tpu.memory_space<vmem>>, vector<2x32xf32>
    tpu.vector_store %arg13[%c0_313, %c0_314], %657 {strides = array<i32>} : memref<2x32xf32, #tpu.memory_space<vmem>>, vector<2x32xf32>,
    %664 = arith.index_cast %608 : i32 to index
    %c0_315 = arith.constant 0 : index
    %c0_316 = arith.constant 0 : index
    %665 = vector.load %arg14[%664, %c0_315, %c0_316] : memref<8x2x32xf32, #tpu.memory_space<vmem>>, vector<1x2x32xf32>
    %666 = vector.shape_cast %665 : vector<1x2x32xf32> to vector<2x32xf32>
    %667 = tpu.concatenate %666, %661 in 1 : vector<2x32xf32>, vector<2x32xf32> -> vector<2x64xf32>
    %668 = arith.index_cast %608 : i32 to index
    %c0_317 = arith.constant 0 : index
    %c0_318 = arith.constant 0 : index
    %669 = vector.load %arg9[%668, %c0_317, %c0_318] : memref<8x2x64xf32, #tpu.memory_space<vmem>>, vector<1x2x64xf32>
    %670 = vector.shape_cast %669 : vector<1x2x64xf32> to vector<2x64xf32>
    %671 = vector.shape_cast %667 : vector<2x64xf32> to vector<1x2x64xf32>
    tpu.vector_store %arg9[%668, %c0_317, %c0_318], %671 {strides = array<i32>} : memref<8x2x64xf32, #tpu.memory_space<vmem>>, vector<1x2x64xf32>,
    %c3_i32_319 = arith.constant 3 : i32
    %c7_i32_320 = arith.constant 7 : i32
    %672 = arith.subi %c7_i32_320, %c3_i32_319 : i32
    %673 = arith.index_cast %672 : i32 to index
    %c0_321 = arith.constant 0 : index
    %c0_322 = arith.constant 0 : index
    %674 = vector.load %arg2[%673, %c0_321, %c0_322] : memref<8x2x1xf32, #tpu.memory_space<vmem>>, vector<1x2x1xf32>
    %675 = vector.shape_cast %674 : vector<1x2x1xf32> to vector<2x1xf32>
    %cst_323 = arith.constant 0.000000e+00 : f32
    %676 = vector.broadcast %cst_323 : f32 to vector<2x1xf32>
    %677 = arith.cmpf ogt, %675, %676 : vector<2x1xf32>
    %678 = arith.index_cast %672 : i32 to index
    %c0_324 = arith.constant 0 : index
    %c0_325 = arith.constant 0 : index
    %679 = vector.load %arg1[%678, %c0_324, %c0_325] : memref<8x2x32xf32, #tpu.memory_space<vmem>>, vector<1x2x32xf32>
    %680 = vector.shape_cast %679 : vector<1x2x32xf32> to vector<2x32xf32>
    %c0_326 = arith.constant 0 : index
    %c0_327 = arith.constant 0 : index
    %681 = vector.load %arg12[%c0_326, %c0_327] : memref<2x32xf32, #tpu.memory_space<vmem>>, vector<2x32xf32>
    %c0_328 = arith.constant 0 : index
    %c0_329 = arith.constant 0 : index
    %682 = vector.load %arg13[%c0_328, %c0_329] : memref<2x32xf32, #tpu.memory_space<vmem>>, vector<2x32xf32>
    %c0_330 = arith.constant 0 : index
    %c0_331 = arith.constant 0 : index
    %683 = vector.load %arg6[%c0_330, %c0_331] : memref<32x128xf32, #tpu.memory_space<vmem>>, vector<32x128xf32>
    %c0_332 = arith.constant 0 : index
    %c0_333 = arith.constant 0 : index
    %684 = vector.load %arg7[%c0_332, %c0_333] : memref<32x128xf32, #tpu.memory_space<vmem>>, vector<32x128xf32>
    %c0_334 = arith.constant 0 : index
    %c0_335 = arith.constant 0 : index
    %685 = vector.load %arg8[%c0_334, %c0_335] : memref<1x128xf32, #tpu.memory_space<vmem>>, vector<1x128xf32>
    %cst_336 = arith.constant dense<0.000000e+00> : vector<2x128xf32>
    %686 = tpu.matmul %680, %683, %cst_336 {dimension_numbers = #tpu.dot_dimension_numbers<[1], [0], [0], [1], [0, 0, 1, 1], [], []>} : vector<2x32xf32>, vector<32x128xf32>, vector<2x128xf32> -> vector<2x128xf32>
    %cst_337 = arith.constant dense<0.000000e+00> : vector<2x128xf32>
    %687 = tpu.matmul %681, %684, %cst_337 {dimension_numbers = #tpu.dot_dimension_numbers<[1], [0], [0], [1], [0, 0, 1, 1], [], []>} : vector<2x32xf32>, vector<32x128xf32>, vector<2x128xf32> -> vector<2x128xf32>
    %688 = arith.addf %686, %687 : vector<2x128xf32>
    %689 = vector.broadcast %685 : vector<1x128xf32> to vector<2x128xf32>
    %690 = arith.addf %688, %689 : vector<2x128xf32>
    %691 = vector.extract_strided_slice %690 {offsets = [0, 0], sizes = [2, 32], strides = [1, 1]} : vector<2x128xf32> to vector<2x32xf32>
    %692 = arith.negf %691 : vector<2x32xf32>
    %693 = math.exp %692 : vector<2x32xf32>
    %cst_338 = arith.constant 1.000000e+00 : f32
    %694 = vector.broadcast %cst_338 : f32 to vector<2x32xf32>
    %695 = arith.addf %694, %693 : vector<2x32xf32>
    %696 = arith.divf %694, %695 : vector<2x32xf32>
    %697 = vector.extract_strided_slice %690 {offsets = [0, 32], sizes = [2, 32], strides = [1, 1]} : vector<2x128xf32> to vector<2x32xf32>
    %698 = arith.negf %697 : vector<2x32xf32>
    %699 = math.exp %698 : vector<2x32xf32>
    %cst_339 = arith.constant 1.000000e+00 : f32
    %700 = vector.broadcast %cst_339 : f32 to vector<2x32xf32>
    %701 = arith.addf %700, %699 : vector<2x32xf32>
    %702 = arith.divf %700, %701 : vector<2x32xf32>
    %703 = vector.extract_strided_slice %690 {offsets = [0, 64], sizes = [2, 32], strides = [1, 1]} : vector<2x128xf32> to vector<2x32xf32>
    %704 = math.tanh %703 : vector<2x32xf32>
    %705 = vector.extract_strided_slice %690 {offsets = [0, 96], sizes = [2, 32], strides = [1, 1]} : vector<2x128xf32> to vector<2x32xf32>
    %706 = arith.negf %705 : vector<2x32xf32>
    %707 = math.exp %706 : vector<2x32xf32>
    %cst_340 = arith.constant 1.000000e+00 : f32
    %708 = vector.broadcast %cst_340 : f32 to vector<2x32xf32>
    %709 = arith.addf %708, %707 : vector<2x32xf32>
    %710 = arith.divf %708, %709 : vector<2x32xf32>
    %711 = arith.mulf %702, %682 : vector<2x32xf32>
    %712 = arith.mulf %696, %704 : vector<2x32xf32>
    %713 = arith.addf %711, %712 : vector<2x32xf32>
    %714 = math.tanh %713 : vector<2x32xf32>
    %715 = arith.mulf %710, %714 : vector<2x32xf32>
    %716 = vector.shape_cast %677 : vector<2x1xi1> to vector<2x1xi1>
    %717 = vector.broadcast %716 : vector<2x1xi1> to vector<2x32xi1>
    %718 = arith.select %717, %715, %681 : vector<2x32xi1>, vector<2x32xf32>
    %719 = vector.shape_cast %677 : vector<2x1xi1> to vector<2x1xi1>
    %720 = vector.broadcast %719 : vector<2x1xi1> to vector<2x32xi1>
    %721 = arith.select %720, %713, %682 : vector<2x32xi1>, vector<2x32xf32>
    %cst_341 = arith.constant 0.000000e+00 : f32
    %722 = vector.broadcast %cst_341 : f32 to vector<2x32xf32>
    %723 = vector.shape_cast %677 : vector<2x1xi1> to vector<2x1xi1>
    %724 = vector.broadcast %723 : vector<2x1xi1> to vector<2x32xi1>
    %725 = arith.select %724, %715, %722 : vector<2x32xi1>, vector<2x32xf32>
    %c0_342 = arith.constant 0 : index
    %c0_343 = arith.constant 0 : index
    %726 = vector.load %arg12[%c0_342, %c0_343] : memref<2x32xf32, #tpu.memory_space<vmem>>, vector<2x32xf32>
    tpu.vector_store %arg12[%c0_342, %c0_343], %718 {strides = array<i32>} : memref<2x32xf32, #tpu.memory_space<vmem>>, vector<2x32xf32>,
    %c0_344 = arith.constant 0 : index
    %c0_345 = arith.constant 0 : index
    %727 = vector.load %arg13[%c0_344, %c0_345] : memref<2x32xf32, #tpu.memory_space<vmem>>, vector<2x32xf32>
    tpu.vector_store %arg13[%c0_344, %c0_345], %721 {strides = array<i32>} : memref<2x32xf32, #tpu.memory_space<vmem>>, vector<2x32xf32>,
    %728 = arith.index_cast %672 : i32 to index
    %c0_346 = arith.constant 0 : index
    %c0_347 = arith.constant 0 : index
    %729 = vector.load %arg14[%728, %c0_346, %c0_347] : memref<8x2x32xf32, #tpu.memory_space<vmem>>, vector<1x2x32xf32>
    %730 = vector.shape_cast %729 : vector<1x2x32xf32> to vector<2x32xf32>
    %731 = tpu.concatenate %730, %725 in 1 : vector<2x32xf32>, vector<2x32xf32> -> vector<2x64xf32>
    %732 = arith.index_cast %672 : i32 to index
    %c0_348 = arith.constant 0 : index
    %c0_349 = arith.constant 0 : index
    %733 = vector.load %arg9[%732, %c0_348, %c0_349] : memref<8x2x64xf32, #tpu.memory_space<vmem>>, vector<1x2x64xf32>
    %734 = vector.shape_cast %733 : vector<1x2x64xf32> to vector<2x64xf32>
    %735 = vector.shape_cast %731 : vector<2x64xf32> to vector<1x2x64xf32>
    tpu.vector_store %arg9[%732, %c0_348, %c0_349], %735 {strides = array<i32>} : memref<8x2x64xf32, #tpu.memory_space<vmem>>, vector<1x2x64xf32>,
    %c4_i32_350 = arith.constant 4 : i32
    %c7_i32_351 = arith.constant 7 : i32
    %736 = arith.subi %c7_i32_351, %c4_i32_350 : i32
    %737 = arith.index_cast %736 : i32 to index
    %c0_352 = arith.constant 0 : index
    %c0_353 = arith.constant 0 : index
    %738 = vector.load %arg2[%737, %c0_352, %c0_353] : memref<8x2x1xf32, #tpu.memory_space<vmem>>, vector<1x2x1xf32>
    %739 = vector.shape_cast %738 : vector<1x2x1xf32> to vector<2x1xf32>
    %cst_354 = arith.constant 0.000000e+00 : f32
    %740 = vector.broadcast %cst_354 : f32 to vector<2x1xf32>
    %741 = arith.cmpf ogt, %739, %740 : vector<2x1xf32>
    %742 = arith.index_cast %736 : i32 to index
    %c0_355 = arith.constant 0 : index
    %c0_356 = arith.constant 0 : index
    %743 = vector.load %arg1[%742, %c0_355, %c0_356] : memref<8x2x32xf32, #tpu.memory_space<vmem>>, vector<1x2x32xf32>
    %744 = vector.shape_cast %743 : vector<1x2x32xf32> to vector<2x32xf32>
    %c0_357 = arith.constant 0 : index
    %c0_358 = arith.constant 0 : index
    %745 = vector.load %arg12[%c0_357, %c0_358] : memref<2x32xf32, #tpu.memory_space<vmem>>, vector<2x32xf32>
    %c0_359 = arith.constant 0 : index
    %c0_360 = arith.constant 0 : index
    %746 = vector.load %arg13[%c0_359, %c0_360] : memref<2x32xf32, #tpu.memory_space<vmem>>, vector<2x32xf32>
    %c0_361 = arith.constant 0 : index
    %c0_362 = arith.constant 0 : index
    %747 = vector.load %arg6[%c0_361, %c0_362] : memref<32x128xf32, #tpu.memory_space<vmem>>, vector<32x128xf32>
    %c0_363 = arith.constant 0 : index
    %c0_364 = arith.constant 0 : index
    %748 = vector.load %arg7[%c0_363, %c0_364] : memref<32x128xf32, #tpu.memory_space<vmem>>, vector<32x128xf32>
    %c0_365 = arith.constant 0 : index
    %c0_366 = arith.constant 0 : index
    %749 = vector.load %arg8[%c0_365, %c0_366] : memref<1x128xf32, #tpu.memory_space<vmem>>, vector<1x128xf32>
    %cst_367 = arith.constant dense<0.000000e+00> : vector<2x128xf32>
    %750 = tpu.matmul %744, %747, %cst_367 {dimension_numbers = #tpu.dot_dimension_numbers<[1], [0], [0], [1], [0, 0, 1, 1], [], []>} : vector<2x32xf32>, vector<32x128xf32>, vector<2x128xf32> -> vector<2x128xf32>
    %cst_368 = arith.constant dense<0.000000e+00> : vector<2x128xf32>
    %751 = tpu.matmul %745, %748, %cst_368 {dimension_numbers = #tpu.dot_dimension_numbers<[1], [0], [0], [1], [0, 0, 1, 1], [], []>} : vector<2x32xf32>, vector<32x128xf32>, vector<2x128xf32> -> vector<2x128xf32>
    %752 = arith.addf %750, %751 : vector<2x128xf32>
    %753 = vector.broadcast %749 : vector<1x128xf32> to vector<2x128xf32>
    %754 = arith.addf %752, %753 : vector<2x128xf32>
    %755 = vector.extract_strided_slice %754 {offsets = [0, 0], sizes = [2, 32], strides = [1, 1]} : vector<2x128xf32> to vector<2x32xf32>
    %756 = arith.negf %755 : vector<2x32xf32>
    %757 = math.exp %756 : vector<2x32xf32>
    %cst_369 = arith.constant 1.000000e+00 : f32
    %758 = vector.broadcast %cst_369 : f32 to vector<2x32xf32>
    %759 = arith.addf %758, %757 : vector<2x32xf32>
    %760 = arith.divf %758, %759 : vector<2x32xf32>
    %761 = vector.extract_strided_slice %754 {offsets = [0, 32], sizes = [2, 32], strides = [1, 1]} : vector<2x128xf32> to vector<2x32xf32>
    %762 = arith.negf %761 : vector<2x32xf32>
    %763 = math.exp %762 : vector<2x32xf32>
    %cst_370 = arith.constant 1.000000e+00 : f32
    %764 = vector.broadcast %cst_370 : f32 to vector<2x32xf32>
    %765 = arith.addf %764, %763 : vector<2x32xf32>
    %766 = arith.divf %764, %765 : vector<2x32xf32>
    %767 = vector.extract_strided_slice %754 {offsets = [0, 64], sizes = [2, 32], strides = [1, 1]} : vector<2x128xf32> to vector<2x32xf32>
    %768 = math.tanh %767 : vector<2x32xf32>
    %769 = vector.extract_strided_slice %754 {offsets = [0, 96], sizes = [2, 32], strides = [1, 1]} : vector<2x128xf32> to vector<2x32xf32>
    %770 = arith.negf %769 : vector<2x32xf32>
    %771 = math.exp %770 : vector<2x32xf32>
    %cst_371 = arith.constant 1.000000e+00 : f32
    %772 = vector.broadcast %cst_371 : f32 to vector<2x32xf32>
    %773 = arith.addf %772, %771 : vector<2x32xf32>
    %774 = arith.divf %772, %773 : vector<2x32xf32>
    %775 = arith.mulf %766, %746 : vector<2x32xf32>
    %776 = arith.mulf %760, %768 : vector<2x32xf32>
    %777 = arith.addf %775, %776 : vector<2x32xf32>
    %778 = math.tanh %777 : vector<2x32xf32>
    %779 = arith.mulf %774, %778 : vector<2x32xf32>
    %780 = vector.shape_cast %741 : vector<2x1xi1> to vector<2x1xi1>
    %781 = vector.broadcast %780 : vector<2x1xi1> to vector<2x32xi1>
    %782 = arith.select %781, %779, %745 : vector<2x32xi1>, vector<2x32xf32>
    %783 = vector.shape_cast %741 : vector<2x1xi1> to vector<2x1xi1>
    %784 = vector.broadcast %783 : vector<2x1xi1> to vector<2x32xi1>
    %785 = arith.select %784, %777, %746 : vector<2x32xi1>, vector<2x32xf32>
    %cst_372 = arith.constant 0.000000e+00 : f32
    %786 = vector.broadcast %cst_372 : f32 to vector<2x32xf32>
    %787 = vector.shape_cast %741 : vector<2x1xi1> to vector<2x1xi1>
    %788 = vector.broadcast %787 : vector<2x1xi1> to vector<2x32xi1>
    %789 = arith.select %788, %779, %786 : vector<2x32xi1>, vector<2x32xf32>
    %c0_373 = arith.constant 0 : index
    %c0_374 = arith.constant 0 : index
    %790 = vector.load %arg12[%c0_373, %c0_374] : memref<2x32xf32, #tpu.memory_space<vmem>>, vector<2x32xf32>
    tpu.vector_store %arg12[%c0_373, %c0_374], %782 {strides = array<i32>} : memref<2x32xf32, #tpu.memory_space<vmem>>, vector<2x32xf32>,
    %c0_375 = arith.constant 0 : index
    %c0_376 = arith.constant 0 : index
    %791 = vector.load %arg13[%c0_375, %c0_376] : memref<2x32xf32, #tpu.memory_space<vmem>>, vector<2x32xf32>
    tpu.vector_store %arg13[%c0_375, %c0_376], %785 {strides = array<i32>} : memref<2x32xf32, #tpu.memory_space<vmem>>, vector<2x32xf32>,
    %792 = arith.index_cast %736 : i32 to index
    %c0_377 = arith.constant 0 : index
    %c0_378 = arith.constant 0 : index
    %793 = vector.load %arg14[%792, %c0_377, %c0_378] : memref<8x2x32xf32, #tpu.memory_space<vmem>>, vector<1x2x32xf32>
    %794 = vector.shape_cast %793 : vector<1x2x32xf32> to vector<2x32xf32>
    %795 = tpu.concatenate %794, %789 in 1 : vector<2x32xf32>, vector<2x32xf32> -> vector<2x64xf32>
    %796 = arith.index_cast %736 : i32 to index
    %c0_379 = arith.constant 0 : index
    %c0_380 = arith.constant 0 : index
    %797 = vector.load %arg9[%796, %c0_379, %c0_380] : memref<8x2x64xf32, #tpu.memory_space<vmem>>, vector<1x2x64xf32>
    %798 = vector.shape_cast %797 : vector<1x2x64xf32> to vector<2x64xf32>
    %799 = vector.shape_cast %795 : vector<2x64xf32> to vector<1x2x64xf32>
    tpu.vector_store %arg9[%796, %c0_379, %c0_380], %799 {strides = array<i32>} : memref<8x2x64xf32, #tpu.memory_space<vmem>>, vector<1x2x64xf32>,
    %c5_i32_381 = arith.constant 5 : i32
    %c7_i32_382 = arith.constant 7 : i32
    %800 = arith.subi %c7_i32_382, %c5_i32_381 : i32
    %801 = arith.index_cast %800 : i32 to index
    %c0_383 = arith.constant 0 : index
    %c0_384 = arith.constant 0 : index
    %802 = vector.load %arg2[%801, %c0_383, %c0_384] : memref<8x2x1xf32, #tpu.memory_space<vmem>>, vector<1x2x1xf32>
    %803 = vector.shape_cast %802 : vector<1x2x1xf32> to vector<2x1xf32>
    %cst_385 = arith.constant 0.000000e+00 : f32
    %804 = vector.broadcast %cst_385 : f32 to vector<2x1xf32>
    %805 = arith.cmpf ogt, %803, %804 : vector<2x1xf32>
    %806 = arith.index_cast %800 : i32 to index
    %c0_386 = arith.constant 0 : index
    %c0_387 = arith.constant 0 : index
    %807 = vector.load %arg1[%806, %c0_386, %c0_387] : memref<8x2x32xf32, #tpu.memory_space<vmem>>, vector<1x2x32xf32>
    %808 = vector.shape_cast %807 : vector<1x2x32xf32> to vector<2x32xf32>
    %c0_388 = arith.constant 0 : index
    %c0_389 = arith.constant 0 : index
    %809 = vector.load %arg12[%c0_388, %c0_389] : memref<2x32xf32, #tpu.memory_space<vmem>>, vector<2x32xf32>
    %c0_390 = arith.constant 0 : index
    %c0_391 = arith.constant 0 : index
    %810 = vector.load %arg13[%c0_390, %c0_391] : memref<2x32xf32, #tpu.memory_space<vmem>>, vector<2x32xf32>
    %c0_392 = arith.constant 0 : index
    %c0_393 = arith.constant 0 : index
    %811 = vector.load %arg6[%c0_392, %c0_393] : memref<32x128xf32, #tpu.memory_space<vmem>>, vector<32x128xf32>
    %c0_394 = arith.constant 0 : index
    %c0_395 = arith.constant 0 : index
    %812 = vector.load %arg7[%c0_394, %c0_395] : memref<32x128xf32, #tpu.memory_space<vmem>>, vector<32x128xf32>
    %c0_396 = arith.constant 0 : index
    %c0_397 = arith.constant 0 : index
    %813 = vector.load %arg8[%c0_396, %c0_397] : memref<1x128xf32, #tpu.memory_space<vmem>>, vector<1x128xf32>
    %cst_398 = arith.constant dense<0.000000e+00> : vector<2x128xf32>
    %814 = tpu.matmul %808, %811, %cst_398 {dimension_numbers = #tpu.dot_dimension_numbers<[1], [0], [0], [1], [0, 0, 1, 1], [], []>} : vector<2x32xf32>, vector<32x128xf32>, vector<2x128xf32> -> vector<2x128xf32>
    %cst_399 = arith.constant dense<0.000000e+00> : vector<2x128xf32>
    %815 = tpu.matmul %809, %812, %cst_399 {dimension_numbers = #tpu.dot_dimension_numbers<[1], [0], [0], [1], [0, 0, 1, 1], [], []>} : vector<2x32xf32>, vector<32x128xf32>, vector<2x128xf32> -> vector<2x128xf32>
    %816 = arith.addf %814, %815 : vector<2x128xf32>
    %817 = vector.broadcast %813 : vector<1x128xf32> to vector<2x128xf32>
    %818 = arith.addf %816, %817 : vector<2x128xf32>
    %819 = vector.extract_strided_slice %818 {offsets = [0, 0], sizes = [2, 32], strides = [1, 1]} : vector<2x128xf32> to vector<2x32xf32>
    %820 = arith.negf %819 : vector<2x32xf32>
    %821 = math.exp %820 : vector<2x32xf32>
    %cst_400 = arith.constant 1.000000e+00 : f32
    %822 = vector.broadcast %cst_400 : f32 to vector<2x32xf32>
    %823 = arith.addf %822, %821 : vector<2x32xf32>
    %824 = arith.divf %822, %823 : vector<2x32xf32>
    %825 = vector.extract_strided_slice %818 {offsets = [0, 32], sizes = [2, 32], strides = [1, 1]} : vector<2x128xf32> to vector<2x32xf32>
    %826 = arith.negf %825 : vector<2x32xf32>
    %827 = math.exp %826 : vector<2x32xf32>
    %cst_401 = arith.constant 1.000000e+00 : f32
    %828 = vector.broadcast %cst_401 : f32 to vector<2x32xf32>
    %829 = arith.addf %828, %827 : vector<2x32xf32>
    %830 = arith.divf %828, %829 : vector<2x32xf32>
    %831 = vector.extract_strided_slice %818 {offsets = [0, 64], sizes = [2, 32], strides = [1, 1]} : vector<2x128xf32> to vector<2x32xf32>
    %832 = math.tanh %831 : vector<2x32xf32>
    %833 = vector.extract_strided_slice %818 {offsets = [0, 96], sizes = [2, 32], strides = [1, 1]} : vector<2x128xf32> to vector<2x32xf32>
    %834 = arith.negf %833 : vector<2x32xf32>
    %835 = math.exp %834 : vector<2x32xf32>
    %cst_402 = arith.constant 1.000000e+00 : f32
    %836 = vector.broadcast %cst_402 : f32 to vector<2x32xf32>
    %837 = arith.addf %836, %835 : vector<2x32xf32>
    %838 = arith.divf %836, %837 : vector<2x32xf32>
    %839 = arith.mulf %830, %810 : vector<2x32xf32>
    %840 = arith.mulf %824, %832 : vector<2x32xf32>
    %841 = arith.addf %839, %840 : vector<2x32xf32>
    %842 = math.tanh %841 : vector<2x32xf32>
    %843 = arith.mulf %838, %842 : vector<2x32xf32>
    %844 = vector.shape_cast %805 : vector<2x1xi1> to vector<2x1xi1>
    %845 = vector.broadcast %844 : vector<2x1xi1> to vector<2x32xi1>
    %846 = arith.select %845, %843, %809 : vector<2x32xi1>, vector<2x32xf32>
    %847 = vector.shape_cast %805 : vector<2x1xi1> to vector<2x1xi1>
    %848 = vector.broadcast %847 : vector<2x1xi1> to vector<2x32xi1>
    %849 = arith.select %848, %841, %810 : vector<2x32xi1>, vector<2x32xf32>
    %cst_403 = arith.constant 0.000000e+00 : f32
    %850 = vector.broadcast %cst_403 : f32 to vector<2x32xf32>
    %851 = vector.shape_cast %805 : vector<2x1xi1> to vector<2x1xi1>
    %852 = vector.broadcast %851 : vector<2x1xi1> to vector<2x32xi1>
    %853 = arith.select %852, %843, %850 : vector<2x32xi1>, vector<2x32xf32>
    %c0_404 = arith.constant 0 : index
    %c0_405 = arith.constant 0 : index
    %854 = vector.load %arg12[%c0_404, %c0_405] : memref<2x32xf32, #tpu.memory_space<vmem>>, vector<2x32xf32>
    tpu.vector_store %arg12[%c0_404, %c0_405], %846 {strides = array<i32>} : memref<2x32xf32, #tpu.memory_space<vmem>>, vector<2x32xf32>,
    %c0_406 = arith.constant 0 : index
    %c0_407 = arith.constant 0 : index
    %855 = vector.load %arg13[%c0_406, %c0_407] : memref<2x32xf32, #tpu.memory_space<vmem>>, vector<2x32xf32>
    tpu.vector_store %arg13[%c0_406, %c0_407], %849 {strides = array<i32>} : memref<2x32xf32, #tpu.memory_space<vmem>>, vector<2x32xf32>,
    %856 = arith.index_cast %800 : i32 to index
    %c0_408 = arith.constant 0 : index
    %c0_409 = arith.constant 0 : index
    %857 = vector.load %arg14[%856, %c0_408, %c0_409] : memref<8x2x32xf32, #tpu.memory_space<vmem>>, vector<1x2x32xf32>
    %858 = vector.shape_cast %857 : vector<1x2x32xf32> to vector<2x32xf32>
    %859 = tpu.concatenate %858, %853 in 1 : vector<2x32xf32>, vector<2x32xf32> -> vector<2x64xf32>
    %860 = arith.index_cast %800 : i32 to index
    %c0_410 = arith.constant 0 : index
    %c0_411 = arith.constant 0 : index
    %861 = vector.load %arg9[%860, %c0_410, %c0_411] : memref<8x2x64xf32, #tpu.memory_space<vmem>>, vector<1x2x64xf32>
    %862 = vector.shape_cast %861 : vector<1x2x64xf32> to vector<2x64xf32>
    %863 = vector.shape_cast %859 : vector<2x64xf32> to vector<1x2x64xf32>
    tpu.vector_store %arg9[%860, %c0_410, %c0_411], %863 {strides = array<i32>} : memref<8x2x64xf32, #tpu.memory_space<vmem>>, vector<1x2x64xf32>,
    %c6_i32_412 = arith.constant 6 : i32
    %c7_i32_413 = arith.constant 7 : i32
    %864 = arith.subi %c7_i32_413, %c6_i32_412 : i32
    %865 = arith.index_cast %864 : i32 to index
    %c0_414 = arith.constant 0 : index
    %c0_415 = arith.constant 0 : index
    %866 = vector.load %arg2[%865, %c0_414, %c0_415] : memref<8x2x1xf32, #tpu.memory_space<vmem>>, vector<1x2x1xf32>
    %867 = vector.shape_cast %866 : vector<1x2x1xf32> to vector<2x1xf32>
    %cst_416 = arith.constant 0.000000e+00 : f32
    %868 = vector.broadcast %cst_416 : f32 to vector<2x1xf32>
    %869 = arith.cmpf ogt, %867, %868 : vector<2x1xf32>
    %870 = arith.index_cast %864 : i32 to index
    %c0_417 = arith.constant 0 : index
    %c0_418 = arith.constant 0 : index
    %871 = vector.load %arg1[%870, %c0_417, %c0_418] : memref<8x2x32xf32, #tpu.memory_space<vmem>>, vector<1x2x32xf32>
    %872 = vector.shape_cast %871 : vector<1x2x32xf32> to vector<2x32xf32>
    %c0_419 = arith.constant 0 : index
    %c0_420 = arith.constant 0 : index
    %873 = vector.load %arg12[%c0_419, %c0_420] : memref<2x32xf32, #tpu.memory_space<vmem>>, vector<2x32xf32>
    %c0_421 = arith.constant 0 : index
    %c0_422 = arith.constant 0 : index
    %874 = vector.load %arg13[%c0_421, %c0_422] : memref<2x32xf32, #tpu.memory_space<vmem>>, vector<2x32xf32>
    %c0_423 = arith.constant 0 : index
    %c0_424 = arith.constant 0 : index
    %875 = vector.load %arg6[%c0_423, %c0_424] : memref<32x128xf32, #tpu.memory_space<vmem>>, vector<32x128xf32>
    %c0_425 = arith.constant 0 : index
    %c0_426 = arith.constant 0 : index
    %876 = vector.load %arg7[%c0_425, %c0_426] : memref<32x128xf32, #tpu.memory_space<vmem>>, vector<32x128xf32>
    %c0_427 = arith.constant 0 : index
    %c0_428 = arith.constant 0 : index
    %877 = vector.load %arg8[%c0_427, %c0_428] : memref<1x128xf32, #tpu.memory_space<vmem>>, vector<1x128xf32>
    %cst_429 = arith.constant dense<0.000000e+00> : vector<2x128xf32>
    %878 = tpu.matmul %872, %875, %cst_429 {dimension_numbers = #tpu.dot_dimension_numbers<[1], [0], [0], [1], [0, 0, 1, 1], [], []>} : vector<2x32xf32>, vector<32x128xf32>, vector<2x128xf32> -> vector<2x128xf32>
    %cst_430 = arith.constant dense<0.000000e+00> : vector<2x128xf32>
    %879 = tpu.matmul %873, %876, %cst_430 {dimension_numbers = #tpu.dot_dimension_numbers<[1], [0], [0], [1], [0, 0, 1, 1], [], []>} : vector<2x32xf32>, vector<32x128xf32>, vector<2x128xf32> -> vector<2x128xf32>
    %880 = arith.addf %878, %879 : vector<2x128xf32>
    %881 = vector.broadcast %877 : vector<1x128xf32> to vector<2x128xf32>
    %882 = arith.addf %880, %881 : vector<2x128xf32>
    %883 = vector.extract_strided_slice %882 {offsets = [0, 0], sizes = [2, 32], strides = [1, 1]} : vector<2x128xf32> to vector<2x32xf32>
    %884 = arith.negf %883 : vector<2x32xf32>
    %885 = math.exp %884 : vector<2x32xf32>
    %cst_431 = arith.constant 1.000000e+00 : f32
    %886 = vector.broadcast %cst_431 : f32 to vector<2x32xf32>
    %887 = arith.addf %886, %885 : vector<2x32xf32>
    %888 = arith.divf %886, %887 : vector<2x32xf32>
    %889 = vector.extract_strided_slice %882 {offsets = [0, 32], sizes = [2, 32], strides = [1, 1]} : vector<2x128xf32> to vector<2x32xf32>
    %890 = arith.negf %889 : vector<2x32xf32>
    %891 = math.exp %890 : vector<2x32xf32>
    %cst_432 = arith.constant 1.000000e+00 : f32
    %892 = vector.broadcast %cst_432 : f32 to vector<2x32xf32>
    %893 = arith.addf %892, %891 : vector<2x32xf32>
    %894 = arith.divf %892, %893 : vector<2x32xf32>
    %895 = vector.extract_strided_slice %882 {offsets = [0, 64], sizes = [2, 32], strides = [1, 1]} : vector<2x128xf32> to vector<2x32xf32>
    %896 = math.tanh %895 : vector<2x32xf32>
    %897 = vector.extract_strided_slice %882 {offsets = [0, 96], sizes = [2, 32], strides = [1, 1]} : vector<2x128xf32> to vector<2x32xf32>
    %898 = arith.negf %897 : vector<2x32xf32>
    %899 = math.exp %898 : vector<2x32xf32>
    %cst_433 = arith.constant 1.000000e+00 : f32
    %900 = vector.broadcast %cst_433 : f32 to vector<2x32xf32>
    %901 = arith.addf %900, %899 : vector<2x32xf32>
    %902 = arith.divf %900, %901 : vector<2x32xf32>
    %903 = arith.mulf %894, %874 : vector<2x32xf32>
    %904 = arith.mulf %888, %896 : vector<2x32xf32>
    %905 = arith.addf %903, %904 : vector<2x32xf32>
    %906 = math.tanh %905 : vector<2x32xf32>
    %907 = arith.mulf %902, %906 : vector<2x32xf32>
    %908 = vector.shape_cast %869 : vector<2x1xi1> to vector<2x1xi1>
    %909 = vector.broadcast %908 : vector<2x1xi1> to vector<2x32xi1>
    %910 = arith.select %909, %907, %873 : vector<2x32xi1>, vector<2x32xf32>
    %911 = vector.shape_cast %869 : vector<2x1xi1> to vector<2x1xi1>
    %912 = vector.broadcast %911 : vector<2x1xi1> to vector<2x32xi1>
    %913 = arith.select %912, %905, %874 : vector<2x32xi1>, vector<2x32xf32>
    %cst_434 = arith.constant 0.000000e+00 : f32
    %914 = vector.broadcast %cst_434 : f32 to vector<2x32xf32>
    %915 = vector.shape_cast %869 : vector<2x1xi1> to vector<2x1xi1>
    %916 = vector.broadcast %915 : vector<2x1xi1> to vector<2x32xi1>
    %917 = arith.select %916, %907, %914 : vector<2x32xi1>, vector<2x32xf32>
    %c0_435 = arith.constant 0 : index
    %c0_436 = arith.constant 0 : index
    %918 = vector.load %arg12[%c0_435, %c0_436] : memref<2x32xf32, #tpu.memory_space<vmem>>, vector<2x32xf32>
    tpu.vector_store %arg12[%c0_435, %c0_436], %910 {strides = array<i32>} : memref<2x32xf32, #tpu.memory_space<vmem>>, vector<2x32xf32>,
    %c0_437 = arith.constant 0 : index
    %c0_438 = arith.constant 0 : index
    %919 = vector.load %arg13[%c0_437, %c0_438] : memref<2x32xf32, #tpu.memory_space<vmem>>, vector<2x32xf32>
    tpu.vector_store %arg13[%c0_437, %c0_438], %913 {strides = array<i32>} : memref<2x32xf32, #tpu.memory_space<vmem>>, vector<2x32xf32>,
    %920 = arith.index_cast %864 : i32 to index
    %c0_439 = arith.constant 0 : index
    %c0_440 = arith.constant 0 : index
    %921 = vector.load %arg14[%920, %c0_439, %c0_440] : memref<8x2x32xf32, #tpu.memory_space<vmem>>, vector<1x2x32xf32>
    %922 = vector.shape_cast %921 : vector<1x2x32xf32> to vector<2x32xf32>
    %923 = tpu.concatenate %922, %917 in 1 : vector<2x32xf32>, vector<2x32xf32> -> vector<2x64xf32>
    %924 = arith.index_cast %864 : i32 to index
    %c0_441 = arith.constant 0 : index
    %c0_442 = arith.constant 0 : index
    %925 = vector.load %arg9[%924, %c0_441, %c0_442] : memref<8x2x64xf32, #tpu.memory_space<vmem>>, vector<1x2x64xf32>
    %926 = vector.shape_cast %925 : vector<1x2x64xf32> to vector<2x64xf32>
    %927 = vector.shape_cast %923 : vector<2x64xf32> to vector<1x2x64xf32>
    tpu.vector_store %arg9[%924, %c0_441, %c0_442], %927 {strides = array<i32>} : memref<8x2x64xf32, #tpu.memory_space<vmem>>, vector<1x2x64xf32>,
    %c7_i32_443 = arith.constant 7 : i32
    %c7_i32_444 = arith.constant 7 : i32
    %928 = arith.subi %c7_i32_444, %c7_i32_443 : i32
    %929 = arith.index_cast %928 : i32 to index
    %c0_445 = arith.constant 0 : index
    %c0_446 = arith.constant 0 : index
    %930 = vector.load %arg2[%929, %c0_445, %c0_446] : memref<8x2x1xf32, #tpu.memory_space<vmem>>, vector<1x2x1xf32>
    %931 = vector.shape_cast %930 : vector<1x2x1xf32> to vector<2x1xf32>
    %cst_447 = arith.constant 0.000000e+00 : f32
    %932 = vector.broadcast %cst_447 : f32 to vector<2x1xf32>
    %933 = arith.cmpf ogt, %931, %932 : vector<2x1xf32>
    %934 = arith.index_cast %928 : i32 to index
    %c0_448 = arith.constant 0 : index
    %c0_449 = arith.constant 0 : index
    %935 = vector.load %arg1[%934, %c0_448, %c0_449] : memref<8x2x32xf32, #tpu.memory_space<vmem>>, vector<1x2x32xf32>
    %936 = vector.shape_cast %935 : vector<1x2x32xf32> to vector<2x32xf32>
    %c0_450 = arith.constant 0 : index
    %c0_451 = arith.constant 0 : index
    %937 = vector.load %arg12[%c0_450, %c0_451] : memref<2x32xf32, #tpu.memory_space<vmem>>, vector<2x32xf32>
    %c0_452 = arith.constant 0 : index
    %c0_453 = arith.constant 0 : index
    %938 = vector.load %arg13[%c0_452, %c0_453] : memref<2x32xf32, #tpu.memory_space<vmem>>, vector<2x32xf32>
    %c0_454 = arith.constant 0 : index
    %c0_455 = arith.constant 0 : index
    %939 = vector.load %arg6[%c0_454, %c0_455] : memref<32x128xf32, #tpu.memory_space<vmem>>, vector<32x128xf32>
    %c0_456 = arith.constant 0 : index
    %c0_457 = arith.constant 0 : index
    %940 = vector.load %arg7[%c0_456, %c0_457] : memref<32x128xf32, #tpu.memory_space<vmem>>, vector<32x128xf32>
    %c0_458 = arith.constant 0 : index
    %c0_459 = arith.constant 0 : index
    %941 = vector.load %arg8[%c0_458, %c0_459] : memref<1x128xf32, #tpu.memory_space<vmem>>, vector<1x128xf32>
    %cst_460 = arith.constant dense<0.000000e+00> : vector<2x128xf32>
    %942 = tpu.matmul %936, %939, %cst_460 {dimension_numbers = #tpu.dot_dimension_numbers<[1], [0], [0], [1], [0, 0, 1, 1], [], []>} : vector<2x32xf32>, vector<32x128xf32>, vector<2x128xf32> -> vector<2x128xf32>
    %cst_461 = arith.constant dense<0.000000e+00> : vector<2x128xf32>
    %943 = tpu.matmul %937, %940, %cst_461 {dimension_numbers = #tpu.dot_dimension_numbers<[1], [0], [0], [1], [0, 0, 1, 1], [], []>} : vector<2x32xf32>, vector<32x128xf32>, vector<2x128xf32> -> vector<2x128xf32>
    %944 = arith.addf %942, %943 : vector<2x128xf32>
    %945 = vector.broadcast %941 : vector<1x128xf32> to vector<2x128xf32>
    %946 = arith.addf %944, %945 : vector<2x128xf32>
    %947 = vector.extract_strided_slice %946 {offsets = [0, 0], sizes = [2, 32], strides = [1, 1]} : vector<2x128xf32> to vector<2x32xf32>
    %948 = arith.negf %947 : vector<2x32xf32>
    %949 = math.exp %948 : vector<2x32xf32>
    %cst_462 = arith.constant 1.000000e+00 : f32
    %950 = vector.broadcast %cst_462 : f32 to vector<2x32xf32>
    %951 = arith.addf %950, %949 : vector<2x32xf32>
    %952 = arith.divf %950, %951 : vector<2x32xf32>
    %953 = vector.extract_strided_slice %946 {offsets = [0, 32], sizes = [2, 32], strides = [1, 1]} : vector<2x128xf32> to vector<2x32xf32>
    %954 = arith.negf %953 : vector<2x32xf32>
    %955 = math.exp %954 : vector<2x32xf32>
    %cst_463 = arith.constant 1.000000e+00 : f32
    %956 = vector.broadcast %cst_463 : f32 to vector<2x32xf32>
    %957 = arith.addf %956, %955 : vector<2x32xf32>
    %958 = arith.divf %956, %957 : vector<2x32xf32>
    %959 = vector.extract_strided_slice %946 {offsets = [0, 64], sizes = [2, 32], strides = [1, 1]} : vector<2x128xf32> to vector<2x32xf32>
    %960 = math.tanh %959 : vector<2x32xf32>
    %961 = vector.extract_strided_slice %946 {offsets = [0, 96], sizes = [2, 32], strides = [1, 1]} : vector<2x128xf32> to vector<2x32xf32>
    %962 = arith.negf %961 : vector<2x32xf32>
    %963 = math.exp %962 : vector<2x32xf32>
    %cst_464 = arith.constant 1.000000e+00 : f32
    %964 = vector.broadcast %cst_464 : f32 to vector<2x32xf32>
    %965 = arith.addf %964, %963 : vector<2x32xf32>
    %966 = arith.divf %964, %965 : vector<2x32xf32>
    %967 = arith.mulf %958, %938 : vector<2x32xf32>
    %968 = arith.mulf %952, %960 : vector<2x32xf32>
    %969 = arith.addf %967, %968 : vector<2x32xf32>
    %970 = math.tanh %969 : vector<2x32xf32>
    %971 = arith.mulf %966, %970 : vector<2x32xf32>
    %972 = vector.shape_cast %933 : vector<2x1xi1> to vector<2x1xi1>
    %973 = vector.broadcast %972 : vector<2x1xi1> to vector<2x32xi1>
    %974 = arith.select %973, %971, %937 : vector<2x32xi1>, vector<2x32xf32>
    %975 = vector.shape_cast %933 : vector<2x1xi1> to vector<2x1xi1>
    %976 = vector.broadcast %975 : vector<2x1xi1> to vector<2x32xi1>
    %977 = arith.select %976, %969, %938 : vector<2x32xi1>, vector<2x32xf32>
    %cst_465 = arith.constant 0.000000e+00 : f32
    %978 = vector.broadcast %cst_465 : f32 to vector<2x32xf32>
    %979 = vector.shape_cast %933 : vector<2x1xi1> to vector<2x1xi1>
    %980 = vector.broadcast %979 : vector<2x1xi1> to vector<2x32xi1>
    %981 = arith.select %980, %971, %978 : vector<2x32xi1>, vector<2x32xf32>
    %c0_466 = arith.constant 0 : index
    %c0_467 = arith.constant 0 : index
    %982 = vector.load %arg12[%c0_466, %c0_467] : memref<2x32xf32, #tpu.memory_space<vmem>>, vector<2x32xf32>
    tpu.vector_store %arg12[%c0_466, %c0_467], %974 {strides = array<i32>} : memref<2x32xf32, #tpu.memory_space<vmem>>, vector<2x32xf32>,
    %c0_468 = arith.constant 0 : index
    %c0_469 = arith.constant 0 : index
    %983 = vector.load %arg13[%c0_468, %c0_469] : memref<2x32xf32, #tpu.memory_space<vmem>>, vector<2x32xf32>
    tpu.vector_store %arg13[%c0_468, %c0_469], %977 {strides = array<i32>} : memref<2x32xf32, #tpu.memory_space<vmem>>, vector<2x32xf32>,
    %984 = arith.index_cast %928 : i32 to index
    %c0_470 = arith.constant 0 : index
    %c0_471 = arith.constant 0 : index
    %985 = vector.load %arg14[%984, %c0_470, %c0_471] : memref<8x2x32xf32, #tpu.memory_space<vmem>>, vector<1x2x32xf32>
    %986 = vector.shape_cast %985 : vector<1x2x32xf32> to vector<2x32xf32>
    %987 = tpu.concatenate %986, %981 in 1 : vector<2x32xf32>, vector<2x32xf32> -> vector<2x64xf32>
    %988 = arith.index_cast %928 : i32 to index
    %c0_472 = arith.constant 0 : index
    %c0_473 = arith.constant 0 : index
    %989 = vector.load %arg9[%988, %c0_472, %c0_473] : memref<8x2x64xf32, #tpu.memory_space<vmem>>, vector<1x2x64xf32>
    %990 = vector.shape_cast %989 : vector<1x2x64xf32> to vector<2x64xf32>
    %991 = vector.shape_cast %987 : vector<2x64xf32> to vector<1x2x64xf32>
    tpu.vector_store %arg9[%988, %c0_472, %c0_473], %991 {strides = array<i32>} : memref<8x2x64xf32, #tpu.memory_space<vmem>>, vector<1x2x64xf32>,
    %c8_i32_474 = arith.constant 8 : i32
    return
  }
  func.func @transform_0(%arg0: i32) -> (i32, i32, i32) {
    %c0_i32 = arith.constant 0 : i32
    %c0_i32_0 = arith.constant 0 : i32
    %c0_i32_1 = arith.constant 0 : i32
    %c0_i32_2 = arith.constant 0 : i32
    return %c0_i32, %c0_i32_0, %c0_i32_1 : i32, i32, i32
  }
  func.func @transform_1(%arg0: i32) -> (i32, i32, i32) {
    %c0_i32 = arith.constant 0 : i32
    %c0_i32_0 = arith.constant 0 : i32
    %c0_i32_1 = arith.constant 0 : i32
    %c0_i32_2 = arith.constant 0 : i32
    return %c0_i32, %c0_i32_0, %c0_i32_1 : i32, i32, i32
  }
  func.func @transform_2(%arg0: i32) -> (i32, i32) {
    %c0_i32 = arith.constant 0 : i32
    %c0_i32_0 = arith.constant 0 : i32
    %c0_i32_1 = arith.constant 0 : i32
    return %c0_i32, %c0_i32_0 : i32, i32
  }
  func.func @transform_3(%arg0: i32) -> (i32, i32) {
    %c0_i32 = arith.constant 0 : i32
    %c0_i32_0 = arith.constant 0 : i32
    %c0_i32_1 = arith.constant 0 : i32
    return %c0_i32, %c0_i32_0 : i32, i32
  }
  func.func @transform_4(%arg0: i32) -> (i32, i32) {
    %c0_i32 = arith.constant 0 : i32
    %c0_i32_0 = arith.constant 0 : i32
    %c0_i32_1 = arith.constant 0 : i32
    return %c0_i32, %c0_i32_0 : i32, i32
  }
  func.func @transform_5(%arg0: i32) -> (i32, i32) {
    %c0_i32 = arith.constant 0 : i32
    %c0_i32_0 = arith.constant 0 : i32
    %c0_i32_1 = arith.constant 0 : i32
    return %c0_i32, %c0_i32_0 : i32, i32
  }
  func.func @transform_6(%arg0: i32) -> (i32, i32) {
    %c0_i32 = arith.constant 0 : i32
    %c0_i32_0 = arith.constant 0 : i32
    %c0_i32_1 = arith.constant 0 : i32
    return %c0_i32, %c0_i32_0 : i32, i32
  }
  func.func @transform_7(%arg0: i32) -> (i32, i32) {
    %c0_i32 = arith.constant 0 : i32
    %c0_i32_0 = arith.constant 0 : i32
    %c0_i32_1 = arith.constant 0 : i32
    return %c0_i32, %c0_i32_0 : i32, i32
  }
  func.func @transform_8(%arg0: i32) -> (i32, i32, i32) {
    %c0_i32 = arith.constant 0 : i32
    %c0_i32_0 = arith.constant 0 : i32
    %c0_i32_1 = arith.constant 0 : i32
    %c0_i32_2 = arith.constant 0 : i32
    return %c0_i32, %c0_i32_0, %c0_i32_1 : i32, i32, i32
  }
}

</mosaic_0001>

<bundles_post_ra>
// kernel: bilstm_forward.3
= control target key start
LH: loop header
LB: loop body
LE: loop exit
PB: predicated region body
PF: predicated region fallthrough
CT: control target
= control target key end

     0   :  { %vm31_vm0 = vcmask 523264   ;;  %vm113_vm1 = vcmask 39936   ;;  %s213_s1 = inlined_call_operand.vmem [shape: f32[64,5], index: 1, kind: input, shape index: {}]   ;;  %s214_s0 = inlined_call_operand.vmem [shape: f32[16,64], index: 0, kind: input, shape index: {}]   ;;  %s215_s2 = inlined_call_operand.vmem [shape: f32[1,5], index: 2, kind: input, shape index: {}]   ;;  %s216_s3 = inlined_call_operand.vmem [shape: f32[16,5], index: 3, kind: output, shape index: {}]  }
   0x1   :  { %v23_v0 = vld [vmem:[%s213_s1 + $0x38] sm:$0xff]  ;;  %v22_v1 = vld [vmem:[%s213_s1 + $0x30] sm:$0xff]  ;;  %v21_v2 = vld [vmem:[%s213_s1 + $0x28] sm:$0xff] }
   0x2   :  { %133 = vmatprep.subr.mxu0 %v23_v0  ;;  %v14_v3 = vld [vmem:[%s214_s0] sm:$0xff]  ;;  %v19_v5 = vld [vmem:[%s213_s1 + $0x18] sm:$0xff]  ;;  %v18_v6 = vld [vmem:[%s213_s1 + $0x10] sm:$0xff] }
   0x3   :  { %134 = vmatpush3.msra.mxu0 %v23_v0  ;;  %149 = vmatprep.mubr.msk.f32.mxu0 %vm31_vm0, %v14_v3  ;;  %v20_v4 = vld [vmem:[%s213_s1 + $0x20] sm:$0xff]  ;;  %v17_v7 = vld [vmem:[%s213_s1 + $0x8] sm:$0xff] }
   0x4   :  { %135 = vmatprep.subr.mxu0 %v22_v1  ;;  %v16_v8 = vld [vmem:[%s213_s1] sm:$0xff]  ;;  %v15_v9 = vld [vmem:[%s214_s0 + $0x8] sm:$0xff] }
   0x5   :  { %136 = vmatpush3.msra.mxu0 %v22_v1  ;;  %v120_v10 = vld [vmem:[%s215_s2] ss:$0 sm:$0xff] }
   0x6   :  { %137 = vmatprep.subr.mxu0 %v21_v2 }
   0x7   :  { %138 = vmatpush3.msra.mxu0 %v21_v2 }
   0x8   :  { %139 = vmatprep.subr.mxu0 %v20_v4 }
   0x9   :  { %140 = vmatpush3.msra.mxu0 %v20_v4 }
   0xa   :  { %141 = vmatprep.subr.mxu0 %v19_v5 }
   0xb   :  { %142 = vmatpush3.msra.mxu0 %v19_v5 }
   0xc   :  { %143 = vmatprep.subr.mxu0 %v18_v6 }
   0xd   :  { %144 = vmatpush3.msra.mxu0 %v18_v6 }
   0xe   :  { %145 = vmatprep.subr.mxu0 %v17_v7 }
   0xf   :  { %146 = vmatpush3.msra.mxu0 %v17_v7 }
  0x10   :  { %147 = vmatprep.subr.mxu0 %v16_v8 }
  0x11   :  { %148 = vmatpush3.msra.mxu0 %v16_v8 }
  0x12   :  { %150 = vmatmul.mubr.msk.f32.vlgmr.msra.gmra.mxu0 %vm31_vm0, %v15_v9 }
  0xd2   :  { %v151_v11 = vpop.f32.mrf.mxu0 }
  0xd3   :  { %v110_v12 = vadd.f32 %v151_v11, %v120_v10 }
  0xd4   :  { %v104_v13 = vpop.f32.mrf.mxu0 }
  0xd5   :  { %115 = vst.msk [vmem:[%s216_s3 + $0x8] sm:$0xff] %vm113_vm1, %v110_v12  ;;  %v105_v14 = vadd.f32 %v120_v10, %v104_v13 }
  0xd7   :  { %114 = vst.msk [vmem:[%s216_s3] sm:$0xff] %vm113_vm1, %v105_v14 }

// kernel: bilstm_forward.2
= control target key start
LH: loop header
LB: loop body
LE: loop exit
PB: predicated region body
PF: predicated region fallthrough
CT: control target
= control target key end

     0   :  { %vm29_vm0 = vcmask 254976   ;;  %v4367_v0 = vmov 0.0   ;;  %vm48_vm1 = vcmask 261120   ;;  %vm4368_vm2 = vmmov 0   ;;  %s4370_s25 = smov 64   ;;  %s4371_s26 = smov 32   ;;  %s5459_s3 = inlined_call_operand.vmem [shape: f32[32,128], index: 3, kind: input, shape index: {}]   ;;  %s5460_s2 = inlined_call_operand.vmem [shape: f32[32,128], index: 2, kind: input, shape index: {}]   ;;  %s5461_s0 = inlined_call_operand.vmem [shape: f32[8,2,32], index: 0, kind: input, shape index: {}]   ;;  %s5462_s4 = inlined_call_operand.vmem [shape: f32[1,128], index: 4, kind: input, shape index: {}]   ;;  %s5463_s1 = inlined_call_operand.vmem [shape: f32[8,2,1], index: 1, kind: input, shape index: {}]   ;;  %s5464_s5 = inlined_call_operand.vmem [shape: f32[32,128], index: 5, kind: input, shape index: {}]   ;;  %s5465_s6 = inlined_call_operand.vmem [shape: f32[32,128], index: 6, kind: input, shape index: {}]   ;;  %s5466_s7 = inlined_call_operand.vmem [shape: f32[1,128], index: 7, kind: input, shape index: {}]   ;;  %s5467_s8 = inlined_call_operand.vmem [shape: f32[8,2,64], index: 8, kind: output, shape index: {}]  }
   0x1   :  { %3879 = vmatprep.subr.mxu0 %v4367_v0  ;;  %3890 = vmatprep.subr.mxu1 %v4367_v0  ;;  %v4423_v1 = vld [vmem:[%s5459_s3 + $0x18] sm:$0xff]  ;;  %v4433_v3 = vld [vmem:[%s5459_s3 + $0x10] sm:$0xff]  ;;  %30 = vst.msk [vmem:[#allocation2] sm:$0x3] %vm29_vm0, %v4367_v0  ;;  %31 = vst.msk [vmem:[#allocation3] sm:$0x3] %vm29_vm0, %v4367_v0 }
   0x2   :  { %v4428_v2 = vld [vmem:[%s5460_s2 + $0x18] sm:$0xff]  ;;  %32 = vst.msk [vmem:[#allocation4] sm:$0x3] %vm29_vm0, %v4367_v0  ;;  %33 = vst.msk [vmem:[#allocation5] sm:$0x3] %vm29_vm0, %v4367_v0  ;;  %3880 = vmatpush3.msra.mxu0 %v4423_v1  ;;  %v4448_v4 = vld [vmem:[%s5460_s2 + $0x10] sm:$0xff]  ;;  %3887 = vmatprep.mubr.msk.f32.mxu0 %vm4368_vm2, %v4367_v0 }
   0x3   :  { %3891 = vmatpush3.msra.mxu1 %v4428_v2  ;;  %3881 = vmatprep.subr.mxu0 %v4367_v0  ;;  %v4455_v5 = vld [vmem:[%s5459_s3 + $0x8] sm:$0xff]  ;;  %v4469_v7 = vld [vmem:[%s5459_s3] sm:$0xff]  ;;  %v4369_v18 = vmov 0   ;;  %s4372_s29 = smov 96  }
   0x4   :  { %3892 = vmatprep.subr.mxu1 %v4367_v0  ;;  %v4460_v6 = vld [vmem:[%s5460_s2 + $0x8] sm:$0xff]  ;;  %3882 = vmatpush3.msra.mxu0 %v4433_v3  ;;  %v4476_v8 = vld [vmem:[%s5460_s2] sm:$0xff] }
   0x5   :  { %3893 = vmatpush3.msra.mxu1 %v4448_v4  ;;  %3883 = vmatprep.subr.mxu0 %v4367_v0  ;;  %v36_v9 = vld [vmem:[%s5461_s0] sm:$0x3]  ;;  %v3625_v37 = vld [vmem:[%s5461_s0 + $0x2] sm:$0x3] }
   0x6   :  { %3894 = vmatprep.subr.mxu1 %v4367_v0  ;;  %3884 = vmatpush3.msra.mxu0 %v4455_v5  ;;  %v4516_v12 = vld [vmem:[%s5462_s4] ss:$0 sm:$0xff]  ;;  %v3624_v42 = vld [vmem:[%s5463_s1 + $0x2] sm:$0x3] }
   0x7   :  { %3895 = vmatpush3.msra.mxu1 %v4460_v6  ;;  %3885 = vmatprep.subr.mxu0 %v4367_v0  ;;  %v34_v24 = vld [vmem:[%s5463_s1] sm:$0x3]  ;;  %vm258_vm5 = vcmp.gt.f32.partialorder %v3624_v42, 0.0 }
   0x8   :  { %3896 = vmatprep.subr.mxu1 %v4367_v0  ;;  %3886 = vmatpush3.msra.mxu0 %v4469_v7  ;;  %v37_v10 = vld [vmem:[#allocation2] sm:$0x3]  ;;  %v38_v20 = vld [vmem:[#allocation3] sm:$0x3]  ;;  %vm35_vm3 = vcmp.gt.f32.partialorder %v34_v24, 0.0  ;;  %v453_v44 = vsel %vm258_vm5, 1, %v4369_v18 }
   0x9   :  { %3897 = vmatpush3.msra.mxu1 %v4476_v8  ;;  %3898 = vmatprep.mubr.msk.f32.mxu1 %vm4368_vm2, %v4367_v0  ;;  %v230_v28 = vsel %vm35_vm3, 1, %v4369_v18 }
   0xa   :  { %3888 = vmatmul.mubr.msk.f32.vlgmr.msra.gmra.mxu0 %vm48_vm1, %v37_v10  ;;  %3899 = vmatmul.mubr.msk.f32.vlgmr.msra.gmra.mxu1 %vm48_vm1, %v36_v9 }
   0xb   :  { %3912 = vmatprep.subr.mxu1 %v4367_v0  ;;  %3901 = vmatprep.subr.mxu0 %v4367_v0 }
   0xc   :  { %3913 = vmatpush3.msra.mxu1 %v4428_v2  ;;  %3902 = vmatpush3.msra.mxu0 %v4423_v1 }
   0xd   :  { %3914 = vmatprep.subr.mxu1 %v4367_v0  ;;  %3903 = vmatprep.subr.mxu0 %v4367_v0 }
   0xe   :  { %3915 = vmatpush3.msra.mxu1 %v4448_v4  ;;  %3904 = vmatpush3.msra.mxu0 %v4433_v3 }
   0xf   :  { %3916 = vmatprep.subr.mxu1 %v4367_v0  ;;  %3905 = vmatprep.subr.mxu0 %v4367_v0 }
  0x10   :  { %3917 = vmatpush3.msra.mxu1 %v4460_v6  ;;  %3906 = vmatpush3.msra.mxu0 %v4455_v5 }
  0x11   :  { %3918 = vmatprep.subr.mxu1 %v4367_v0  ;;  %3920 = vmatprep.mubr.msk.f32.mxu1 %vm4368_vm2, %v4367_v0 }
  0x12   :  { %3919 = vmatpush3.msra.mxu1 %v4476_v8  ;;  %3907 = vmatprep.subr.mxu0 %v4367_v0 }
  0x13   :  { %3908 = vmatpush3.msra.mxu0 %v4469_v7  ;;  %3909 = vmatprep.mubr.msk.f32.mxu0 %vm4368_vm2, %v4367_v0 }
  0x14   :  { %3934 = vmatprep.subr.mxu1 %v4367_v0  ;;  %3923 = vmatprep.subr.mxu0 %v4367_v0 }
  0x15   :  { %4237 = vset.pattern.permute.xlu1 %v4369_v18  ;;  %4238 = vset.pattern.permute.xlu0 %v4369_v18 }
  0x16   :  { %3921 = vmatmul.mubr.msk.f32.vlgmr.msra.gmra.mxu1 %vm48_vm1, %v3625_v37 }
  0x17   :  { %3935 = vmatpush3.msra.mxu1 %v4428_v2  ;;  %3942 = vmatprep.mubr.msk.f32.mxu1 %vm4368_vm2, %v4367_v0 }
  0x18   :  { %3936 = vmatprep.subr.mxu1 %v4367_v0 }
  0x19   :  { %3937 = vmatpush3.msra.mxu1 %v4448_v4 }
  0x1a   :  { %3938 = vmatprep.subr.mxu1 %v4367_v0 }
  0x1b   :  { %3939 = vmatpush3.msra.mxu1 %v4460_v6 }
  0x1c   :  { %3940 = vmatprep.subr.mxu1 %v4367_v0 }
  0x1d   :  { %3941 = vmatpush3.msra.mxu1 %v4476_v8 }
  0x1e   :  { %3956 = vmatprep.subr.mxu1 %v4367_v0 }
  0xca   :  { %v118_v11 = vpop.f32.mrf.mxu0  ;;  %v191_v13 = vpop.f32.mrf.mxu1 }
  0xcb   :  { %v192_v14 = vadd.f32 %v191_v13, %v118_v11 }
  0xcc   :  { %v3889_v15 = vpop.f32.mrf.mxu0  ;;  %v3900_v16 = vpop.f32.mrf.mxu1 }
  0xcd   :  { %v201_v17 = vadd.f32 %v4516_v12, %v192_v14  ;;  %v3630_v15 = vld [vmem:[%s5463_s1 + $0x4] sm:$0x3] }
  0xce   :  { %vm482_vm7 = vcmp.gt.f32.partialorder %v3630_v15, 0.0 }
  0xcf   :  { %4239 = vtanh.f32 %v201_v17  ;;  %v3623_v21 = vmul.f32 -1.442695, %v201_v17  ;;  %v3631_v17 = vld [vmem:[%s5461_s0 + $0x4] sm:$0x3] }
  0xd0   :  { %3943 = vmatmul.mubr.msk.f32.vlgmr.msra.gmra.mxu1 %vm48_vm1, %v3631_v17 }
  0xd1   :  { %4241 = vpow2.f32 %v3623_v21  ;;  %3957 = vmatpush3.msra.mxu1 %v4428_v2  ;;  %3964 = vmatprep.mubr.msk.f32.mxu1 %vm4368_vm2, %v4367_v0 }
  0xd2   :  { %3958 = vmatprep.subr.mxu1 %v4367_v0 }
  0xd3   :  { %3959 = vmatpush3.msra.mxu1 %v4448_v4 }
  0xd4   :  { %3960 = vmatprep.subr.mxu1 %v4367_v0 }
  0xd5   :  { %3961 = vmatpush3.msra.mxu1 %v4460_v6 }
  0xd6   :  { %v414_v47 = vpop.f32.mrf.mxu1  ;;  %3962 = vmatprep.subr.mxu1 %v4367_v0 }
  0xd7   :  { %3963 = vmatpush3.msra.mxu1 %v4476_v8 }
  0xd8   :  { %v3922_v48 = vpop.f32.mrf.mxu1  ;;  %3978 = vmatprep.subr.mxu1 %v4367_v0 }
  0xdc   :  { %v4240_v19 = vpop.eup %4239 }
  0xdd   :  { %215 = vrot.lane.b32.xlu0 %v4240_v19, %s4370_s25  ;;  %v677_v19 = vsel %vm482_vm7, 1, %v4369_v18 }
  0xde   :  { %v4242_v22 = vpop.eup %4241 }
  0xdf   :  { %v205_v23 = vadd.f32 1.0, %v4242_v22 }
  0xe1   :  { %210 = vrot.lane.b32.xlu0 %v38_v20, %s4371_s26  ;;  %4243 = vrcp.f32 %v205_v23 }
  0xee   :  { %v4244_v25 = vpop.eup %4243 }
 0x14f   :  { %v216_v26 = vpop.permute.xlu0 %215 }
 0x150   :  { %v218_v27 = vmul.f32 %v4244_v25, %v216_v26 }
 0x152   :  { %220 = vrot.lane.b32.xlu1 %v218_v27, %s4371_s26 }
 0x153   :  { %v211_v29 = vpop.permute.xlu0 %210 }
 0x154   :  { %v213_v30 = vmul.f32 %v4244_v25, %v211_v29 }
 0x156   :  { %232 = vperm.xlu1 %4237, %v230_v28  }
 0x15a   :  { %235 = vrot.lane.b32.xlu1 %v37_v10, %s4372_s29 }
 0x1c4   :  { %v221_v31 = vpop.permute.xlu1 %220 }
 0x1c5   :  { %v223_v32 = vadd.f32 %v221_v31, %v213_v30 }
 0x1c7   :  { %4245 = vtanh.f32 %v223_v32 }
 0x1d1   :  { %v4529_v33 = vpop.permute.xlu1 %232 }
 0x1d2   :  { %vm234_vm4 = vcmp.eq.s32.totalorder %v4529_v33, 1 }
 0x1d3   :  { %v239_v34 = vsel %vm234_vm4, %v223_v32, %v211_v29 }
 0x1d4   :  { %v4246_v35 = vpop.eup %4245  ;;  %247 = vrot.lane.b32.xlu1 %v239_v34, %s4372_s29 }
 0x1d5   :  { %226 = vrot.lane.b32.xlu0 %v4246_v35, %s4370_s25  ;;  %v236_v36 = vpop.permute.xlu1 %235 }
 0x246   :  { %v248_v38 = vpop.permute.xlu1 %247 }
 0x247   :  { %250 = vst.msk [vmem:[#allocation3] sm:$0x3] %vm29_vm0, %v248_v38  ;;  %v227_v39 = vpop.permute.xlu0 %226 }
 0x248   :  { %v4548_v40 = vmul.f32 %v4244_v25, %v227_v39  ;;  %v638_v25 = vpop.f32.mrf.mxu1 }
 0x24a   :  { %v238_v41 = vsel %vm234_vm4, %v4548_v40, %v236_v36  ;;  %v3944_v26 = vpop.f32.mrf.mxu1 }
 0x24b   :  { %242 = vrot.lane.b32.xlu0 %v238_v41, %s4371_s26 }
 0x24e   :  { %v262_v43 = vld [vmem:[#allocation3] sm:$0x3] }
 0x24f   :  { %433 = vrot.lane.b32.xlu1 %v262_v43, %s4371_s26 }
 0x253   :  { %455 = vperm.xlu1 %4237, %v453_v44  }
 0x2bd   :  { %v243_v45 = vpop.permute.xlu0 %242 }
 0x2be   :  { %245 = vst.msk [vmem:[#allocation2] sm:$0x3] %vm29_vm0, %v243_v45 }
 0x2c1   :  { %v434_v60 = vpop.permute.xlu1 %433 }
 0x2c5   :  { %v261_v46 = vld [vmem:[#allocation2] sm:$0x3] }
 0x2c6   :  { %458 = vrot.lane.b32.xlu1 %v261_v46, %s4372_s29  ;;  %3910 = vmatmul.mubr.msk.f32.vlgmr.msra.gmra.mxu0 %vm48_vm1, %v261_v46 }
 0x2c7   :  { %3924 = vmatpush3.msra.mxu0 %v4423_v1  ;;  %3931 = vmatprep.mubr.msk.f32.mxu0 %vm4368_vm2, %v4367_v0 }
 0x2c8   :  { %3925 = vmatprep.subr.mxu0 %v4367_v0 }
 0x2c9   :  { %3926 = vmatpush3.msra.mxu0 %v4433_v3 }
 0x2ca   :  { %3927 = vmatprep.subr.mxu0 %v4367_v0 }
 0x2cb   :  { %3928 = vmatpush3.msra.mxu0 %v4455_v5 }
 0x2cc   :  { %3929 = vmatprep.subr.mxu0 %v4367_v0 }
 0x2cd   :  { %3930 = vmatpush3.msra.mxu0 %v4469_v7 }
 0x2ce   :  { %3945 = vmatprep.subr.mxu0 %v4367_v0  ;;  %v4578_v61 = vpop.permute.xlu1 %455 }
 0x2cf   :  { %vm457_vm6 = vcmp.eq.s32.totalorder %v4578_v61, 1 }
 0x338   :  { %v459_v13 = vpop.permute.xlu1 %458 }
 0x386   :  { %v341_v49 = vpop.f32.mrf.mxu0 }
 0x387   :  { %v415_v50 = vadd.f32 %v414_v47, %v341_v49  ;;  %v3636_v49 = vld [vmem:[%s5463_s1 + $0x6] sm:$0x3] }
 0x388   :  { %v3911_v51 = vpop.f32.mrf.mxu0  ;;  %vm706_vm9 = vcmp.gt.f32.partialorder %v3636_v49, 0.0 }
 0x389   :  { %v424_v52 = vadd.f32 %v4516_v12, %v415_v50  ;;  %v3637_v51 = vld [vmem:[%s5461_s0 + $0x6] sm:$0x3] }
 0x38a   :  { %3965 = vmatmul.mubr.msk.f32.vlgmr.msra.gmra.mxu1 %vm48_vm1, %v3637_v51 }
 0x38b   :  { %4247 = vtanh.f32 %v424_v52  ;;  %v3629_v54 = vmul.f32 -1.442695, %v424_v52  ;;  %v901_v52 = vsel %vm706_vm9, 1, %v4369_v18  ;;  %3979 = vmatpush3.msra.mxu1 %v4428_v2  ;;  %3986 = vmatprep.mubr.msk.f32.mxu1 %vm4368_vm2, %v4367_v0 }
 0x38c   :  { %3980 = vmatprep.subr.mxu1 %v4367_v0 }
 0x38d   :  { %4249 = vpow2.f32 %v3629_v54  ;;  %3981 = vmatpush3.msra.mxu1 %v4448_v4 }
 0x38e   :  { %3982 = vmatprep.subr.mxu1 %v4367_v0 }
 0x38f   :  { %3983 = vmatpush3.msra.mxu1 %v4460_v6 }
 0x390   :  { %3984 = vmatprep.subr.mxu1 %v4367_v0 }
 0x391   :  { %3985 = vmatpush3.msra.mxu1 %v4476_v8 }
 0x392   :  { %4000 = vmatprep.subr.mxu1 %v4367_v0 }
 0x398   :  { %v4248_v53 = vpop.eup %4247 }
 0x399   :  { %438 = vrot.lane.b32.xlu0 %v4248_v53, %s4370_s25 }
 0x39a   :  { %v4250_v55 = vpop.eup %4249 }
 0x39b   :  { %v428_v56 = vadd.f32 1.0, %v4250_v55 }
 0x39d   :  { %4251 = vrcp.f32 %v428_v56 }
 0x3aa   :  { %v4252_v57 = vpop.eup %4251 }
 0x3ab   :  { %v436_v62 = vmul.f32 %v4252_v57, %v434_v60 }
 0x40b   :  { %v439_v58 = vpop.permute.xlu0 %438 }
 0x40c   :  { %v441_v59 = vmul.f32 %v4252_v57, %v439_v58 }
 0x40e   :  { %443 = vrot.lane.b32.xlu0 %v441_v59, %s4371_s26 }
 0x44a   :  { %v862_v58 = vpop.f32.mrf.mxu1 }
 0x44c   :  { %v3966_v59 = vpop.f32.mrf.mxu1 }
 0x480   :  { %v444_v63 = vpop.permute.xlu0 %443 }
 0x481   :  { %v446_v9 = vadd.f32 %v444_v63, %v436_v62 }
 0x483   :  { %4253 = vtanh.f32 %v446_v9  ;;  %v462_v10 = vsel %vm457_vm6, %v446_v9, %v434_v60 }
 0x484   :  { %470 = vrot.lane.b32.xlu1 %v462_v10, %s4372_s29 }
 0x490   :  { %v4254_v11 = vpop.eup %4253 }
 0x491   :  { %449 = vrot.lane.b32.xlu0 %v4254_v11, %s4370_s25 }
 0x4f6   :  { %v471_v14 = vpop.permute.xlu1 %470 }
 0x4f7   :  { %473 = vst.msk [vmem:[#allocation3] sm:$0x3] %vm29_vm0, %v471_v14 }
 0x4fe   :  { %v486_v16 = vld [vmem:[#allocation3] sm:$0x3] }
 0x4ff   :  { %657 = vrot.lane.b32.xlu1 %v486_v16, %s4371_s26 }
 0x503   :  { %679 = vperm.xlu1 %4237, %v677_v19   ;;  %v450_v20 = vpop.permute.xlu0 %449 }
 0x504   :  { %v4600_v21 = vmul.f32 %v4252_v57, %v450_v20 }
 0x506   :  { %v461_v22 = vsel %vm457_vm6, %v4600_v21, %v459_v13 }
 0x507   :  { %465 = vrot.lane.b32.xlu0 %v461_v22, %s4371_s26 }
 0x571   :  { %v658_v39 = vpop.permute.xlu1 %657 }
 0x579   :  { %v466_v23 = vpop.permute.xlu0 %465 }
 0x57a   :  { %468 = vst.msk [vmem:[#allocation2] sm:$0x3] %vm29_vm0, %v466_v23 }
 0x57e   :  { %v4627_v41 = vpop.permute.xlu1 %679 }
 0x57f   :  { %vm681_vm8 = vcmp.eq.s32.totalorder %v4627_v41, 1 }
 0x581   :  { %v485_v24 = vld [vmem:[#allocation2] sm:$0x3] }
 0x582   :  { %682 = vrot.lane.b32.xlu1 %v485_v24, %s4372_s29  ;;  %3932 = vmatmul.mubr.msk.f32.vlgmr.msra.gmra.mxu0 %vm48_vm1, %v485_v24 }
 0x583   :  { %3946 = vmatpush3.msra.mxu0 %v4423_v1  ;;  %3953 = vmatprep.mubr.msk.f32.mxu0 %vm4368_vm2, %v4367_v0 }
 0x584   :  { %3947 = vmatprep.subr.mxu0 %v4367_v0 }
 0x585   :  { %3948 = vmatpush3.msra.mxu0 %v4433_v3 }
 0x586   :  { %3949 = vmatprep.subr.mxu0 %v4367_v0 }
 0x587   :  { %3950 = vmatpush3.msra.mxu0 %v4455_v5 }
 0x588   :  { %3951 = vmatprep.subr.mxu0 %v4367_v0 }
 0x589   :  { %3952 = vmatpush3.msra.mxu0 %v4469_v7 }
 0x58a   :  { %3967 = vmatprep.subr.mxu0 %v4367_v0 }
 0x5f4   :  { %v683_v47 = vpop.permute.xlu1 %682 }
 0x642   :  { %v565_v27 = vpop.f32.mrf.mxu0 }
 0x643   :  { %v639_v28 = vadd.f32 %v638_v25, %v565_v27 }
 0x644   :  { %v3933_v29 = vpop.f32.mrf.mxu0 }
 0x645   :  { %v648_v30 = vadd.f32 %v4516_v12, %v639_v28  ;;  %v3642_v29 = vld [vmem:[%s5463_s1 + $0x8] sm:$0x3] }
 0x646   :  { %vm930_vm11 = vcmp.gt.f32.partialorder %v3642_v29, 0.0 }
 0x647   :  { %4255 = vtanh.f32 %v648_v30  ;;  %v3635_v32 = vmul.f32 -1.442695, %v648_v30 }
 0x649   :  { %4257 = vpow2.f32 %v3635_v32  ;;  %v1125_v32 = vsel %vm930_vm11, 1, %v4369_v18 }
 0x654   :  { %v4256_v31 = vpop.eup %4255 }
 0x655   :  { %662 = vrot.lane.b32.xlu0 %v4256_v31, %s4370_s25  ;;  %v3643_v31 = vld [vmem:[%s5461_s0 + $0x8] sm:$0x3] }
 0x656   :  { %v4258_v34 = vpop.eup %4257  ;;  %3987 = vmatmul.mubr.msk.f32.vlgmr.msra.gmra.mxu1 %vm48_vm1, %v3643_v31 }
 0x657   :  { %v652_v35 = vadd.f32 1.0, %v4258_v34  ;;  %4001 = vmatpush3.msra.mxu1 %v4428_v2  ;;  %4008 = vmatprep.mubr.msk.f32.mxu1 %vm4368_vm2, %v4367_v0 }
 0x658   :  { %4002 = vmatprep.subr.mxu1 %v4367_v0 }
 0x659   :  { %4259 = vrcp.f32 %v652_v35  ;;  %4003 = vmatpush3.msra.mxu1 %v4448_v4 }
 0x65a   :  { %4004 = vmatprep.subr.mxu1 %v4367_v0 }
 0x65b   :  { %4005 = vmatpush3.msra.mxu1 %v4460_v6 }
 0x65c   :  { %4006 = vmatprep.subr.mxu1 %v4367_v0 }
 0x65d   :  { %4007 = vmatpush3.msra.mxu1 %v4476_v8 }
 0x65e   :  { %4022 = vmatprep.subr.mxu1 %v4367_v0 }
 0x666   :  { %v4260_v36 = vpop.eup %4259 }
 0x667   :  { %v660_v42 = vmul.f32 %v4260_v36, %v658_v39 }
 0x6c7   :  { %v663_v37 = vpop.permute.xlu0 %662 }
 0x6c8   :  { %v665_v38 = vmul.f32 %v4260_v36, %v663_v37 }
 0x6ca   :  { %667 = vrot.lane.b32.xlu0 %v665_v38, %s4371_s26 }
 0x73c   :  { %v668_v43 = vpop.permute.xlu0 %667 }
 0x73d   :  { %v670_v44 = vadd.f32 %v668_v43, %v660_v42 }
 0x73f   :  { %4261 = vtanh.f32 %v670_v44  ;;  %v686_v45 = vsel %vm681_vm8, %v670_v44, %v658_v39  ;;  %v1086_v39 = vpop.f32.mrf.mxu1 }
 0x740   :  { %694 = vrot.lane.b32.xlu1 %v686_v45, %s4372_s29 }
 0x741   :  { %v3988_v42 = vpop.f32.mrf.mxu1 }
 0x74c   :  { %v4262_v46 = vpop.eup %4261 }
 0x74d   :  { %673 = vrot.lane.b32.xlu0 %v4262_v46, %s4370_s25 }
 0x7b2   :  { %v695_v48 = vpop.permute.xlu1 %694 }
 0x7b3   :  { %697 = vst.msk [vmem:[#allocation3] sm:$0x3] %vm29_vm0, %v695_v48 }
 0x7ba   :  { %v710_v50 = vld [vmem:[#allocation3] sm:$0x3] }
 0x7bb   :  { %881 = vrot.lane.b32.xlu1 %v710_v50, %s4371_s26 }
 0x7bf   :  { %903 = vperm.xlu1 %4237, %v901_v52   ;;  %v674_v53 = vpop.permute.xlu0 %673 }
 0x7c0   :  { %v4649_v54 = vmul.f32 %v4260_v36, %v674_v53 }
 0x7c2   :  { %v685_v55 = vsel %vm681_vm8, %v4649_v54, %v683_v47 }
 0x7c3   :  { %689 = vrot.lane.b32.xlu0 %v685_v55, %s4371_s26 }
 0x82d   :  { %v882_v19 = vpop.permute.xlu1 %881 }
 0x835   :  { %v690_v56 = vpop.permute.xlu0 %689 }
 0x836   :  { %692 = vst.msk [vmem:[#allocation2] sm:$0x3] %vm29_vm0, %v690_v56 }
 0x83a   :  { %v4676_v20 = vpop.permute.xlu1 %903 }
 0x83b   :  { %vm905_vm10 = vcmp.eq.s32.totalorder %v4676_v20, 1 }
 0x83d   :  { %v709_v57 = vld [vmem:[#allocation2] sm:$0x3] }
 0x83e   :  { %906 = vrot.lane.b32.xlu1 %v709_v57, %s4372_s29  ;;  %3954 = vmatmul.mubr.msk.f32.vlgmr.msra.gmra.mxu0 %vm48_vm1, %v709_v57 }
 0x83f   :  { %3968 = vmatpush3.msra.mxu0 %v4423_v1  ;;  %3975 = vmatprep.mubr.msk.f32.mxu0 %vm4368_vm2, %v4367_v0 }
 0x840   :  { %3969 = vmatprep.subr.mxu0 %v4367_v0 }
 0x841   :  { %3970 = vmatpush3.msra.mxu0 %v4433_v3 }
 0x842   :  { %3971 = vmatprep.subr.mxu0 %v4367_v0 }
 0x843   :  { %3972 = vmatpush3.msra.mxu0 %v4455_v5 }
 0x844   :  { %3973 = vmatprep.subr.mxu0 %v4367_v0 }
 0x845   :  { %3974 = vmatpush3.msra.mxu0 %v4469_v7 }
 0x846   :  { %3989 = vmatprep.subr.mxu0 %v4367_v0 }
 0x8b0   :  { %v907_v27 = vpop.permute.xlu1 %906 }
 0x8fe   :  { %v789_v60 = vpop.f32.mrf.mxu0 }
 0x8ff   :  { %v863_v62 = vadd.f32 %v862_v58, %v789_v60 }
 0x900   :  { %v3955_v63 = vpop.f32.mrf.mxu0 }
 0x901   :  { %v872_v9 = vadd.f32 %v4516_v12, %v863_v62 }
 0x903   :  { %4263 = vtanh.f32 %v872_v9  ;;  %v3641_v11 = vmul.f32 -1.442695, %v872_v9 }
 0x905   :  { %4265 = vpow2.f32 %v3641_v11 }
 0x910   :  { %v4264_v10 = vpop.eup %4263 }
 0x911   :  { %886 = vrot.lane.b32.xlu0 %v4264_v10, %s4370_s25  ;;  %v3648_v10 = vld [vmem:[%s5463_s1 + $0xa] sm:$0x3] }
 0x912   :  { %v4266_v13 = vpop.eup %4265  ;;  %vm1154_vm13 = vcmp.gt.f32.partialorder %v3648_v10, 0.0 }
 0x913   :  { %v876_v14 = vadd.f32 1.0, %v4266_v13  ;;  %v3649_v13 = vld [vmem:[%s5461_s0 + $0xa] sm:$0x3] }
 0x914   :  { %4009 = vmatmul.mubr.msk.f32.vlgmr.msra.gmra.mxu1 %vm48_vm1, %v3649_v13 }
 0x915   :  { %4267 = vrcp.f32 %v876_v14  ;;  %v1349_v14 = vsel %vm1154_vm13, 1, %v4369_v18  ;;  %4023 = vmatpush3.msra.mxu1 %v4428_v2  ;;  %4030 = vmatprep.mubr.msk.f32.mxu1 %vm4368_vm2, %v4367_v0 }
 0x916   :  { %4024 = vmatprep.subr.mxu1 %v4367_v0 }
 0x917   :  { %4025 = vmatpush3.msra.mxu1 %v4448_v4 }
 0x918   :  { %4026 = vmatprep.subr.mxu1 %v4367_v0 }
 0x919   :  { %4027 = vmatpush3.msra.mxu1 %v4460_v6 }
 0x91a   :  { %4028 = vmatprep.subr.mxu1 %v4367_v0 }
 0x91b   :  { %4029 = vmatpush3.msra.mxu1 %v4476_v8 }
 0x91c   :  { %4044 = vmatprep.subr.mxu1 %v4367_v0 }
 0x922   :  { %v4268_v15 = vpop.eup %4267 }
 0x923   :  { %v884_v22 = vmul.f32 %v4268_v15, %v882_v19 }
 0x983   :  { %v887_v16 = vpop.permute.xlu0 %886 }
 0x984   :  { %v889_v17 = vmul.f32 %v4268_v15, %v887_v16 }
 0x986   :  { %891 = vrot.lane.b32.xlu0 %v889_v17, %s4371_s26 }
 0x9d4   :  { %v1310_v6 = vpop.f32.mrf.mxu1 }
 0x9f8   :  { %v892_v23 = vpop.permute.xlu0 %891 }
 0x9f9   :  { %v894_v24 = vadd.f32 %v892_v23, %v884_v22  ;;  %v4010_v22 = vpop.f32.mrf.mxu1 }
 0x9fa   :  { %v1608_v22 = vld [vmem:[%s5460_s2 + $0x8] sm:$0xff] }
 0x9fb   :  { %4269 = vtanh.f32 %v894_v24  ;;  %v910_v25 = vsel %vm905_vm10, %v894_v24, %v882_v19 }
 0x9fc   :  { %918 = vrot.lane.b32.xlu1 %v910_v25, %s4372_s29 }
 0xa08   :  { %v4270_v26 = vpop.eup %4269 }
 0xa09   :  { %897 = vrot.lane.b32.xlu0 %v4270_v26, %s4370_s25 }
 0xa6e   :  { %v919_v28 = vpop.permute.xlu1 %918 }
 0xa6f   :  { %921 = vst.msk [vmem:[#allocation3] sm:$0x3] %vm29_vm0, %v919_v28 }
 0xa76   :  { %v934_v30 = vld [vmem:[#allocation3] sm:$0x3] }
 0xa77   :  { %1105 = vrot.lane.b32.xlu1 %v934_v30, %s4371_s26 }
 0xa7b   :  { %1127 = vperm.xlu1 %4237, %v1125_v32   ;;  %v898_v34 = vpop.permute.xlu0 %897 }
 0xa7c   :  { %v4698_v35 = vmul.f32 %v4268_v15, %v898_v34 }
 0xa7e   :  { %v909_v36 = vsel %vm905_vm10, %v4698_v35, %v907_v27 }
 0xa7f   :  { %913 = vrot.lane.b32.xlu0 %v909_v36, %s4371_s26 }
 0xae9   :  { %v1106_v55 = vpop.permute.xlu1 %1105 }
 0xaf1   :  { %v914_v37 = vpop.permute.xlu0 %913 }
 0xaf2   :  { %916 = vst.msk [vmem:[#allocation2] sm:$0x3] %vm29_vm0, %v914_v37 }
 0xaf6   :  { %v4725_v56 = vpop.permute.xlu1 %1127 }
 0xaf7   :  { %vm1129_vm12 = vcmp.eq.s32.totalorder %v4725_v56, 1 }
 0xaf9   :  { %v933_v38 = vld [vmem:[#allocation2] sm:$0x3] }
 0xafa   :  { %1130 = vrot.lane.b32.xlu1 %v933_v38, %s4372_s29  ;;  %3976 = vmatmul.mubr.msk.f32.vlgmr.msra.gmra.mxu0 %vm48_vm1, %v933_v38 }
 0xafb   :  { %3990 = vmatpush3.msra.mxu0 %v4423_v1  ;;  %3997 = vmatprep.mubr.msk.f32.mxu0 %vm4368_vm2, %v4367_v0 }
 0xafc   :  { %3991 = vmatprep.subr.mxu0 %v4367_v0 }
 0xafd   :  { %3992 = vmatpush3.msra.mxu0 %v4433_v3 }
 0xafe   :  { %3993 = vmatprep.subr.mxu0 %v4367_v0 }
 0xaff   :  { %3994 = vmatpush3.msra.mxu0 %v4455_v5 }
 0xb00   :  { %3995 = vmatprep.subr.mxu0 %v4367_v0 }
 0xb01   :  { %3996 = vmatpush3.msra.mxu0 %v4469_v7 }
 0xb02   :  { %4011 = vmatprep.subr.mxu0 %v4367_v0 }
 0xb6c   :  { %v1131_v63 = vpop.permute.xlu1 %1130 }
 0xbba   :  { %v1013_v43 = vpop.f32.mrf.mxu0 }
 0xbbb   :  { %v1087_v44 = vadd.f32 %v1086_v39, %v1013_v43  ;;  %v3654_v43 = vld [vmem:[%s5463_s1 + $0xc] sm:$0x3] }
 0xbbc   :  { %v3977_v45 = vpop.f32.mrf.mxu0  ;;  %vm1378_vm15 = vcmp.gt.f32.partialorder %v3654_v43, 0.0  ;;  %v1827_v43 = vld [vmem:[#allocation4] sm:$0x3] }
 0xbbd   :  { %v1096_v46 = vadd.f32 %v4516_v12, %v1087_v44  ;;  %v3655_v45 = vld [vmem:[%s5461_s0 + $0xc] sm:$0x3] }
 0xbbe   :  { %4031 = vmatmul.mubr.msk.f32.vlgmr.msra.gmra.mxu1 %vm48_vm1, %v3655_v45 }
 0xbbf   :  { %4271 = vtanh.f32 %v1096_v46  ;;  %v3647_v48 = vmul.f32 -1.442695, %v1096_v46  ;;  %v1573_v46 = vsel %vm1378_vm15, 1, %v4369_v18  ;;  %4045 = vmatpush3.msra.mxu1 %v4428_v2  ;;  %4052 = vmatprep.mubr.msk.f32.mxu1 %vm4368_vm2, %v4367_v0 }
 0xbc0   :  { %4046 = vmatprep.subr.mxu1 %v4367_v0 }
 0xbc1   :  { %4273 = vpow2.f32 %v3647_v48 }
 0xbcc   :  { %v4272_v47 = vpop.eup %4271 }
 0xbcd   :  { %1110 = vrot.lane.b32.xlu0 %v4272_v47, %s4370_s25 }
 0xbce   :  { %v4274_v49 = vpop.eup %4273 }
 0xbcf   :  { %v1100_v50 = vadd.f32 1.0, %v4274_v49 }
 0xbd1   :  { %4275 = vrcp.f32 %v1100_v50 }
 0xbde   :  { %v4276_v51 = vpop.eup %4275 }
 0xbdf   :  { %v1108_v57 = vmul.f32 %v4276_v51, %v1106_v55 }
 0xc3f   :  { %v1111_v52 = vpop.permute.xlu0 %1110 }
 0xc40   :  { %v1113_v53 = vmul.f32 %v4276_v51, %v1111_v52 }
 0xc42   :  { %1115 = vrot.lane.b32.xlu0 %v1113_v53, %s4371_s26 }
 0xc7e   :  { %v1534_v2 = vpop.f32.mrf.mxu1 }
 0xc80   :  { %v4032_v52 = vpop.f32.mrf.mxu1 }
 0xc81   :  { %v4957_v52 = vld [vmem:[%s5466_s7] ss:$0 sm:$0xff] }
 0xcb4   :  { %v1116_v58 = vpop.permute.xlu0 %1115 }
 0xcb5   :  { %v1118_v59 = vadd.f32 %v1116_v58, %v1108_v57 }
 0xcb7   :  { %4277 = vtanh.f32 %v1118_v59  ;;  %v1134_v60 = vsel %vm1129_vm12, %v1118_v59, %v1106_v55 }
 0xcb8   :  { %1142 = vrot.lane.b32.xlu1 %v1134_v60, %s4372_s29 }
 0xcc4   :  { %v4278_v62 = vpop.eup %4277 }
 0xcc5   :  { %1121 = vrot.lane.b32.xlu0 %v4278_v62, %s4370_s25 }
 0xd2a   :  { %v1143_v9 = vpop.permute.xlu1 %1142 }
 0xd2b   :  { %1145 = vst.msk [vmem:[#allocation3] sm:$0x3] %vm29_vm0, %v1143_v9 }
 0xd32   :  { %v1158_v11 = vld [vmem:[#allocation3] sm:$0x3] }
 0xd33   :  { %1329 = vrot.lane.b32.xlu1 %v1158_v11, %s4371_s26 }
 0xd37   :  { %1351 = vperm.xlu1 %4237, %v1349_v14   ;;  %v1122_v15 = vpop.permute.xlu0 %1121 }
 0xd38   :  { %v4747_v16 = vmul.f32 %v4276_v51, %v1122_v15 }
 0xd3a   :  { %v1133_v17 = vsel %vm1129_vm12, %v4747_v16, %v1131_v63 }
 0xd3b   :  { %1137 = vrot.lane.b32.xlu0 %v1133_v17, %s4371_s26 }
 0xda5   :  { %v1330_v30 = vpop.permute.xlu1 %1329 }
 0xdad   :  { %v1138_v19 = vpop.permute.xlu0 %1137 }
 0xdae   :  { %1140 = vst.msk [vmem:[#allocation2] sm:$0x3] %vm29_vm0, %v1138_v19  ;;  %v1614_v19 = vld [vmem:[%s5459_s3 + $0x18] sm:$0xff] }
 0xdb2   :  { %v4774_v31 = vpop.permute.xlu1 %1351 }
 0xdb3   :  { %vm1353_vm14 = vcmp.eq.s32.totalorder %v4774_v31, 1 }
 0xdb5   :  { %v1157_v4 = vld [vmem:[#allocation2] sm:$0x3] }
 0xdb6   :  { %1354 = vrot.lane.b32.xlu1 %v1157_v4, %s4372_s29  ;;  %3998 = vmatmul.mubr.msk.f32.vlgmr.msra.gmra.mxu0 %vm48_vm1, %v1157_v4  ;;  %v1609_v4 = vld [vmem:[%s5460_s2 + $0x10] sm:$0xff] }
 0xdb7   :  { %4012 = vmatpush3.msra.mxu0 %v4423_v1  ;;  %4019 = vmatprep.mubr.msk.f32.mxu0 %vm4368_vm2, %v4367_v0 }
 0xdb8   :  { %4013 = vmatprep.subr.mxu0 %v4367_v0  ;;  %4047 = vmatpush3.msra.mxu1 %v1609_v4 }
 0xdb9   :  { %4014 = vmatpush3.msra.mxu0 %v4433_v3  ;;  %4048 = vmatprep.subr.mxu1 %v4367_v0 }
 0xdba   :  { %4015 = vmatprep.subr.mxu0 %v4367_v0  ;;  %4049 = vmatpush3.msra.mxu1 %v1608_v22 }
 0xdbb   :  { %4016 = vmatpush3.msra.mxu0 %v4455_v5  ;;  %4050 = vmatprep.subr.mxu1 %v4367_v0 }
 0xdbc   :  { %4017 = vmatprep.subr.mxu0 %v4367_v0  ;;  %4051 = vmatpush3.msra.mxu1 %v4476_v8  ;;  %v4858_v8 = vld [vmem:[%s5464_s5 + $0x10] sm:$0xff] }
 0xdbd   :  { %4018 = vmatpush3.msra.mxu0 %v4469_v7  ;;  %4066 = vmatprep.subr.mxu1 %v4367_v0 }
 0xdbe   :  { %4033 = vmatprep.subr.mxu0 %v4367_v0 }
 0xe28   :  { %v1355_v39 = vpop.permute.xlu1 %1354 }
 0xe76   :  { %v1237_v1 = vpop.f32.mrf.mxu0 }
 0xe77   :  { %v1311_v23 = vadd.f32 %v1310_v6, %v1237_v1  ;;  %v1613_v6 = vld [vmem:[%s5459_s3 + $0x10] sm:$0xff]  ;;  %v1612_v1 = vld [vmem:[%s5459_s3 + $0x8] sm:$0xff] }
 0xe78   :  { %v3999_v24 = vpop.f32.mrf.mxu0 }
 0xe79   :  { %v1320_v25 = vadd.f32 %v4516_v12, %v1311_v23  ;;  %v1611_v23 = vld [vmem:[%s5459_s3] sm:$0xff]  ;;  %v3661_v24 = vld [vmem:[%s5461_s0 + $0xe] sm:$0x3] }
 0xe7a   :  { %4053 = vmatmul.mubr.msk.f32.vlgmr.msra.gmra.mxu1 %vm48_vm1, %v3661_v24 }
 0xe7b   :  { %4279 = vtanh.f32 %v1320_v25  ;;  %v3653_v3 = vmul.f32 -1.442695, %v1320_v25  ;;  %v4845_v25 = vld [vmem:[%s5464_s5 + $0x18] sm:$0xff]  ;;  %4074 = vmatprep.mubr.msk.f32.mxu1 %vm4368_vm2, %v4367_v0 }
 0xe7c   :  { %4067 = vmatpush3.msra.mxu1 %v4845_v25 }
 0xe7d   :  { %4281 = vpow2.f32 %v3653_v3  ;;  %4068 = vmatprep.subr.mxu1 %v4367_v0 }
 0xe7e   :  { %4069 = vmatpush3.msra.mxu1 %v4858_v8 }
 0xe7f   :  { %4070 = vmatprep.subr.mxu1 %v4367_v0 }
 0xe88   :  { %v4280_v26 = vpop.eup %4279 }
 0xe89   :  { %1334 = vrot.lane.b32.xlu0 %v4280_v26, %s4370_s25 }
 0xe8a   :  { %v4282_v5 = vpop.eup %4281 }
 0xe8b   :  { %v1324_v27 = vadd.f32 1.0, %v4282_v5 }
 0xe8d   :  { %4283 = vrcp.f32 %v1324_v27  ;;  %v4869_v27 = vld [vmem:[%s5464_s5 + $0x8] sm:$0xff] }
 0xe8e   :  { %4071 = vmatpush3.msra.mxu1 %v4869_v27 }
 0xe8f   :  { %4072 = vmatprep.subr.mxu1 %v4367_v0 }
 0xe9a   :  { %v4284_v28 = vpop.eup %4283 }
 0xe9b   :  { %v1332_v32 = vmul.f32 %v4284_v28, %v1330_v30 }
 0xefb   :  { %v1335_v7 = vpop.permute.xlu0 %1334 }
 0xefc   :  { %v1337_v29 = vmul.f32 %v4284_v28, %v1335_v7 }
 0xefe   :  { %1339 = vrot.lane.b32.xlu0 %v1337_v29, %s4371_s26  ;;  %v4880_v29 = vld [vmem:[%s5464_s5] sm:$0xff] }
 0xeff   :  { %4073 = vmatpush3.msra.mxu1 %v4880_v29 }
 0xf00   :  { %4088 = vmatprep.subr.mxu1 %v4367_v0 }
 0xf70   :  { %v1340_v34 = vpop.permute.xlu0 %1339 }
 0xf71   :  { %v1342_v36 = vadd.f32 %v1340_v34, %v1332_v32  ;;  %v1828_v32 = vld [vmem:[#allocation5] sm:$0x3] }
 0xf73   :  { %4285 = vtanh.f32 %v1342_v36  ;;  %v1358_v37 = vsel %vm1353_vm14, %v1342_v36, %v1330_v30  ;;  %v3667_v30 = vld [vmem:[%s5461_s0 + $0xe] sm:$0x3]  ;;  %v4904_v36 = vld [vmem:[%s5465_s6 + $0x18] sm:$0xff] }
 0xf74   :  { %1366 = vrot.lane.b32.xlu1 %v1358_v37, %s4372_s29  ;;  %4075 = vmatmul.mubr.msk.f32.vlgmr.msra.gmra.mxu1 %vm48_vm1, %v3667_v30  ;;  %v3673_v30 = vld [vmem:[%s5463_s1 + $0xc] sm:$0x3] }
 0xf75   :  { %4089 = vmatpush3.msra.mxu1 %v4845_v25  ;;  %4096 = vmatprep.mubr.msk.f32.mxu1 %vm4368_vm2, %v4367_v0  ;;  %vm2050_vm9 = vcmp.gt.f32.partialorder %v3673_v30, 0.0 }
 0xf76   :  { %4090 = vmatprep.subr.mxu1 %v4367_v0 }
 0xf77   :  { %4091 = vmatpush3.msra.mxu1 %v4858_v8 }
 0xf78   :  { %4092 = vmatprep.subr.mxu1 %v4367_v0 }
 0xf79   :  { %4093 = vmatpush3.msra.mxu1 %v4869_v27 }
 0xf7a   :  { %4094 = vmatprep.subr.mxu1 %v4367_v0 }
 0xf7b   :  { %4095 = vmatpush3.msra.mxu1 %v4880_v29 }
 0xf7c   :  { %4110 = vmatprep.subr.mxu1 %v4367_v0 }
 0xf80   :  { %v4286_v38 = vpop.eup %4285 }
 0xf81   :  { %1345 = vrot.lane.b32.xlu0 %v4286_v38, %s4370_s25  ;;  %v4913_v38 = vld [vmem:[%s5465_s6 + $0x10] sm:$0xff] }
 0xfe6   :  { %v1367_v42 = vpop.permute.xlu1 %1366 }
 0xfe7   :  { %1369 = vst.msk [vmem:[#allocation3] sm:$0x3] %vm29_vm0, %v1367_v42  ;;  %v4929_v42 = vld [vmem:[%s5465_s6] sm:$0xff] }
 0xfee   :  { %v1382_v44 = vld [vmem:[#allocation3] sm:$0x3] }
 0xfef   :  { %1553 = vrot.lane.b32.xlu1 %v1382_v44, %s4371_s26  ;;  %v4946_v44 = vpop.f32.mrf.mxu1 }
 0xff1   :  { %v4054_v45 = vpop.f32.mrf.mxu1 }
 0xff3   :  { %1575 = vperm.xlu1 %4237, %v1573_v46   ;;  %v1346_v47 = vpop.permute.xlu0 %1345 }
 0xff4   :  { %v4795_v48 = vmul.f32 %v4284_v28, %v1346_v47 }
 0xff6   :  { %v1357_v49 = vsel %vm1353_vm14, %v4795_v48, %v1355_v39  ;;  %v4922_v39 = vld [vmem:[%s5465_s6 + $0x8] sm:$0xff] }
 0xff7   :  { %1361 = vrot.lane.b32.xlu0 %v1357_v49, %s4371_s26  ;;  %v3666_v49 = vld [vmem:[%s5463_s1 + $0xe] sm:$0x3] }
 0xff8   :  { %vm1825_vm5 = vcmp.gt.f32.partialorder %v3666_v49, 0.0 }
0x1034   :  { %v1980_v46 = vpop.f32.mrf.mxu1 }
0x1036   :  { %v4076_v47 = vpop.f32.mrf.mxu1 }
0x1061   :  { %v4809_v13 = vpop.permute.xlu1 %1553 }
0x1069   :  { %v1362_v50 = vpop.permute.xlu0 %1361 }
0x106a   :  { %1364 = vst.msk [vmem:[#allocation2] sm:$0x3] %vm29_vm0, %v1362_v50  ;;  %v2019_v50 = vsel %vm1825_vm5, 1, %v4369_v18 }
0x106e   :  { %v4850_v26 = vpop.permute.xlu1 %1575 }
0x106f   :  { %vm1577_vm3 = vcmp.eq.s32.totalorder %v4850_v26, 1 }
0x1071   :  { %v1381_v51 = vld [vmem:[#allocation2] sm:$0x3] }
0x1072   :  { %1578 = vrot.lane.b32.xlu1 %v1381_v51, %s4372_s29  ;;  %4020 = vmatmul.mubr.msk.f32.vlgmr.msra.gmra.mxu0 %vm48_vm1, %v1381_v51 }
0x1073   :  { %4041 = vmatprep.mubr.msk.f32.mxu0 %vm4368_vm2, %v4367_v0  ;;  %4034 = vmatpush3.msra.mxu0 %v1614_v19 }
0x1074   :  { %4035 = vmatprep.subr.mxu0 %v4367_v0 }
0x1075   :  { %4036 = vmatpush3.msra.mxu0 %v1613_v6 }
0x1076   :  { %4037 = vmatprep.subr.mxu0 %v4367_v0 }
0x1077   :  { %4038 = vmatpush3.msra.mxu0 %v1612_v1  ;;  %v3674_v1 = vld [vmem:[%s5461_s0 + $0xc] sm:$0x3] }
0x1078   :  { %4039 = vmatprep.subr.mxu0 %v4367_v0  ;;  %4097 = vmatmul.mubr.msk.f32.vlgmr.msra.gmra.mxu1 %vm48_vm1, %v3674_v1  ;;  %v3680_v1 = vld [vmem:[%s5463_s1 + $0xa] sm:$0x3] }
0x1079   :  { %4040 = vmatpush3.msra.mxu0 %v1611_v23  ;;  %4111 = vmatpush3.msra.mxu1 %v4845_v25  ;;  %vm2274_vm13 = vcmp.gt.f32.partialorder %v3680_v1, 0.0  ;;  %v3687_v1 = vld [vmem:[%s5463_s1 + $0x8] sm:$0x3] }
0x107a   :  { %4055 = vmatprep.subr.mxu0 %v4367_v0  ;;  %4118 = vmatprep.mubr.msk.f32.mxu1 %vm4368_vm2, %v4367_v0  ;;  %vm2498_vm5 = vcmp.gt.f32.partialorder %v3687_v1, 0.0 }
0x107b   :  { %4112 = vmatprep.subr.mxu1 %v4367_v0 }
0x107c   :  { %4113 = vmatpush3.msra.mxu1 %v4858_v8 }
0x107d   :  { %4114 = vmatprep.subr.mxu1 %v4367_v0 }
0x107e   :  { %4115 = vmatpush3.msra.mxu1 %v4869_v27 }
0x107f   :  { %4116 = vmatprep.subr.mxu1 %v4367_v0 }
0x1080   :  { %4117 = vmatpush3.msra.mxu1 %v4880_v29 }
0x1081   :  { %4132 = vmatprep.subr.mxu1 %v4367_v0 }
0x10e4   :  { %v1579_v28 = vpop.permute.xlu1 %1578 }
0x1132   :  { %v1461_v53 = vpop.f32.mrf.mxu0 }
0x1133   :  { %v1535_v55 = vadd.f32 %v1534_v2, %v1461_v53 }
0x1134   :  { %v4021_v57 = vpop.f32.mrf.mxu0 }
0x1135   :  { %v1544_v58 = vadd.f32 %v4516_v12, %v1535_v55 }
0x1137   :  { %4287 = vtanh.f32 %v1544_v58  ;;  %v3659_v60 = vmul.f32 -1.442695, %v1544_v58 }
0x1139   :  { %4289 = vpow2.f32 %v3659_v60 }
0x1144   :  { %v4288_v59 = vpop.eup %4287 }
0x1145   :  { %1558 = vrot.lane.b32.xlu0 %v4288_v59, %s4370_s25 }
0x1146   :  { %v4290_v62 = vpop.eup %4289 }
0x1147   :  { %v1548_v63 = vadd.f32 1.0, %v4290_v62 }
0x1149   :  { %4291 = vrcp.f32 %v1548_v63 }
0x1156   :  { %v4292_v9 = vpop.eup %4291 }
0x1157   :  { %v1556_v14 = vmul.f32 %v4292_v9, %v4809_v13 }
0x11b7   :  { %v1559_v10 = vpop.permute.xlu0 %1558 }
0x11b8   :  { %v1561_v11 = vmul.f32 %v4292_v9, %v1559_v10 }
0x11ba   :  { %1563 = vrot.lane.b32.xlu0 %v1561_v11, %s4371_s26 }
0x122c   :  { %v1564_v15 = vpop.permute.xlu0 %1563 }
0x122d   :  { %v4812_v12 = vadd.f32 %v1564_v15, %v1556_v14 }
0x122f   :  { %4293 = vtanh.f32 %v4812_v12 }
0x123c   :  { %v4294_v17 = vpop.eup %4293 }
0x123d   :  { %1569 = vrot.lane.b32.xlu0 %v4294_v17, %s4370_s25 }
0x12af   :  { %v1570_v3 = vpop.permute.xlu0 %1569 }
0x12b0   :  { %v4863_v5 = vmul.f32 %v4292_v9, %v1570_v3 }
0x12b2   :  { %v1581_v7 = vsel %vm1577_vm3, %v4863_v5, %v1579_v28 }
0x12b3   :  { %1585 = vrot.lane.b32.xlu0 %v1581_v7, %s4371_s26 }
0x12b7   :  { %1999 = vrot.lane.b32.xlu0 %v1828_v32, %s4371_s26 }
0x12bb   :  { %2021 = vperm.xlu0 %4238, %v2019_v50  }
0x1325   :  { %v1586_v34 = vpop.permute.xlu0 %1585 }
0x1326   :  { %1588 = vst.msk [vmem:[#allocation2] sm:$0x3] %vm29_vm0, %v1586_v34  ;;  %v2244_v34 = vsel %vm2050_vm9, 1, %v4369_v18 }
0x1329   :  { %v2000_v14 = vpop.permute.xlu0 %1999 }
0x132d   :  { %v4906_v37 = vld [vmem:[#allocation2] sm:$0x3] }
0x132e   :  { %4042 = vmatmul.mubr.msk.f32.vlgmr.msra.gmra.mxu0 %vm48_vm1, %v4906_v37 }
0x132f   :  { %4056 = vmatpush3.msra.mxu0 %v4904_v36  ;;  %4063 = vmatprep.mubr.msk.f32.mxu0 %vm4368_vm2, %v4367_v0 }
0x1330   :  { %4057 = vmatprep.subr.mxu0 %v4367_v0 }
0x1331   :  { %4058 = vmatpush3.msra.mxu0 %v4913_v38 }
0x1332   :  { %4059 = vmatprep.subr.mxu0 %v4367_v0 }
0x1333   :  { %4060 = vmatpush3.msra.mxu0 %v4922_v39 }
0x1334   :  { %4061 = vmatprep.subr.mxu0 %v4367_v0 }
0x1335   :  { %4062 = vmatpush3.msra.mxu0 %v4929_v42 }
0x1336   :  { %4064 = vmatmul.mubr.msk.f32.vlgmr.msra.gmra.mxu0 %vm48_vm1, %v1827_v43  ;;  %4077 = vmatprep.subr.mxu0 %v4367_v0  ;;  %v4963_v6 = vpop.permute.xlu0 %2021 }
0x1337   :  { %4078 = vmatpush3.msra.mxu0 %v4904_v36  ;;  %4085 = vmatprep.mubr.msk.f32.mxu0 %vm4368_vm2, %v4367_v0  ;;  %vm2023_vm7 = vcmp.eq.s32.totalorder %v4963_v6, 1 }
0x1338   :  { %4079 = vmatprep.subr.mxu0 %v4367_v0 }
0x1339   :  { %4080 = vmatpush3.msra.mxu0 %v4913_v38 }
0x133a   :  { %4081 = vmatprep.subr.mxu0 %v4367_v0 }
0x133b   :  { %4082 = vmatpush3.msra.mxu0 %v4922_v39 }
0x133c   :  { %4083 = vmatprep.subr.mxu0 %v4367_v0 }
0x133d   :  { %4084 = vmatpush3.msra.mxu0 %v4929_v42 }
0x133e   :  { %4099 = vmatprep.subr.mxu0 %v4367_v0 }
0x13ee   :  { %v4952_v51 = vpop.f32.mrf.mxu0 }
0x13f0   :  { %v4043_v2 = vpop.f32.mrf.mxu0 }
0x13f6   :  { %v1907_v53 = vpop.f32.mrf.mxu0 }
0x13f7   :  { %v1981_v55 = vadd.f32 %v1980_v46, %v1907_v53  ;;  %v2205_v46 = vpop.f32.mrf.mxu1 }
0x13f8   :  { %v4065_v57 = vpop.f32.mrf.mxu0 }
0x13f9   :  { %v1990_v58 = vadd.f32 %v4957_v52, %v1981_v55  ;;  %v4098_v47 = vpop.f32.mrf.mxu1 }
0x13fb   :  { %4295 = vtanh.f32 %v1990_v58  ;;  %v3671_v60 = vmul.f32 -1.442695, %v1990_v58 }
0x13fd   :  { %4297 = vpow2.f32 %v3671_v60 }
0x1408   :  { %v4296_v59 = vpop.eup %4295 }
0x1409   :  { %2004 = vrot.lane.b32.xlu1 %v4296_v59, %s4370_s25 }
0x140a   :  { %v4298_v62 = vpop.eup %4297 }
0x140b   :  { %v1994_v63 = vadd.f32 1.0, %v4298_v62 }
0x140d   :  { %4299 = vrcp.f32 %v1994_v63 }
0x141a   :  { %v4300_v9 = vpop.eup %4299 }
0x141b   :  { %v2002_v15 = vmul.f32 %v4300_v9, %v2000_v14 }
0x147b   :  { %v2005_v10 = vpop.permute.xlu1 %2004 }
0x147c   :  { %v2007_v11 = vmul.f32 %v4300_v9, %v2005_v10 }
0x147e   :  { %2009 = vrot.lane.b32.xlu1 %v2007_v11, %s4371_s26 }
0x14f0   :  { %v2010_v17 = vpop.permute.xlu1 %2009 }
0x14f1   :  { %v2012_v19 = vadd.f32 %v2010_v17, %v2002_v15 }
0x14f3   :  { %4301 = vtanh.f32 %v2012_v19  ;;  %v2028_v22 = vsel %vm2023_vm7, %v2012_v19, %v2000_v14 }
0x1500   :  { %v4302_v4 = vpop.eup %4301 }
0x1501   :  { %2015 = vrot.lane.b32.xlu1 %v4302_v4, %s4370_s25 }
0x1505   :  { %2024 = vrot.lane.b32.xlu1 %v1827_v43, %s4372_s29 }
0x1509   :  { %2036 = vrot.lane.b32.xlu1 %v2028_v22, %s4372_s29 }
0x1573   :  { %v2016_v23 = vpop.permute.xlu1 %2015 }
0x1574   :  { %v4984_v24 = vmul.f32 %v4300_v9, %v2016_v23 }
0x1576   :  { %v2029_v33 = vsel %vm2023_vm7, %v4984_v24, 0.0 }
0x1577   :  { %v2025_v3 = vpop.permute.xlu1 %2024 }
0x1578   :  { %v2027_v28 = vsel %vm2023_vm7, %v4984_v24, %v2025_v3  ;;  %v3681_v3 = vld [vmem:[%s5461_s0 + $0xa] sm:$0x3] }
0x1579   :  { %2031 = vrot.lane.b32.xlu0 %v2027_v28, %s4371_s26  ;;  %v2468_v28 = vsel %vm2274_vm13, 1, %v4369_v18  ;;  %4119 = vmatmul.mubr.msk.f32.vlgmr.msra.gmra.mxu1 %vm48_vm1, %v3681_v3  ;;  %v3688_v3 = vld [vmem:[%s5461_s0 + $0x8] sm:$0x3] }
0x157a   :  { %4133 = vmatpush3.msra.mxu1 %v4845_v25  ;;  %4140 = vmatprep.mubr.msk.f32.mxu1 %vm4368_vm2, %v4367_v0 }
0x157b   :  { %v2037_v7 = vpop.permute.xlu1 %2036  ;;  %4134 = vmatprep.subr.mxu1 %v4367_v0 }
0x157c   :  { %2039 = vst.msk [vmem:[#allocation5] sm:$0x3] %vm29_vm0, %v2037_v7  ;;  %4135 = vmatpush3.msra.mxu1 %v4858_v8 }
0x157d   :  { %4136 = vmatprep.subr.mxu1 %v4367_v0 }
0x157e   :  { %4137 = vmatpush3.msra.mxu1 %v4869_v27 }
0x157f   :  { %4138 = vmatprep.subr.mxu1 %v4367_v0 }
0x1580   :  { %4139 = vmatpush3.msra.mxu1 %v4880_v29 }
0x1581   :  { %4154 = vmatprep.subr.mxu1 %v4367_v0  ;;  %4141 = vmatmul.mubr.msk.f32.vlgmr.msra.gmra.mxu1 %vm48_vm1, %v3688_v3  ;;  %v3694_v3 = vld [vmem:[%s5463_s1 + $0x6] sm:$0x3] }
0x1582   :  { %4155 = vmatpush3.msra.mxu1 %v4845_v25  ;;  %4162 = vmatprep.mubr.msk.f32.mxu1 %vm4368_vm2, %v4367_v0  ;;  %vm2722_vm13 = vcmp.gt.f32.partialorder %v3694_v3, 0.0 }
0x1583   :  { %v2053_v32 = vld [vmem:[#allocation5] sm:$0x3]  ;;  %4156 = vmatprep.subr.mxu1 %v4367_v0 }
0x1584   :  { %2224 = vrot.lane.b32.xlu1 %v2053_v32, %s4371_s26  ;;  %4157 = vmatpush3.msra.mxu1 %v4858_v8 }
0x1585   :  { %4158 = vmatprep.subr.mxu1 %v4367_v0 }
0x1586   :  { %4159 = vmatpush3.msra.mxu1 %v4869_v27 }
0x1587   :  { %4160 = vmatprep.subr.mxu1 %v4367_v0 }
0x1588   :  { %2246 = vperm.xlu1 %4237, %v2244_v34   ;;  %4161 = vmatpush3.msra.mxu1 %v4880_v29 }
0x1589   :  { %4176 = vmatprep.subr.mxu1 %v4367_v0 }
0x15eb   :  { %v2032_v43 = vpop.permute.xlu0 %2031 }
0x15ec   :  { %2034 = vst.msk [vmem:[#allocation4] sm:$0x3] %vm29_vm0, %v2032_v43 }
0x15f3   :  { %v2052_v45 = vld [vmem:[#allocation4] sm:$0x3] }
0x15f4   :  { %4086 = vmatmul.mubr.msk.f32.vlgmr.msra.gmra.mxu0 %vm48_vm1, %v2052_v45  ;;  %2249 = vrot.lane.b32.xlu1 %v2052_v45, %s4372_s29 }
0x15f5   :  { %4100 = vmatpush3.msra.mxu0 %v4904_v36  ;;  %4107 = vmatprep.mubr.msk.f32.mxu0 %vm4368_vm2, %v4367_v0 }
0x15f6   :  { %4101 = vmatprep.subr.mxu0 %v4367_v0  ;;  %v2225_v9 = vpop.permute.xlu1 %2224 }
0x15f7   :  { %4102 = vmatpush3.msra.mxu0 %v4913_v38 }
0x15f8   :  { %4103 = vmatprep.subr.mxu0 %v4367_v0 }
0x15f9   :  { %4104 = vmatpush3.msra.mxu0 %v4922_v39 }
0x15fa   :  { %4105 = vmatprep.subr.mxu0 %v4367_v0 }
0x15fb   :  { %4106 = vmatpush3.msra.mxu0 %v4929_v42 }
0x15fc   :  { %4121 = vmatprep.subr.mxu0 %v4367_v0 }
0x1603   :  { %v5012_v10 = vpop.permute.xlu1 %2246 }
0x1604   :  { %vm2248_vm11 = vcmp.eq.s32.totalorder %v5012_v10, 1 }
0x1639   :  { %v2429_v45 = vpop.f32.mrf.mxu1 }
0x1666   :  { %v2250_v4 = vpop.permute.xlu1 %2249 }
0x16b4   :  { %v2132_v49 = vpop.f32.mrf.mxu0 }
0x16b5   :  { %v2206_v50 = vadd.f32 %v2205_v46, %v2132_v49  ;;  %v4120_v46 = vpop.f32.mrf.mxu1 }
0x16b6   :  { %v4087_v2 = vpop.f32.mrf.mxu0 }
0x16b7   :  { %v2215_v53 = vadd.f32 %v4957_v52, %v2206_v50  ;;  %v2653_v46 = vpop.f32.mrf.mxu1 }
0x16b9   :  { %4303 = vtanh.f32 %v2215_v53  ;;  %v3678_v57 = vmul.f32 -1.442695, %v2215_v53 }
0x16bb   :  { %4305 = vpow2.f32 %v3678_v57 }
0x16c6   :  { %v4304_v55 = vpop.eup %4303 }
0x16c7   :  { %2229 = vrot.lane.b32.xlu0 %v4304_v55, %s4370_s25 }
0x16c8   :  { %v4306_v58 = vpop.eup %4305 }
0x16c9   :  { %v2219_v59 = vadd.f32 1.0, %v4306_v58 }
0x16cb   :  { %4307 = vrcp.f32 %v2219_v59 }
0x16d8   :  { %v4308_v60 = vpop.eup %4307 }
0x16d9   :  { %v2227_v11 = vmul.f32 %v4308_v60, %v2225_v9 }
0x1739   :  { %v2230_v62 = vpop.permute.xlu0 %2229 }
0x173a   :  { %v2232_v63 = vmul.f32 %v4308_v60, %v2230_v62 }
0x173c   :  { %2234 = vrot.lane.b32.xlu0 %v2232_v63, %s4371_s26 }
0x17ae   :  { %v2235_v14 = vpop.permute.xlu0 %2234 }
0x17af   :  { %v2237_v15 = vadd.f32 %v2235_v14, %v2227_v11 }
0x17b1   :  { %4309 = vtanh.f32 %v2237_v15  ;;  %v2253_v17 = vsel %vm2248_vm11, %v2237_v15, %v2225_v9 }
0x17b2   :  { %2261 = vrot.lane.b32.xlu1 %v2253_v17, %s4372_s29 }
0x17be   :  { %v4310_v19 = vpop.eup %4309 }
0x17bf   :  { %2240 = vrot.lane.b32.xlu0 %v4310_v19, %s4370_s25 }
0x1824   :  { %v2262_v22 = vpop.permute.xlu1 %2261 }
0x1825   :  { %2264 = vst.msk [vmem:[#allocation5] sm:$0x3] %vm29_vm0, %v2262_v22 }
0x182c   :  { %v2277_v23 = vld [vmem:[#allocation5] sm:$0x3] }
0x182d   :  { %2448 = vrot.lane.b32.xlu1 %v2277_v23, %s4371_s26 }
0x1831   :  { %2470 = vperm.xlu1 %4237, %v2468_v28   ;;  %v2241_v7 = vpop.permute.xlu0 %2240  ;;  %v2692_v28 = vsel %vm2498_vm5, 1, %v4369_v18 }
0x1832   :  { %v5034_v30 = vmul.f32 %v4308_v60, %v2241_v7 }
0x1834   :  { %v2252_v32 = vsel %vm2248_vm11, %v5034_v30, %v2250_v4  ;;  %v2254_v61 = vsel %vm2248_vm11, %v5034_v30, 0.0 }
0x1835   :  { %2256 = vrot.lane.b32.xlu0 %v2252_v32, %s4371_s26 }
0x189f   :  { %v2449_v63 = vpop.permute.xlu1 %2448 }
0x18a7   :  { %v2257_v34 = vpop.permute.xlu0 %2256 }
0x18a8   :  { %2259 = vst.msk [vmem:[#allocation4] sm:$0x3] %vm29_vm0, %v2257_v34 }
0x18ac   :  { %v5061_v9 = vpop.permute.xlu1 %2470 }
0x18ad   :  { %vm2472_vm15 = vcmp.eq.s32.totalorder %v5061_v9, 1 }
0x18af   :  { %v2276_v43 = vld [vmem:[#allocation4] sm:$0x3] }
0x18b0   :  { %2473 = vrot.lane.b32.xlu1 %v2276_v43, %s4372_s29  ;;  %4108 = vmatmul.mubr.msk.f32.vlgmr.msra.gmra.mxu0 %vm48_vm1, %v2276_v43 }
0x18b1   :  { %4122 = vmatpush3.msra.mxu0 %v4904_v36  ;;  %4129 = vmatprep.mubr.msk.f32.mxu0 %vm4368_vm2, %v4367_v0 }
0x18b2   :  { %4123 = vmatprep.subr.mxu0 %v4367_v0 }
0x18b3   :  { %4124 = vmatpush3.msra.mxu0 %v4913_v38 }
0x18b4   :  { %4125 = vmatprep.subr.mxu0 %v4367_v0 }
0x18b5   :  { %4126 = vmatpush3.msra.mxu0 %v4922_v39 }
0x18b6   :  { %4127 = vmatprep.subr.mxu0 %v4367_v0 }
0x18b7   :  { %4128 = vmatpush3.msra.mxu0 %v4929_v42 }
0x18b8   :  { %4143 = vmatprep.subr.mxu0 %v4367_v0 }
0x1922   :  { %v2474_v4 = vpop.permute.xlu1 %2473 }
0x1970   :  { %v2356_v47 = vpop.f32.mrf.mxu0 }
0x1971   :  { %v2430_v49 = vadd.f32 %v2429_v45, %v2356_v47  ;;  %v4142_v47 = vpop.f32.mrf.mxu1 }
0x1972   :  { %v4109_v50 = vpop.f32.mrf.mxu0 }
0x1973   :  { %v2439_v2 = vadd.f32 %v4957_v52, %v2430_v49 }
0x1975   :  { %4311 = vtanh.f32 %v2439_v2  ;;  %v3685_v55 = vmul.f32 -1.442695, %v2439_v2 }
0x1977   :  { %4313 = vpow2.f32 %v3685_v55 }
0x1982   :  { %v4312_v53 = vpop.eup %4311 }
0x1983   :  { %2453 = vrot.lane.b32.xlu0 %v4312_v53, %s4370_s25 }
0x1984   :  { %v4314_v57 = vpop.eup %4313 }
0x1985   :  { %v2443_v58 = vadd.f32 1.0, %v4314_v57 }
0x1987   :  { %4315 = vrcp.f32 %v2443_v58 }
0x1994   :  { %v4316_v59 = vpop.eup %4315 }
0x1995   :  { %v2451_v11 = vmul.f32 %v4316_v59, %v2449_v63 }
0x19f5   :  { %v2454_v60 = vpop.permute.xlu0 %2453 }
0x19f6   :  { %v2456_v62 = vmul.f32 %v4316_v59, %v2454_v60 }
0x19f8   :  { %2458 = vrot.lane.b32.xlu0 %v2456_v62, %s4371_s26 }
0x1a6a   :  { %v2459_v14 = vpop.permute.xlu0 %2458 }
0x1a6b   :  { %v2461_v15 = vadd.f32 %v2459_v14, %v2451_v11 }
0x1a6d   :  { %4317 = vtanh.f32 %v2461_v15  ;;  %v2477_v17 = vsel %vm2472_vm15, %v2461_v15, %v2449_v63 }
0x1a6e   :  { %2485 = vrot.lane.b32.xlu1 %v2477_v17, %s4372_s29 }
0x1a7a   :  { %v4318_v19 = vpop.eup %4317 }
0x1a7b   :  { %2464 = vrot.lane.b32.xlu0 %v4318_v19, %s4370_s25 }
0x1ae0   :  { %v2486_v22 = vpop.permute.xlu1 %2485 }
0x1ae1   :  { %2488 = vst.msk [vmem:[#allocation5] sm:$0x3] %vm29_vm0, %v2486_v22 }
0x1ae8   :  { %v2501_v23 = vld [vmem:[#allocation5] sm:$0x3] }
0x1ae9   :  { %2672 = vrot.lane.b32.xlu1 %v2501_v23, %s4371_s26 }
0x1aed   :  { %2694 = vperm.xlu1 %4237, %v2692_v28   ;;  %v2465_v7 = vpop.permute.xlu0 %2464 }
0x1aee   :  { %v5083_v32 = vmul.f32 %v4316_v59, %v2465_v7  ;;  %v3695_v7 = vld [vmem:[%s5461_s0 + $0x6] sm:$0x3] }
0x1aef   :  { %4163 = vmatmul.mubr.msk.f32.vlgmr.msra.gmra.mxu1 %vm48_vm1, %v3695_v7 }
0x1af0   :  { %v2476_v34 = vsel %vm2472_vm15, %v5083_v32, %v2474_v4  ;;  %4177 = vmatpush3.msra.mxu1 %v4845_v25  ;;  %4184 = vmatprep.mubr.msk.f32.mxu1 %vm4368_vm2, %v4367_v0 }
0x1af1   :  { %2480 = vrot.lane.b32.xlu0 %v2476_v34, %s4371_s26  ;;  %v2916_v34 = vsel %vm2722_vm13, 1, %v4369_v18  ;;  %4178 = vmatprep.subr.mxu1 %v4367_v0 }
0x1af2   :  { %4179 = vmatpush3.msra.mxu1 %v4858_v8 }
0x1af3   :  { %4180 = vmatprep.subr.mxu1 %v4367_v0 }
0x1af4   :  { %4181 = vmatpush3.msra.mxu1 %v4869_v27 }
0x1af5   :  { %4182 = vmatprep.subr.mxu1 %v4367_v0 }
0x1af6   :  { %4183 = vmatpush3.msra.mxu1 %v4880_v29 }
0x1af7   :  { %4198 = vmatprep.subr.mxu1 %v4367_v0 }
0x1b5b   :  { %v2673_v11 = vpop.permute.xlu1 %2672 }
0x1b63   :  { %v2481_v43 = vpop.permute.xlu0 %2480 }
0x1b64   :  { %2483 = vst.msk [vmem:[#allocation4] sm:$0x3] %vm29_vm0, %v2481_v43 }
0x1b68   :  { %v5110_v14 = vpop.permute.xlu1 %2694 }
0x1b69   :  { %vm5468_vm9 = vcmp.eq.s32.totalorder %v5110_v14, 1 }
0x1b6b   :  { %v2500_v45 = vld [vmem:[#allocation4] sm:$0x3] }
0x1b6c   :  { %2697 = vrot.lane.b32.xlu1 %v2500_v45, %s4372_s29  ;;  %4130 = vmatmul.mubr.msk.f32.vlgmr.msra.gmra.mxu0 %vm48_vm1, %v2500_v45 }
0x1b6d   :  { %4144 = vmatpush3.msra.mxu0 %v4904_v36  ;;  %4151 = vmatprep.mubr.msk.f32.mxu0 %vm4368_vm2, %v4367_v0 }
0x1b6e   :  { %4145 = vmatprep.subr.mxu0 %v4367_v0 }
0x1b6f   :  { %4146 = vmatpush3.msra.mxu0 %v4913_v38 }
0x1b70   :  { %4147 = vmatprep.subr.mxu0 %v4367_v0 }
0x1b71   :  { %4148 = vmatpush3.msra.mxu0 %v4922_v39 }
0x1b72   :  { %4149 = vmatprep.subr.mxu0 %v4367_v0 }
0x1b73   :  { %4150 = vmatpush3.msra.mxu0 %v4929_v42 }
0x1b74   :  { %4165 = vmatprep.subr.mxu0 %v4367_v0 }
0x1bde   :  { %v2698_v1 = vpop.permute.xlu1 %2697 }
0x1c2c   :  { %v2580_v49 = vpop.f32.mrf.mxu0 }
0x1c2d   :  { %v2654_v50 = vadd.f32 %v2653_v46, %v2580_v49 }
0x1c2e   :  { %v4131_v2 = vpop.f32.mrf.mxu0 }
0x1c2f   :  { %v2663_v53 = vadd.f32 %v4957_v52, %v2654_v50  ;;  %v2877_v50 = vpop.f32.mrf.mxu1 }
0x1c31   :  { %4319 = vtanh.f32 %v2663_v53  ;;  %v3692_v57 = vmul.f32 -1.442695, %v2663_v53  ;;  %v4164_v2 = vpop.f32.mrf.mxu1 }
0x1c33   :  { %4321 = vpow2.f32 %v3692_v57 }
0x1c3e   :  { %v4320_v55 = vpop.eup %4319 }
0x1c3f   :  { %2677 = vrot.lane.b32.xlu0 %v4320_v55, %s4370_s25 }
0x1c40   :  { %v4322_v58 = vpop.eup %4321 }
0x1c41   :  { %v2667_v59 = vadd.f32 1.0, %v4322_v58 }
0x1c43   :  { %4323 = vrcp.f32 %v2667_v59 }
0x1c50   :  { %v4324_v60 = vpop.eup %4323 }
0x1c51   :  { %v2675_v15 = vmul.f32 %v4324_v60, %v2673_v11 }
0x1cb1   :  { %v2678_v62 = vpop.permute.xlu0 %2677 }
0x1cb2   :  { %v2680_v63 = vmul.f32 %v4324_v60, %v2678_v62 }
0x1cb4   :  { %2682 = vrot.lane.b32.xlu0 %v2680_v63, %s4371_s26 }
0x1d26   :  { %v2683_v17 = vpop.permute.xlu0 %2682 }
0x1d27   :  { %v2685_v19 = vadd.f32 %v2683_v17, %v2675_v15 }
0x1d29   :  { %4325 = vtanh.f32 %v2685_v19  ;;  %v2701_v4 = vsel %vm5468_vm9, %v2685_v19, %v2673_v11 }
0x1d2a   :  { %2709 = vrot.lane.b32.xlu1 %v2701_v4, %s4372_s29 }
0x1d36   :  { %v4326_v22 = vpop.eup %4325 }
0x1d37   :  { %2688 = vrot.lane.b32.xlu0 %v4326_v22, %s4370_s25 }
0x1d9c   :  { %v2710_v23 = vpop.permute.xlu1 %2709 }
0x1d9d   :  { %2712 = vst.msk [vmem:[#allocation5] sm:$0x3] %vm29_vm0, %v2710_v23 }
0x1da4   :  { %v2725_v28 = vld [vmem:[#allocation5] sm:$0x3] }
0x1da5   :  { %2896 = vrot.lane.b32.xlu1 %v2725_v28, %s4371_s26 }
0x1da9   :  { %2918 = vperm.xlu1 %4237, %v2916_v34   ;;  %v2689_v43 = vpop.permute.xlu0 %2688 }
0x1daa   :  { %v5132_v45 = vmul.f32 %v4324_v60, %v2689_v43  ;;  %v3701_v43 = vld [vmem:[%s5463_s1 + $0x4] sm:$0x3] }
0x1dab   :  { %vm2946_vm13 = vcmp.gt.f32.partialorder %v3701_v43, 0.0  ;;  %v3709_v43 = vld [vmem:[%s5461_s0 + $0x2] sm:$0x3] }
0x1dac   :  { %v2700_v46 = vsel %vm5468_vm9, %v5132_v45, %v2698_v1 }
0x1dad   :  { %2704 = vrot.lane.b32.xlu0 %v2700_v46, %s4371_s26 }
0x1e17   :  { %v2897_v19 = vpop.permute.xlu1 %2896 }
0x1e1f   :  { %v2705_v47 = vpop.permute.xlu0 %2704 }
0x1e20   :  { %2707 = vst.msk [vmem:[#allocation4] sm:$0x3] %vm29_vm0, %v2705_v47  ;;  %v3702_v47 = vld [vmem:[%s5461_s0 + $0x4] sm:$0x3] }
0x1e21   :  { %4185 = vmatmul.mubr.msk.f32.vlgmr.msra.gmra.mxu1 %vm48_vm1, %v3702_v47 }
0x1e22   :  { %4199 = vmatpush3.msra.mxu1 %v4845_v25  ;;  %4206 = vmatprep.mubr.msk.f32.mxu1 %vm4368_vm2, %v4367_v0 }
0x1e23   :  { %4200 = vmatprep.subr.mxu1 %v4367_v0 }
0x1e24   :  { %v5159_v4 = vpop.permute.xlu1 %2918  ;;  %4201 = vmatpush3.msra.mxu1 %v4858_v8 }
0x1e25   :  { %vm2920_vm5 = vcmp.eq.s32.totalorder %v5159_v4, 1  ;;  %4202 = vmatprep.subr.mxu1 %v4367_v0 }
0x1e26   :  { %4203 = vmatpush3.msra.mxu1 %v4869_v27 }
0x1e27   :  { %v2724_v49 = vld [vmem:[#allocation4] sm:$0x3]  ;;  %4204 = vmatprep.subr.mxu1 %v4367_v0 }
0x1e28   :  { %2921 = vrot.lane.b32.xlu1 %v2724_v49, %s4372_s29  ;;  %4152 = vmatmul.mubr.msk.f32.vlgmr.msra.gmra.mxu0 %vm48_vm1, %v2724_v49  ;;  %v3140_v49 = vsel %vm2946_vm13, 1, %v4369_v18 }
0x1e29   :  { %4166 = vmatpush3.msra.mxu0 %v4904_v36  ;;  %4173 = vmatprep.mubr.msk.f32.mxu0 %vm4368_vm2, %v4367_v0 }
0x1e2a   :  { %4167 = vmatprep.subr.mxu0 %v4367_v0  ;;  %4205 = vmatpush3.msra.mxu1 %v4880_v29 }
0x1e2b   :  { %4168 = vmatpush3.msra.mxu0 %v4913_v38  ;;  %4220 = vmatprep.subr.mxu1 %v4367_v0 }
0x1e2c   :  { %4169 = vmatprep.subr.mxu0 %v4367_v0  ;;  %4207 = vmatmul.mubr.msk.f32.vlgmr.msra.gmra.mxu1 %vm48_vm1, %v3709_v43 }
0x1e2d   :  { %4170 = vmatpush3.msra.mxu0 %v4922_v39  ;;  %4228 = vmatprep.mubr.msk.f32.mxu1 %vm4368_vm2, %v4367_v0 }
0x1e2e   :  { %4171 = vmatprep.subr.mxu0 %v4367_v0 }
0x1e2f   :  { %4172 = vmatpush3.msra.mxu0 %v4929_v42 }
0x1e30   :  { %4187 = vmatprep.subr.mxu0 %v4367_v0 }
0x1e9a   :  { %v2922_v7 = vpop.permute.xlu1 %2921 }
0x1ee1   :  { %v3101_v27 = vpop.f32.mrf.mxu1 }
0x1ee3   :  { %v4186_v29 = vpop.f32.mrf.mxu1 }
0x1ee8   :  { %v2804_v53 = vpop.f32.mrf.mxu0 }
0x1ee9   :  { %v2878_v55 = vadd.f32 %v2877_v50, %v2804_v53 }
0x1eea   :  { %v4153_v57 = vpop.f32.mrf.mxu0 }
0x1eeb   :  { %v2887_v58 = vadd.f32 %v4957_v52, %v2878_v55 }
0x1eed   :  { %4327 = vtanh.f32 %v2887_v58  ;;  %v3699_v60 = vmul.f32 -1.442695, %v2887_v58 }
0x1eef   :  { %4329 = vpow2.f32 %v3699_v60 }
0x1efa   :  { %v4328_v59 = vpop.eup %4327 }
0x1efb   :  { %2901 = vrot.lane.b32.xlu0 %v4328_v59, %s4370_s25 }
0x1efc   :  { %v4330_v62 = vpop.eup %4329 }
0x1efd   :  { %v2891_v63 = vadd.f32 1.0, %v4330_v62 }
0x1eff   :  { %4331 = vrcp.f32 %v2891_v63 }
0x1f0c   :  { %v4332_v11 = vpop.eup %4331 }
0x1f0d   :  { %v2899_v22 = vmul.f32 %v4332_v11, %v2897_v19 }
0x1f6d   :  { %v2902_v15 = vpop.permute.xlu0 %2901 }
0x1f6e   :  { %v2904_v17 = vmul.f32 %v4332_v11, %v2902_v15 }
0x1f70   :  { %2906 = vrot.lane.b32.xlu0 %v2904_v17, %s4371_s26 }
0x1fe2   :  { %v2907_v1 = vpop.permute.xlu0 %2906 }
0x1fe3   :  { %v2909_v23 = vadd.f32 %v2907_v1, %v2899_v22 }
0x1fe5   :  { %4333 = vtanh.f32 %v2909_v23  ;;  %v2925_v3 = vsel %vm2920_vm5, %v2909_v23, %v2897_v19 }
0x1fe6   :  { %2933 = vrot.lane.b32.xlu1 %v2925_v3, %s4372_s29 }
0x1ff2   :  { %v4334_v28 = vpop.eup %4333 }
0x1ff3   :  { %2912 = vrot.lane.b32.xlu0 %v4334_v28, %s4370_s25 }
0x2058   :  { %v2934_v34 = vpop.permute.xlu1 %2933 }
0x2059   :  { %2936 = vst.msk [vmem:[#allocation5] sm:$0x3] %vm29_vm0, %v2934_v34 }
0x2060   :  { %v2949_v46 = vld [vmem:[#allocation5] sm:$0x3] }
0x2061   :  { %3120 = vrot.lane.b32.xlu1 %v2949_v46, %s4371_s26 }
0x2065   :  { %3142 = vperm.xlu1 %4237, %v3140_v49   ;;  %v2913_v50 = vpop.permute.xlu0 %2912 }
0x2066   :  { %v5181_v2 = vmul.f32 %v4332_v11, %v2913_v50 }
0x2068   :  { %v2924_v53 = vsel %vm2920_vm5, %v5181_v2, %v2922_v7  ;;  %v3708_v7 = vld [vmem:[%s5463_s1 + $0x2] sm:$0x3]  ;;  %v2926_v41 = vsel %vm2920_vm5, %v5181_v2, 0.0 }
0x2069   :  { %2928 = vrot.lane.b32.xlu0 %v2924_v53, %s4371_s26  ;;  %vm3170_vm9 = vcmp.gt.f32.partialorder %v3708_v7, 0.0  ;;  %v1759_v7 = vadd.f32 %v4946_v44, %v4952_v51  ;;  %v3400_v44 = vld [vmem:[%s5464_s5 + $0x10] sm:$0xff] }
0x206a   :  { %v3364_v46 = vsel %vm3170_vm9, 1, %v4369_v18  ;;  %v3404_v51 = vld [vmem:[%s5465_s6 + $0x10] sm:$0xff] }
0x20d3   :  { %v3121_v11 = vpop.permute.xlu1 %3120 }
0x20db   :  { %v2929_v25 = vpop.permute.xlu0 %2928 }
0x20dc   :  { %2931 = vst.msk [vmem:[#allocation4] sm:$0x3] %vm29_vm0, %v2929_v25 }
0x20e0   :  { %v5208_v15 = vpop.permute.xlu1 %3142 }
0x20e1   :  { %vm5469_vm13 = vcmp.eq.s32.totalorder %v5208_v15, 1 }
0x20e3   :  { %v2948_v8 = vld [vmem:[#allocation4] sm:$0x3] }
0x20e4   :  { %3145 = vrot.lane.b32.xlu1 %v2948_v8, %s4372_s29  ;;  %4174 = vmatmul.mubr.msk.f32.vlgmr.msra.gmra.mxu0 %vm48_vm1, %v2948_v8  ;;  %v1582_v8 = vsel %vm1577_vm3, %v4812_v12, %v4809_v13 }
0x20e5   :  { %4188 = vmatpush3.msra.mxu0 %v4904_v36  ;;  %4195 = vmatprep.mubr.msk.f32.mxu0 %vm4368_vm2, %v4367_v0 }
0x20e6   :  { %4189 = vmatprep.subr.mxu0 %v4367_v0 }
0x20e7   :  { %4190 = vmatpush3.msra.mxu0 %v4913_v38 }
0x20e8   :  { %4191 = vmatprep.subr.mxu0 %v4367_v0 }
0x20e9   :  { %4192 = vmatpush3.msra.mxu0 %v4922_v39 }
0x20ea   :  { %4193 = vmatprep.subr.mxu0 %v4367_v0 }
0x20eb   :  { %4194 = vmatpush3.msra.mxu0 %v4929_v42 }
0x20ec   :  { %4209 = vmatprep.subr.mxu0 %v4367_v0 }
0x2156   :  { %v3146_v3 = vpop.permute.xlu1 %3145 }
0x21a4   :  { %v3028_v36 = vpop.f32.mrf.mxu0 }
0x21a5   :  { %v3102_v55 = vadd.f32 %v3101_v27, %v3028_v36  ;;  %v3325_v27 = vpop.f32.mrf.mxu1 }
0x21a6   :  { %v4175_v57 = vpop.f32.mrf.mxu0 }
0x21a7   :  { %v3111_v58 = vadd.f32 %v4957_v52, %v3102_v55  ;;  %v4208_v29 = vpop.f32.mrf.mxu1 }
0x21a8   :  { %v3398_v29 = vld [vmem:[%s5464_s5] sm:$0xff] }
0x21a9   :  { %4335 = vtanh.f32 %v3111_v58  ;;  %v3706_v38 = vmul.f32 -1.442695, %v3111_v58 }
0x21ab   :  { %4337 = vpow2.f32 %v3706_v38 }
0x21b6   :  { %v4336_v59 = vpop.eup %4335 }
0x21b7   :  { %3125 = vrot.lane.b32.xlu0 %v4336_v59, %s4370_s25 }
0x21b8   :  { %v4338_v39 = vpop.eup %4337 }
0x21b9   :  { %v3115_v60 = vadd.f32 1.0, %v4338_v39 }
0x21bb   :  { %4339 = vrcp.f32 %v3115_v60 }
0x21c8   :  { %v4340_v62 = vpop.eup %4339 }
0x21c9   :  { %v3123_v17 = vmul.f32 %v4340_v62, %v3121_v11 }
0x2229   :  { %v3126_v42 = vpop.permute.xlu0 %3125 }
0x222a   :  { %v3128_v63 = vmul.f32 %v4340_v62, %v3126_v42 }
0x222c   :  { %3130 = vrot.lane.b32.xlu0 %v3128_v63, %s4371_s26 }
0x229e   :  { %v3131_v19 = vpop.permute.xlu0 %3130 }
0x229f   :  { %v3133_v22 = vadd.f32 %v3131_v19, %v3123_v17 }
0x22a1   :  { %4341 = vtanh.f32 %v3133_v22  ;;  %v3149_v1 = vsel %vm5469_vm13, %v3133_v22, %v3121_v11 }
0x22a2   :  { %3157 = vrot.lane.b32.xlu1 %v3149_v1, %s4372_s29 }
0x22ae   :  { %v4342_v23 = vpop.eup %4341 }
0x22af   :  { %3136 = vrot.lane.b32.xlu0 %v4342_v23, %s4370_s25 }
0x2314   :  { %v3158_v28 = vpop.permute.xlu1 %3157 }
0x2315   :  { %3160 = vst.msk [vmem:[#allocation5] sm:$0x3] %vm29_vm0, %v3158_v28  ;;  %v3401_v28 = vld [vmem:[%s5464_s5 + $0x18] sm:$0xff] }
0x2316   :  { %4221 = vmatpush3.msra.mxu1 %v3401_v28 }
0x2317   :  { %4222 = vmatprep.subr.mxu1 %v4367_v0 }
0x2318   :  { %4223 = vmatpush3.msra.mxu1 %v3400_v44 }
0x2319   :  { %4224 = vmatprep.subr.mxu1 %v4367_v0 }
0x231c   :  { %v3173_v34 = vld [vmem:[#allocation5] sm:$0x3] }
0x231d   :  { %3344 = vrot.lane.b32.xlu1 %v3173_v34, %s4371_s26  ;;  %v3664_v34 = vld [vmem:[%s5462_s4] ss:$0 sm:$0xff] }
0x2321   :  { %3366 = vperm.xlu1 %4237, %v3364_v46   ;;  %v3137_v47 = vpop.permute.xlu0 %3136  ;;  %v5267_v46 = vadd.f32 %v3664_v34, %v1759_v7 }
0x2322   :  { %v5227_v49 = vmul.f32 %v4340_v62, %v3137_v47  ;;  %v3660_v47 = vld [vmem:[%s5463_s1 + $0xe] sm:$0x3] }
0x2323   :  { %vm1602_vm9 = vcmp.gt.f32.partialorder %v3660_v47, 0.0 }
0x2324   :  { %v3148_v50 = vsel %vm5469_vm13, %v5227_v49, %v3146_v3 }
0x2325   :  { %3152 = vrot.lane.b32.xlu0 %v3148_v50, %s4371_s26  ;;  %v3405_v50 = vld [vmem:[%s5465_s6 + $0x18] sm:$0xff] }
0x238f   :  { %v3345_v36 = vpop.permute.xlu1 %3344 }
0x2397   :  { %v3153_v53 = vpop.permute.xlu0 %3152 }
0x2398   :  { %3155 = vst.msk [vmem:[#allocation4] sm:$0x3] %vm29_vm0, %v3153_v53  ;;  %v3399_v53 = vld [vmem:[%s5464_s5 + $0x8] sm:$0xff] }
0x2399   :  { %4225 = vmatpush3.msra.mxu1 %v3399_v53 }
0x239a   :  { %4226 = vmatprep.subr.mxu1 %v4367_v0 }
0x239b   :  { %4227 = vmatpush3.msra.mxu1 %v3398_v29 }
0x239c   :  { %v5243_v55 = vpop.permute.xlu1 %3366 }
0x239f   :  { %v3172_v25 = vld [vmem:[#allocation4] sm:$0x3] }
0x23a0   :  { %3369 = vrot.lane.b32.xlu1 %v3172_v25, %s4372_s29  ;;  %4196 = vmatmul.mubr.msk.f32.vlgmr.msra.gmra.mxu0 %vm48_vm1, %v3172_v25  ;;  %v3393_v25 = vld [vmem:[%s5463_s1] sm:$0x3] }
0x23a1   :  { %4217 = vmatprep.mubr.msk.f32.mxu0 %vm4368_vm2, %v4367_v0  ;;  %vm3368_vm2 = vcmp.eq.s32.totalorder %v5243_v55, 1  ;;  %4210 = vmatpush3.msra.mxu0 %v3405_v50  ;;  %vm3394_vm13 = vcmp.gt.f32.partialorder %v3393_v25, 0.0 }
0x23a2   :  { %4211 = vmatprep.subr.mxu0 %v4367_v0 }
0x23a3   :  { %4212 = vmatpush3.msra.mxu0 %v3404_v51 }
0x23a4   :  { %1590 = vrot.lane.b32.xlu1 %v1582_v8, %s4372_s29  ;;  %4213 = vmatprep.subr.mxu0 %v4367_v0 }
0x2412   :  { %v5245_v57 = vpop.permute.xlu1 %3369 }
0x2416   :  { %v1591_v58 = vpop.permute.xlu1 %1590 }
0x2417   :  { %1593 = vst.msk [vmem:[#allocation3] sm:$0x3] %vm29_vm0, %v1591_v58  ;;  %v3402_v58 = vld [vmem:[%s5465_s6] sm:$0xff] }
0x241e   :  { %v1606_v23 = vld [vmem:[#allocation3] sm:$0x3] }
0x2460   :  { %v3252_v59 = vpop.f32.mrf.mxu0 }
0x2461   :  { %v3326_v38 = vadd.f32 %v3325_v27, %v3252_v59  ;;  %v3403_v27 = vld [vmem:[%s5465_s6 + $0x8] sm:$0xff]  ;;  %v1797_v59 = vsel %vm1602_vm9, 1, %v4369_v18 }
0x2462   :  { %v4197_v39 = vpop.f32.mrf.mxu0  ;;  %4214 = vmatpush3.msra.mxu0 %v3403_v27 }
0x2463   :  { %v3335_v60 = vadd.f32 %v4957_v52, %v3326_v38  ;;  %4215 = vmatprep.subr.mxu0 %v4367_v0  ;;  %v240_v0 = vsel %vm234_vm4, %v4548_v40, 0.0  ;;  %v2478_v40 = vsel %vm2472_vm15, %v5083_v32, 0.0 }
0x2464   :  { %4216 = vmatpush3.msra.mxu0 %v3402_v58 }
0x2465   :  { %4343 = vtanh.f32 %v3335_v60  ;;  %v3713_v13 = vmul.f32 -1.442695, %v3335_v60  ;;  %v3588_v60 = vsel %vm3394_vm13, 1, %v4369_v18  ;;  %v687_v18 = vsel %vm681_vm8, %v4649_v54, 0.0 }
0x2467   :  { %4345 = vpow2.f32 %v3713_v13 }
0x2472   :  { %v4344_v62 = vpop.eup %4343 }
0x2473   :  { %3349 = vrot.lane.b32.xlu0 %v4344_v62, %s4370_s25 }
0x2474   :  { %v4346_v12 = vpop.eup %4345 }
0x2475   :  { %v3339_v42 = vadd.f32 1.0, %v4346_v12 }
0x2477   :  { %4347 = vrcp.f32 %v3339_v42 }
0x2484   :  { %v4348_v63 = vpop.eup %4347 }
0x2485   :  { %v3347_v19 = vmul.f32 %v4348_v63, %v3345_v36 }
0x24e5   :  { %v3350_v11 = vpop.permute.xlu0 %3349 }
0x24e6   :  { %v3352_v17 = vmul.f32 %v4348_v63, %v3350_v11 }
0x24e8   :  { %3354 = vrot.lane.b32.xlu0 %v3352_v17, %s4371_s26  ;;  %v3717_v17 = vld [vmem:[%s5466_s7] ss:$0 sm:$0xff] }
0x255a   :  { %v3355_v22 = vpop.permute.xlu0 %3354 }
0x255b   :  { %v3357_v1 = vadd.f32 %v3355_v22, %v3347_v19 }
0x255d   :  { %4349 = vtanh.f32 %v3357_v1  ;;  %v3373_v52 = vsel %vm3368_vm2, %v3357_v1, %v3345_v36  ;;  %v3395_v36 = vld [vmem:[%s5461_s0] sm:$0x3] }
0x255e   :  { %3381 = vrot.lane.b32.xlu1 %v3373_v52, %s4372_s29  ;;  %4351 = vtanh.f32 %v5267_v46  ;;  %4229 = vmatmul.mubr.msk.f32.vlgmr.msra.gmra.mxu1 %vm48_vm1, %v3395_v36 }
0x2562   :  { %1777 = vrot.lane.b32.xlu1 %v1606_v23, %s4371_s26 }
0x256a   :  { %v4350_v3 = vpop.eup %4349 }
0x256b   :  { %3360 = vrot.lane.b32.xlu0 %v4350_v3, %s4370_s25  ;;  %v4352_v13 = vpop.eup %4351 }
0x25d0   :  { %v3382_v43 = vpop.permute.xlu1 %3381 }
0x25d1   :  { %3384 = vst.msk [vmem:[#allocation5] sm:$0x3] %vm29_vm0, %v3382_v43 }
0x25d4   :  { %v1778_v56 = vpop.permute.xlu1 %1777 }
0x25d8   :  { %v3397_v8 = vld [vmem:[#allocation5] sm:$0x3] }
0x25d9   :  { %3568 = vrot.lane.b32.xlu1 %v3397_v8, %s4371_s26 }
0x25dd   :  { %1799 = vperm.xlu1 %4237, %v1797_v59   ;;  %v3361_v38 = vpop.permute.xlu0 %3360 }
0x25de   :  { %v3363_v39 = vmul.f32 %v4348_v63, %v3361_v38  ;;  %v3665_v63 = vmul.f32 -1.442695, %v5267_v46 }
0x25e0   :  { %v3372_v62 = vsel %vm3368_vm2, %v3363_v39, %v5245_v57  ;;  %v1135_v57 = vsel %vm1129_vm12, %v4747_v16, 0.0  ;;  %v3374_v54 = vsel %vm3368_vm2, %v3363_v39, 0.0  ;;  %4353 = vpow2.f32 %v3665_v63 }
0x25e1   :  { %3590 = vperm.xlu1 %4237, %v3588_v60   ;;  %3376 = vrot.lane.b32.xlu0 %v3372_v62, %s4371_s26  ;;  %vm2047_vm12 = vcmask 517120  }
0x25e5   :  { %1802 = vrot.lane.b32.xlu1 %v4906_v37, %s4372_s29  ;;  %1782 = vrot.lane.b32.xlu0 %v4352_v13, %s4370_s25  ;;  %v1583_v37 = vsel %vm1577_vm3, %v4863_v5, 0.0 }
0x25e9   :  { %252 = vrot.lane.b32.xlu1 %v240_v0, %s4371_s26  ;;  %v463_v0 = vsel %vm457_vm6, %v4600_v21, 0.0  ;;  %vm5470_vm6 = vcmp.eq.s32.totalorder %v5110_v14, 1 }
0x25ea   :  { %v2702_v21 = vsel %vm5470_vm6, %v5132_v45, 0.0 }
0x25ed   :  { %699 = vrot.lane.b32.xlu1 %v687_v18, %s4371_s26  ;;  %v4354_v11 = vpop.eup %4353  ;;  %v911_v18 = vsel %vm905_vm10, %v4698_v35, 0.0  ;;  %vm5471_vm10 = vcmp.eq.s32.totalorder %v5208_v15, 1 }
0x25ee   :  { %v1772_v52 = vadd.f32 1.0, %v4354_v11  ;;  %v3150_v20 = vsel %vm5471_vm10, %v5227_v49, 0.0 }
0x25f1   :  { %1147 = vrot.lane.b32.xlu1 %v1135_v57, %s4371_s26  ;;  %v1359_v57 = vsel %vm1353_vm14, %v4795_v48, 0.0 }
0x25f5   :  { %1595 = vrot.lane.b32.xlu1 %v1583_v37, %s4371_s26 }
0x25f9   :  { %2042 = vrot.lane.b32.xlu1 %v2029_v33, %s4370_s25 }
0x25fd   :  { %2491 = vrot.lane.b32.xlu1 %v2478_v40, %s4370_s25 }
0x2601   :  { %2939 = vrot.lane.b32.xlu1 %v2926_v41, %s4370_s25 }
0x2605   :  { %3387 = vrot.lane.b32.xlu1 %v3374_v54, %s4370_s25 }
0x261e   :  { %v3549_v12 = vpop.f32.mrf.mxu1 }
0x2620   :  { %v4230_v42 = vpop.f32.mrf.mxu1 }
0x264b   :  { %v3569_v26 = vpop.permute.xlu1 %3568 }
0x2653   :  { %v3377_v16 = vpop.permute.xlu0 %3376 }
0x2654   :  { %3379 = vst.msk [vmem:[#allocation4] sm:$0x3] %vm29_vm0, %v3377_v16 }
0x2657   :  { %v1783_v28 = vpop.permute.xlu0 %1782 }
0x2658   :  { %v5348_v5 = vpop.permute.xlu1 %1799 }
0x2659   :  { %vm1801_vm4 = vcmp.eq.s32.totalorder %v5348_v5, 1 }
0x265b   :  { %v3396_v6 = vld [vmem:[#allocation4] sm:$0x3] }
0x265c   :  { %v5350_v24 = vpop.permute.xlu1 %3590  ;;  %4218 = vmatmul.mubr.msk.f32.vlgmr.msra.gmra.mxu0 %vm48_vm1, %v3396_v6 }
0x265d   :  { %vm3592_vm8 = vcmp.eq.s32.totalorder %v5350_v24, 1 }
0x2660   :  { %v1803_v9 = vpop.permute.xlu1 %1802 }
0x2664   :  { %v253_v32 = vpop.permute.xlu1 %252 }
0x2665   :  { %255 = vst.msk [vmem:[#allocation6] sm:$0x3] %vm29_vm0, %v253_v32 }
0x2668   :  { %v700_v4 = vpop.permute.xlu1 %699 }
0x2669   :  { %703 = vst.msk [vmem:[#allocation6 + $0x4] sm:$0x3] %vm29_vm0, %v700_v4 }
0x266c   :  { %v1148_v2 = vpop.permute.xlu1 %1147 }
0x266d   :  { %1151 = vst.msk [vmem:[#allocation6 + $0x8] sm:$0x3] %vm29_vm0, %v1148_v2 }
0x2670   :  { %v1596_v55 = vpop.permute.xlu1 %1595 }
0x2671   :  { %1599 = vst.msk [vmem:[#allocation6 + $0xc] sm:$0x3] %vm29_vm0, %v1596_v55 }
0x2674   :  { %v2043_v35 = vpop.permute.xlu1 %2042 }
0x2678   :  { %v2492_v31 = vpop.permute.xlu1 %2491 }
0x267c   :  { %v2940_v48 = vpop.permute.xlu1 %2939 }
0x2680   :  { %v3388_v30 = vpop.permute.xlu1 %3387 }
0x271c   :  { %v3476_v19 = vpop.f32.mrf.mxu0 }
0x271d   :  { %v3550_v22 = vadd.f32 %v3549_v12, %v3476_v19  ;;  %v2713_v12 = vld [vmem:[#allocation6 + $0x8] sm:$0x3] }
0x271e   :  { %v4219_v1 = vpop.f32.mrf.mxu0 }
0x271f   :  { %v3559_v23 = vadd.f32 %v3717_v17, %v3550_v22  ;;  %v3161_v17 = vld [vmem:[#allocation6 + $0x4] sm:$0x3] }
0x2721   :  { %4355 = vtanh.f32 %v3559_v23  ;;  %v3718_v43 = vmul.f32 -1.442695, %v3559_v23 }
0x2722   :  { %4357 = vrcp.f32 %v1772_v52  ;;  %v3609_v52 = vld [vmem:[#allocation6] sm:$0x3] }
0x2723   :  { %4359 = vpow2.f32 %v3718_v43 }
0x272e   :  { %v4356_v3 = vpop.eup %4355 }
0x272f   :  { %3573 = vrot.lane.b32.xlu0 %v4356_v3, %s4370_s25  ;;  %v4358_v7 = vpop.eup %4357 }
0x2730   :  { %v1785_v34 = vmul.f32 %v4358_v7, %v1783_v28  ;;  %v4360_v46 = vpop.eup %4359  ;;  %v1780_v53 = vmul.f32 %v4358_v7, %v1778_v56 }
0x2731   :  { %v3563_v47 = vadd.f32 1.0, %v4360_v46 }
0x2733   :  { %1787 = vrot.lane.b32.xlu0 %v1785_v34, %s4371_s26  ;;  %4361 = vrcp.f32 %v3563_v47 }
0x2740   :  { %v4362_v50 = vpop.eup %4361 }
0x2741   :  { %v3571_v36 = vmul.f32 %v4362_v50, %v3569_v26 }
0x27a1   :  { %v3574_v44 = vpop.permute.xlu0 %3573 }
0x27a2   :  { %v3576_v51 = vmul.f32 %v4362_v50, %v3574_v44 }
0x27a4   :  { %3578 = vrot.lane.b32.xlu0 %v3576_v51, %s4371_s26 }
0x27a5   :  { %v1788_v25 = vpop.permute.xlu0 %1787 }
0x27a6   :  { %v1790_v8 = vadd.f32 %v1788_v25, %v1780_v53 }
0x27a8   :  { %4363 = vtanh.f32 %v1790_v8  ;;  %v1806_v27 = vsel %vm1801_vm4, %v1790_v8, %v1778_v56 }
0x27b5   :  { %v4364_v29 = vpop.eup %4363 }
0x27b6   :  { %1793 = vrot.lane.b32.xlu0 %v4364_v29, %s4370_s25 }
0x2816   :  { %v3579_v58 = vpop.permute.xlu0 %3578 }
0x2817   :  { %v3581_v59 = vadd.f32 %v3579_v58, %v3571_v36 }
0x2819   :  { %4365 = vtanh.f32 %v3581_v59  ;;  %v3597_v38 = vsel %vm3592_vm8, %v3581_v59, %v3569_v26 }
0x2826   :  { %v4366_v39 = vpop.eup %4365 }
0x2827   :  { %3584 = vrot.lane.b32.xlu0 %v4366_v39, %s4370_s25 }
0x2828   :  { %v1794_v60 = vpop.permute.xlu0 %1793 }
0x2829   :  { %v1796_v62 = vmul.f32 %v4358_v7, %v1794_v60 }
0x282b   :  { %3593 = vrot.lane.b32.xlu0 %v3396_v6, %s4372_s29  ;;  %v1805_v13 = vsel %vm1801_vm4, %v1796_v62, %v1803_v9  ;;  %v1807_v37 = vsel %vm1801_vm4, %v1796_v62, 0.0  ;;  %v2265_v9 = vld [vmem:[#allocation6 + $0xc] sm:$0x3] }
0x282c   :  { %1809 = vrot.lane.b32.xlu1 %v1805_v13, %s4371_s26 }
0x282f   :  { %475 = vrot.lane.b32.xlu0 %v463_v0, %s4371_s26 }
0x2833   :  { %923 = vrot.lane.b32.xlu0 %v911_v18, %s4371_s26 }
0x2837   :  { %1371 = vrot.lane.b32.xlu0 %v1359_v57, %s4371_s26 }
0x283b   :  { %1819 = vrot.lane.b32.xlu0 %v1807_v37, %s4371_s26 }
0x283f   :  { %2267 = vrot.lane.b32.xlu0 %v2254_v61, %s4370_s25 }
0x2843   :  { %2715 = vrot.lane.b32.xlu0 %v2702_v21, %s4370_s25 }
0x2847   :  { %3163 = vrot.lane.b32.xlu0 %v3150_v20, %s4370_s25 }
0x284b   :  { %1814 = vrot.lane.b32.xlu0 %v1806_v27, %s4372_s29 }
0x2899   :  { %v3585_v10 = vpop.permute.xlu0 %3584 }
0x289a   :  { %v3587_v33 = vmul.f32 %v4362_v50, %v3585_v10 }
0x289c   :  { %v3598_v14 = vsel %vm3592_vm8, %v3587_v33, 0.0 }
0x289d   :  { %3611 = vrot.lane.b32.xlu0 %v3598_v14, %s4370_s25  ;;  %v3594_v45 = vpop.permute.xlu0 %3593 }
0x289e   :  { %v3596_v15 = vsel %vm3592_vm8, %v3587_v33, %v3594_v45  ;;  %v1810_v49 = vpop.permute.xlu1 %1809 }
0x289f   :  { %1812 = vst.msk [vmem:[#allocation2] sm:$0x3] %vm29_vm0, %v1810_v49  ;;  %3600 = vrot.lane.b32.xlu1 %v3596_v15, %s4371_s26 }
0x28a1   :  { %3605 = vrot.lane.b32.xlu0 %v3597_v38, %s4372_s29  ;;  %v476_v40 = vpop.permute.xlu0 %475 }
0x28a2   :  { %479 = vst.msk [vmem:[#allocation6 + $0x2] sm:$0x3] %vm29_vm0, %v476_v40 }
0x28a5   :  { %v924_v41 = vpop.permute.xlu0 %923 }
0x28a6   :  { %927 = vst.msk [vmem:[#allocation6 + $0x6] sm:$0x3] %vm29_vm0, %v924_v41 }
0x28a9   :  { %v3385_v54 = vld [vmem:[#allocation6 + $0x2] sm:$0x3]  ;;  %v1372_v56 = vpop.permute.xlu0 %1371 }
0x28aa   :  { %v3390_v16 = vsel %vm48_vm1, %v3385_v54, %v3388_v30  ;;  %1375 = vst.msk [vmem:[#allocation6 + $0xa] sm:$0x3] %vm29_vm0, %v1372_v56 }
0x28ab   :  { %3714 = vst.msk [vmem:[%s5467_s8 + $0x2] sm:$0x3] %vm2047_vm12, %v3390_v16 }
0x28ad   :  { %v2937_v26 = vld [vmem:[#allocation6 + $0x6] sm:$0x3]  ;;  %v1820_v5 = vpop.permute.xlu0 %1819 }
0x28ae   :  { %v2942_v6 = vsel %vm48_vm1, %v2937_v26, %v2940_v48  ;;  %1823 = vst.msk [vmem:[#allocation6 + $0xe] sm:$0x3] %vm29_vm0, %v1820_v5 }
0x28af   :  { %3700 = vst.msk [vmem:[%s5467_s8 + $0x6] sm:$0x3] %vm2047_vm12, %v2942_v6 }
0x28b1   :  { %v2489_v24 = vld [vmem:[#allocation6 + $0xa] sm:$0x3]  ;;  %v2268_v32 = vpop.permute.xlu0 %2267 }
0x28b2   :  { %v2494_v4 = vsel %vm48_vm1, %v2489_v24, %v2492_v31  ;;  %v2270_v2 = vsel %vm48_vm1, %v2265_v9, %v2268_v32 }
0x28b3   :  { %3686 = vst.msk [vmem:[%s5467_s8 + $0xa] sm:$0x3] %vm2047_vm12, %v2494_v4  ;;  %3679 = vst.msk [vmem:[%s5467_s8 + $0xc] sm:$0x3] %vm2047_vm12, %v2270_v2 }
0x28b5   :  { %v2040_v55 = vld [vmem:[#allocation6 + $0xe] sm:$0x3]  ;;  %v2716_v42 = vpop.permute.xlu0 %2715 }
0x28b6   :  { %v2045_v63 = vsel %vm48_vm1, %v2040_v55, %v2043_v35  ;;  %v2718_v11 = vsel %vm48_vm1, %v2713_v12, %v2716_v42 }
0x28b7   :  { %3672 = vst.msk [vmem:[%s5467_s8 + $0xe] sm:$0x3] %vm2047_vm12, %v2045_v63  ;;  %3693 = vst.msk [vmem:[%s5467_s8 + $0x8] sm:$0x3] %vm2047_vm12, %v2718_v11 }
0x28b9   :  { %v3164_v19 = vpop.permute.xlu0 %3163 }
0x28ba   :  { %v3166_v22 = vsel %vm48_vm1, %v3161_v17, %v3164_v19 }
0x28bb   :  { %3707 = vst.msk [vmem:[%s5467_s8 + $0x4] sm:$0x3] %vm2047_vm12, %v3166_v22 }
0x28bd   :  { %v1815_v1 = vpop.permute.xlu0 %1814 }
0x28be   :  { %1817 = vst.msk [vmem:[#allocation3] sm:$0x3] %vm29_vm0, %v1815_v1 }
0x290f   :  { %v3612_v23 = vpop.permute.xlu0 %3611 }
0x2910   :  { %v3614_v3 = vsel %vm48_vm1, %v3609_v52, %v3612_v23 }
0x2911   :  { %3615 = vst.msk [vmem:[%s5467_s8] sm:$0x3] %vm2047_vm12, %v3614_v3  ;;  %v3601_v28 = vpop.permute.xlu1 %3600 }
0x2912   :  { %3603 = vst.msk [vmem:[#allocation4] sm:$0x3] %vm29_vm0, %v3601_v28 }
0x2913   :  { %v3606_v7 = vpop.permute.xlu0 %3605 }
0x2914   :  { %3608 = vst.msk [vmem:[#allocation5] sm:$0x3] %vm29_vm0, %v3606_v7 }

</bundles_post_ra>
